<compile_context>
chip_gen: v7x
topology: tpu7x:2x2x1
jax: 0.10.0
libtpu: 0.0.40
codegen_flags: <defaults>
</compile_context>

<pallas_src>
import jax
import jax.numpy as jnp
from jax.experimental import pallas as pl
from jax.experimental.pallas import tpu as pltpu


P_DROP = 0.2
N_PAD = 128          # lane-padded output width (true output width is 10)
HIDDEN = 512
IN_FEATURES = 784
OUT_FEATURES = 10


def mlp_kernel(x_ref, u_ref, w1_ref, b1_ref, w2_ref, b2_ref, o_ref):
    # ---- first linear: [TB,784] @ [784,512] + [1,512] ----
    h = jnp.dot(x_ref[...], w1_ref[...], preferred_element_type=jnp.float32) + b1_ref[...]

    # ---- ReLU ----
    h = jnp.maximum(h, 0.0)

    # ---- Dropout(p=0.2): keep mask from host-side uniforms; 1/(1-p) scale is folded
    #      into w2 on the host, so this is just one compare + one select on the VPU. ----
    keep = u_ref[...] >= P_DROP
    h = jnp.where(keep, h, 0.0)

    # ---- projection: [TB,512] @ [512,128] + [1,128] (lane-padded; cols 10..127 are 0) ----
    logits = jnp.dot(h, w2_ref[...], preferred_element_type=jnp.float32) + b2_ref[...]

    # ---- sigmoid (EUP exp path on TPU) ----
    out = jax.nn.sigmoid(logits)

    # ---- round to 4 decimals (round-half-to-even, same as torch.round) ----
    o_ref[...] = jnp.round(out * 1e4) * 1e-4


def digit_classifier_forward(images, w1, b1, w2, b2, dropout_key, *, tile_b=256):
    """images: [B, 784] f32; w1: [784, 512]; b1: [512] or [1,512];
    w2: [512, 10]; b2: [10] or [1,10].  Returns [B, 10] f32."""
    B = images.shape[0]
    Bp = ((B + tile_b - 1) // tile_b) * tile_b

    # Pad batch to a multiple of the tile (padded rows are sliced off at the end).
    if Bp != B:
        images = jnp.pad(images, ((0, Bp - B), (0, 0)))

    b1 = jnp.reshape(b1, (1, HIDDEN)).astype(jnp.float32)
    # Lane-pad w2/b2 to 128 columns and fold the dropout 1/(1-p) scale into w2 (exact).
    scale = 1.0 / (1.0 - P_DROP)
    w2p = jnp.zeros((HIDDEN, N_PAD), jnp.float32).at[:, :OUT_FEATURES].set(
        w2.astype(jnp.float32) * scale)
    b2p = jnp.zeros((1, N_PAD), jnp.float32).at[:, :OUT_FEATURES].set(
        jnp.reshape(b2, (1, OUT_FEATURES)).astype(jnp.float32))

    # Deterministic dropout uniforms, one per hidden activation, tiled with the batch.
    u = jax.random.uniform(dropout_key, (Bp, HIDDEN), jnp.float32)

    grid = (Bp // tile_b,)
    compiler_params = None
    if jax.default_backend() == "tpu":
        compiler_params = pltpu.CompilerParams(dimension_semantics=("parallel",))

    out = pl.pallas_call(
        mlp_kernel,
        out_shape=jax.ShapeDtypeStruct((Bp, N_PAD), jnp.float32),
        grid=grid,
        in_specs=[
            pl.BlockSpec((tile_b, IN_FEATURES), lambda i: (i, 0)),   # x tile
            pl.BlockSpec((tile_b, HIDDEN), lambda i: (i, 0)),        # dropout uniforms
            pl.BlockSpec((IN_FEATURES, HIDDEN), lambda i: (0, 0)),   # w1 (resident)
            pl.BlockSpec((1, HIDDEN), lambda i: (0, 0)),             # b1 (resident)
            pl.BlockSpec((HIDDEN, N_PAD), lambda i: (0, 0)),         # w2 padded (resident)
            pl.BlockSpec((1, N_PAD), lambda i: (0, 0)),              # b2 padded (resident)
        ],
        out_specs=pl.BlockSpec((tile_b, N_PAD), lambda i: (i, 0)),
        compiler_params=compiler_params,
    )(images, u, w1.astype(jnp.float32), b1, w2p, b2p)

    return out[:B, :OUT_FEATURES]


def init_params(key):
    """Deterministic parameter init mirroring nn.Linear shapes (weights pre-transposed)."""
    k1, k2, k3, k4 = jax.random.split(key, 4)
    bound1 = 1.0 / (IN_FEATURES ** 0.5)
    bound2 = 1.0 / (HIDDEN ** 0.5)
    w1 = jax.random.uniform(k1, (IN_FEATURES, HIDDEN), jnp.float32, -bound1, bound1)
    b1 = jax.random.uniform(k2, (1, HIDDEN), jnp.float32, -bound1, bound1)
    w2 = jax.random.uniform(k3, (HIDDEN, OUT_FEATURES), jnp.float32, -bound2, bound2)
    b2 = jax.random.uniform(k4, (1, OUT_FEATURES), jnp.float32, -bound2, bound2)
    return w1, b1, w2, b2


if __name__ == "__main__":
    key = jax.random.PRNGKey(0)
    k_params, k_x, k_drop = jax.random.split(key, 3)

    w1, b1, w2, b2 = init_params(k_params)

    B = 2
    images = jax.random.normal(k_x, (B, IN_FEATURES), jnp.float32)

    out = digit_classifier_forward(images, w1, b1, w2, b2, k_drop)
    out = jax.block_until_ready(out)

    assert out.shape == (B, OUT_FEATURES) and out.dtype == jnp.float32
    # sanity: sigmoid output rounded to 4 decimals stays in [0, 1]
    assert bool(jnp.all(out >= 0.0)) and bool(jnp.all(out <= 1.0))
    # sanity: values are actually rounded to 4 decimals
    assert bool(jnp.all(jnp.abs(out * 1e4 - jnp.round(out * 1e4)) < 1e-3))

    print("KERNEL_OK")
</pallas_src>

<mosaic_0001>
module attributes {stable_mosaic.version = 11 : i64} {
  func.func @mlp_kernel(%arg0: i32, %arg1: memref<256x784xf32, #tpu.memory_space<vmem>>, %arg2: memref<256x512xf32, #tpu.memory_space<vmem>>, %arg3: memref<784x512xf32, #tpu.memory_space<vmem>>, %arg4: memref<1x512xf32, #tpu.memory_space<vmem>>, %arg5: memref<512x128xf32, #tpu.memory_space<vmem>>, %arg6: memref<1x128xf32, #tpu.memory_space<vmem>>, %arg7: memref<256x128xf32, #tpu.memory_space<vmem>>) attributes {dimension_semantics = [#tpu.dimension_semantics<arbitrary>], iteration_bounds = array<i64: 1>, scalar_prefetch = 0 : i64, scratch_operands = 0 : i64, tpu.core_type = #tpu.core_type<tc>, window_params = [{transform_indices = @transform_0, window_bounds = array<i64: 256, 784>}, {transform_indices = @transform_1, window_bounds = array<i64: 256, 512>}, {pipeline_mode = #tpu.pipeline_mode<synchronous>, transform_indices = @transform_2, window_bounds = array<i64: 784, 512>}, {pipeline_mode = #tpu.pipeline_mode<synchronous>, transform_indices = @transform_3, window_bounds = array<i64: 1, 512>}, {pipeline_mode = #tpu.pipeline_mode<synchronous>, transform_indices = @transform_4, window_bounds = array<i64: 512, 128>}, {pipeline_mode = #tpu.pipeline_mode<synchronous>, transform_indices = @transform_5, window_bounds = array<i64: 1, 128>}, {transform_indices = @transform_6, window_bounds = array<i64: 256, 128>}]} {
    %c0 = arith.constant 0 : index
    %c0_0 = arith.constant 0 : index
    %0 = vector.load %arg1[%c0, %c0_0] : memref<256x784xf32, #tpu.memory_space<vmem>>, vector<256x784xf32>
    %c0_1 = arith.constant 0 : index
    %c0_2 = arith.constant 0 : index
    %1 = vector.load %arg3[%c0_1, %c0_2] : memref<784x512xf32, #tpu.memory_space<vmem>>, vector<784x512xf32>
    %cst = arith.constant dense<0.000000e+00> : vector<256x512xf32>
    %2 = tpu.matmul %0, %1, %cst {dimension_numbers = #tpu.dot_dimension_numbers<[1], [0], [0], [1], [0, 0, 1, 1], [], []>} : vector<256x784xf32>, vector<784x512xf32>, vector<256x512xf32> -> vector<256x512xf32>
    %c0_3 = arith.constant 0 : index
    %c0_4 = arith.constant 0 : index
    %3 = vector.load %arg4[%c0_3, %c0_4] : memref<1x512xf32, #tpu.memory_space<vmem>>, vector<1x512xf32>
    %4 = vector.broadcast %3 : vector<1x512xf32> to vector<256x512xf32>
    %5 = arith.addf %2, %4 : vector<256x512xf32>
    %cst_5 = arith.constant 0.000000e+00 : f32
    %6 = vector.broadcast %cst_5 : f32 to vector<256x512xf32>
    %7 = arith.maximumf %5, %6 : vector<256x512xf32>
    %c0_6 = arith.constant 0 : index
    %c0_7 = arith.constant 0 : index
    %8 = vector.load %arg2[%c0_6, %c0_7] : memref<256x512xf32, #tpu.memory_space<vmem>>, vector<256x512xf32>
    %cst_8 = arith.constant 2.000000e-01 : f32
    %9 = vector.broadcast %cst_8 : f32 to vector<256x512xf32>
    %10 = arith.cmpf oge, %8, %9 : vector<256x512xf32>
    %cst_9 = arith.constant 0.000000e+00 : f32
    %11 = vector.broadcast %cst_9 : f32 to vector<256x512xf32>
    %12 = arith.select %10, %7, %11 : vector<256x512xi1>, vector<256x512xf32>
    %c0_10 = arith.constant 0 : index
    %c0_11 = arith.constant 0 : index
    %13 = vector.load %arg5[%c0_10, %c0_11] : memref<512x128xf32, #tpu.memory_space<vmem>>, vector<512x128xf32>
    %cst_12 = arith.constant dense<0.000000e+00> : vector<256x128xf32>
    %14 = tpu.matmul %12, %13, %cst_12 {dimension_numbers = #tpu.dot_dimension_numbers<[1], [0], [0], [1], [0, 0, 1, 1], [], []>} : vector<256x512xf32>, vector<512x128xf32>, vector<256x128xf32> -> vector<256x128xf32>
    %c0_13 = arith.constant 0 : index
    %c0_14 = arith.constant 0 : index
    %15 = vector.load %arg6[%c0_13, %c0_14] : memref<1x128xf32, #tpu.memory_space<vmem>>, vector<1x128xf32>
    %16 = vector.broadcast %15 : vector<1x128xf32> to vector<256x128xf32>
    %17 = arith.addf %14, %16 : vector<256x128xf32>
    %18 = arith.negf %17 : vector<256x128xf32>
    %19 = math.exp %18 : vector<256x128xf32>
    %cst_15 = arith.constant 1.000000e+00 : f32
    %20 = vector.broadcast %cst_15 : f32 to vector<256x128xf32>
    %21 = arith.addf %20, %19 : vector<256x128xf32>
    %22 = arith.divf %20, %21 : vector<256x128xf32>
    %cst_16 = arith.constant 1.000000e+04 : f32
    %23 = vector.broadcast %cst_16 : f32 to vector<256x128xf32>
    %24 = arith.mulf %22, %23 : vector<256x128xf32>
    %25 = math.roundeven %24 : vector<256x128xf32>
    %cst_17 = arith.constant 9.99999974E-5 : f32
    %26 = vector.broadcast %cst_17 : f32 to vector<256x128xf32>
    %27 = arith.mulf %25, %26 : vector<256x128xf32>
    %c0_18 = arith.constant 0 : index
    %c0_19 = arith.constant 0 : index
    %28 = vector.load %arg7[%c0_18, %c0_19] : memref<256x128xf32, #tpu.memory_space<vmem>>, vector<256x128xf32>
    tpu.vector_store %arg7[%c0_18, %c0_19], %27 {strides = array<i32>} : memref<256x128xf32, #tpu.memory_space<vmem>>, vector<256x128xf32>,
    return
  }
  func.func @transform_0(%arg0: i32) -> (i32, i32) {
    %c0_i32 = arith.constant 0 : i32
    %c0_i32_0 = arith.constant 0 : i32
    return %arg0, %c0_i32 : i32, i32
  }
  func.func @transform_1(%arg0: i32) -> (i32, i32) {
    %c0_i32 = arith.constant 0 : i32
    %c0_i32_0 = arith.constant 0 : i32
    return %arg0, %c0_i32 : i32, i32
  }
  func.func @transform_2(%arg0: i32) -> (i32, i32) {
    %c0_i32 = arith.constant 0 : i32
    %c0_i32_0 = arith.constant 0 : i32
    %c0_i32_1 = arith.constant 0 : i32
    return %c0_i32, %c0_i32_0 : i32, i32
  }
  func.func @transform_3(%arg0: i32) -> (i32, i32) {
    %c0_i32 = arith.constant 0 : i32
    %c0_i32_0 = arith.constant 0 : i32
    %c0_i32_1 = arith.constant 0 : i32
    return %c0_i32, %c0_i32_0 : i32, i32
  }
  func.func @transform_4(%arg0: i32) -> (i32, i32) {
    %c0_i32 = arith.constant 0 : i32
    %c0_i32_0 = arith.constant 0 : i32
    %c0_i32_1 = arith.constant 0 : i32
    return %c0_i32, %c0_i32_0 : i32, i32
  }
  func.func @transform_5(%arg0: i32) -> (i32, i32) {
    %c0_i32 = arith.constant 0 : i32
    %c0_i32_0 = arith.constant 0 : i32
    %c0_i32_1 = arith.constant 0 : i32
    return %c0_i32, %c0_i32_0 : i32, i32
  }
  func.func @transform_6(%arg0: i32) -> (i32, i32) {
    %c0_i32 = arith.constant 0 : i32
    %c0_i32_0 = arith.constant 0 : i32
    return %arg0, %c0_i32 : i32, i32
  }
}

</mosaic_0001>

<bundles_post_ra>
// kernel: tpu_custom_call.1
= control target key start
LH: loop header
LB: loop body
LE: loop exit
PB: predicated region body
PF: predicated region fallthrough
CT: control target
= control target key end

     0   :  { %11 = vsyncpa [#allocation3], 0  ;;  %s9165_s0 = inlined_call_operand.vmem [shape: f32[256,784], index: 0, kind: input, shape index: {}]   ;;  %s9166_s1 = inlined_call_operand.hbm [shape: f32[256,512], index: 1, kind: input, shape index: {}]   ;;  %s9167_s2 = inlined_call_operand.vmem [shape: f32[784,512], index: 2, kind: input, shape index: {}]   ;;  %s9168_s3 = inlined_call_operand.vmem [shape: f32[1,512], index: 3, kind: input, shape index: {}]   ;;  %s9169_s4 = inlined_call_operand.hbm [shape: f32[512,128], index: 4, kind: input, shape index: {}]   ;;  %s9170_s5 = inlined_call_operand.vmem [shape: f32[1,128], index: 5, kind: input, shape index: {}]   ;;  %s9171_s6 = inlined_call_operand.hbm [shape: f32[256,128], index: 6, kind: output, shape index: {}]  }
   0x1   :  { %12 = vsyncpa [#allocation6], 0 }
   0x2   :  { %13 = vsyncpa [#allocation4], 0  ;;  %s5948_s21 = smov [#allocation2]   ;;  %s5876_s25 = scalar_lea.hbm %s9166_s1, 16384 }
   0x3   :  { %s21_s22 = sshll.u32 %s5948_s21, 4  ;;  %p5877_p0 = scmp.ne.s32.totalorder %s9166_s1, %s5876_s25  ;;  %s22_s22 = int_to_ptr.vmem [resolvable:$true] %s21_s22 }
   0x4   :  { %p5880_p1 = scmp.lt.u32.totalorder %s5876_s25, %s9166_s1 }
   0x6   :  { %p5882_p2 = pnand %p5880_p1, %p5877_p0 }
   0x8   :  { %5885 = shalt.err (!%p5882_p2)
}
   0x9   :  { %s5886_s30 = scalar_lea.vmem %s22_s22, 16384  ;;  %p5891_p4 = scmp.lt.s32.totalorder %s22_s22, %s22_s22 }
   0xa   :  { %p5887_p3 = scmp.ne.s32.totalorder %s22_s22, %s5886_s30  ;;  %p5892_p5 = scmp.lt.s32.totalorder %s5886_s30, %s5886_s30 }
   0xc   :  { %p5893_p6 = por %p5892_p5, %p5891_p4 }
   0xe   :  { %p5894_p7 = pnand %p5893_p6, %p5887_p3 }
  0x10   :  { %5897 = shalt.err (!%p5894_p7)
}
  0x11   :  { %s5949_s7 = smov 512   ;;  %s5950_s8 = smov 32  }
  0x12   :  { %27 = dma.hbm_to_vmem [thread:$0]  %s9166_s1, 16384, %s22_s22, [#allocation3], %s5949_s7, %s5949_s7, %s5950_s8  }
  0x13   :  { %s5951_s11 = smov [#allocation5]   ;;  %s5898_s15 = scalar_lea.hbm %s9169_s4, 8192 }
  0x14   :  { %s37_s12 = sshll.u32 %s5951_s11, 4  ;;  %p5899_p8 = scmp.ne.s32.totalorder %s9169_s4, %s5898_s15  ;;  %s38_s12 = int_to_ptr.vmem [resolvable:$true] %s37_s12 }
  0x15   :  { %p5902_p9 = scmp.lt.u32.totalorder %s5898_s15, %s9169_s4 }
  0x17   :  { %p5904_p10 = pnand %p5902_p9, %p5899_p8 }
  0x19   :  { %5907 = shalt.err (!%p5904_p10)
}
  0x1a   :  { %s5908_s20 = scalar_lea.vmem %s38_s12, 8192  ;;  %p5913_p12 = scmp.lt.s32.totalorder %s38_s12, %s38_s12 }
  0x1b   :  { %p5909_p11 = scmp.ne.s32.totalorder %s38_s12, %s5908_s20  ;;  %p5914_p13 = scmp.lt.s32.totalorder %s5908_s20, %s5908_s20 }
  0x1d   :  { %p5915_p0 = por %p5914_p13, %p5913_p12 }
  0x1f   :  { %p5916_p1 = pnand %p5915_p0, %p5909_p11 }
  0x21   :  { %5919 = shalt.err (!%p5916_p1)
}
  0x22   :  { %s5952_s1 = smov 128   ;;  %s5953_s21 = smov 8  }
  0x23   :  { %43 = dma.hbm_to_vmem [thread:$0]  %s9169_s4, 8192, %s38_s12, [#allocation6], %s5952_s1, %s5952_s1, %s5953_s21  }
  0x24   :  { %5942 = dma.done.wait [#allocation3], 16384  }
  0x25   :  { %5943 = vsyncadd [#allocation3], 4294950912 }
  0x26   :  { %5944 = dma.done.wait [#allocation6], 8192  }
  0x27   :  { %5945 = vsyncadd [#allocation6], 4294959104  ;;  %v277_v0 = vld [vmem:[%s9167_s2 + $0x8] sm:$0xff]  ;;  %v276_v5 = vld [vmem:[%s9167_s2] sm:$0xff]  ;;  %vm690_vm0 = vcmask 130048  }
  0x28   :  { %v281_v1 = vld [vmem:[%s9167_s2 + $0x28] sm:$0xff]  ;;  %v280_v6 = vld [vmem:[%s9167_s2 + $0x20] sm:$0xff] }
  0x29   :  { %v405_v2 = vld [vmem:[%s9167_s2 + $0x408] sm:$0xff]  ;;  %v4439_v3 = vpack.c.bf16 %v281_v1, %v277_v0  ;;  %v4441_v8 = vpack.c.bf16 %v280_v6, %v276_v5  ;;  %v404_v9 = vld [vmem:[%s9167_s2 + $0x400] sm:$0xff] }
  0x2a   :  { %v409_v4 = vld [vmem:[%s9167_s2 + $0x428] sm:$0xff]  ;;  %v408_v10 = vld [vmem:[%s9167_s2 + $0x420] sm:$0xff] }
  0x2b   :  { %v4503_v7 = vpack.c.bf16 %v409_v4, %v405_v2  ;;  %v285_v11 = vld [vmem:[%s9167_s2 + $0x48] sm:$0xff]  ;;  %4440 = vmatprep.subr.bf16.mxu1 %v4439_v3  ;;  %v4505_v12 = vpack.c.bf16 %v408_v10, %v404_v9  ;;  %v284_v18 = vld [vmem:[%s9167_s2 + $0x40] sm:$0xff] }
  0x2c   :  { %v289_v13 = vld [vmem:[%s9167_s2 + $0x68] sm:$0xff]  ;;  %4442 = vmatpush1.bf16.msra.mxu1 %v4441_v8  ;;  %v288_v19 = vld [vmem:[%s9167_s2 + $0x60] sm:$0xff] }
  0x2d   :  { %v413_v14 = vld [vmem:[%s9167_s2 + $0x448] sm:$0xff]  ;;  %4504 = vmatprep.subr.bf16.mxu0 %v4503_v7  ;;  %v4443_v16 = vpack.c.bf16 %v289_v13, %v285_v11  ;;  %v412_v20 = vld [vmem:[%s9167_s2 + $0x440] sm:$0xff]  ;;  %v4445_v21 = vpack.c.bf16 %v288_v19, %v284_v18 }
  0x2e   :  { %v417_v15 = vld [vmem:[%s9167_s2 + $0x468] sm:$0xff]  ;;  %4506 = vmatpush1.bf16.msra.mxu0 %v4505_v12  ;;  %v416_v22 = vld [vmem:[%s9167_s2 + $0x460] sm:$0xff] }
  0x2f   :  { %v4507_v17 = vpack.c.bf16 %v417_v15, %v413_v14  ;;  %v293_v23 = vld [vmem:[%s9167_s2 + $0x88] sm:$0xff]  ;;  %4444 = vmatprep.subr.bf16.mxu1 %v4443_v16  ;;  %v4509_v25 = vpack.c.bf16 %v416_v22, %v412_v20  ;;  %v292_v29 = vld [vmem:[%s9167_s2 + $0x80] sm:$0xff] }
  0x30   :  { %v297_v24 = vld [vmem:[%s9167_s2 + $0xa8] sm:$0xff]  ;;  %v296_v31 = vld [vmem:[%s9167_s2 + $0xa0] sm:$0xff]  ;;  %4446 = vmatpush1.bf16.msra.mxu1 %v4445_v21 }
  0x31   :  { %4508 = vmatprep.subr.bf16.mxu0 %v4507_v17  ;;  %v4447_v26 = vpack.c.bf16 %v297_v24, %v293_v23  ;;  %v421_v27 = vld [vmem:[%s9167_s2 + $0x488] sm:$0xff]  ;;  %v420_v32 = vld [vmem:[%s9167_s2 + $0x480] sm:$0xff]  ;;  %v4449_v34 = vpack.c.bf16 %v296_v31, %v292_v29 }
  0x32   :  { %v425_v28 = vld [vmem:[%s9167_s2 + $0x4a8] sm:$0xff]  ;;  %v424_v33 = vld [vmem:[%s9167_s2 + $0x4a0] sm:$0xff]  ;;  %4510 = vmatpush1.bf16.msra.mxu0 %v4509_v25 }
  0x33   :  { %v4511_v30 = vpack.c.bf16 %v425_v28, %v421_v27  ;;  %v301_v35 = vld [vmem:[%s9167_s2 + $0xc8] sm:$0xff]  ;;  %4448 = vmatprep.subr.bf16.mxu1 %v4447_v26  ;;  %v4513_v38 = vpack.c.bf16 %v424_v33, %v420_v32  ;;  %v300_v41 = vld [vmem:[%s9167_s2 + $0xc0] sm:$0xff] }
  0x34   :  { %v305_v36 = vld [vmem:[%s9167_s2 + $0xe8] sm:$0xff]  ;;  %v304_v42 = vld [vmem:[%s9167_s2 + $0xe0] sm:$0xff]  ;;  %4450 = vmatpush1.bf16.msra.mxu1 %v4449_v34 }
  0x35   :  { %v429_v37 = vld [vmem:[%s9167_s2 + $0x4c8] sm:$0xff]  ;;  %v4451_v39 = vpack.c.bf16 %v305_v36, %v301_v35  ;;  %4512 = vmatprep.subr.bf16.mxu0 %v4511_v30  ;;  %v428_v44 = vld [vmem:[%s9167_s2 + $0x4c0] sm:$0xff]  ;;  %v4453_v50 = vpack.c.bf16 %v304_v42, %v300_v41 }
  0x36   :  { %v433_v40 = vld [vmem:[%s9167_s2 + $0x4e8] sm:$0xff]  ;;  %v432_v45 = vld [vmem:[%s9167_s2 + $0x4e0] sm:$0xff]  ;;  %4514 = vmatpush1.bf16.msra.mxu0 %v4513_v38 }
  0x37   :  { %v4515_v43 = vpack.c.bf16 %v433_v40, %v429_v37  ;;  %v309_v46 = vld [vmem:[%s9167_s2 + $0x108] sm:$0xff]  ;;  %4452 = vmatprep.subr.bf16.mxu1 %v4451_v39  ;;  %v4517_v51 = vpack.c.bf16 %v432_v45, %v428_v44  ;;  %v308_v53 = vld [vmem:[%s9167_s2 + $0x100] sm:$0xff] }
  0x38   :  { %v313_v47 = vld [vmem:[%s9167_s2 + $0x128] sm:$0xff]  ;;  %v312_v54 = vld [vmem:[%s9167_s2 + $0x120] sm:$0xff]  ;;  %4454 = vmatpush1.bf16.msra.mxu1 %v4453_v50 }
  0x39   :  { %v437_v48 = vld [vmem:[%s9167_s2 + $0x508] sm:$0xff]  ;;  %v4455_v52 = vpack.c.bf16 %v313_v47, %v309_v46  ;;  %v436_v55 = vld [vmem:[%s9167_s2 + $0x500] sm:$0xff]  ;;  %4516 = vmatprep.subr.bf16.mxu0 %v4515_v43  ;;  %v4457_v62 = vpack.c.bf16 %v312_v54, %v308_v53 }
  0x3a   :  { %v441_v49 = vld [vmem:[%s9167_s2 + $0x528] sm:$0xff]  ;;  %v440_v57 = vld [vmem:[%s9167_s2 + $0x520] sm:$0xff]  ;;  %4518 = vmatpush1.bf16.msra.mxu0 %v4517_v51 }
  0x3b   :  { %v4519_v56 = vpack.c.bf16 %v441_v49, %v437_v48  ;;  %v317_v58 = vld [vmem:[%s9167_s2 + $0x148] sm:$0xff]  ;;  %4456 = vmatprep.subr.bf16.mxu1 %v4455_v52  ;;  %v4521_v63 = vpack.c.bf16 %v440_v57, %v436_v55  ;;  %v316_v1 = vld [vmem:[%s9167_s2 + $0x140] sm:$0xff] }
  0x3c   :  { %v321_v59 = vld [vmem:[%s9167_s2 + $0x168] sm:$0xff]  ;;  %v320_v2 = vld [vmem:[%s9167_s2 + $0x160] sm:$0xff]  ;;  %4458 = vmatpush1.bf16.msra.mxu1 %v4457_v62 }
  0x3d   :  { %v445_v60 = vld [vmem:[%s9167_s2 + $0x548] sm:$0xff]  ;;  %v4459_v0 = vpack.c.bf16 %v321_v59, %v317_v58  ;;  %v444_v3 = vld [vmem:[%s9167_s2 + $0x540] sm:$0xff]  ;;  %4520 = vmatprep.subr.bf16.mxu0 %v4519_v56  ;;  %v4461_v10 = vpack.c.bf16 %v320_v2, %v316_v1 }
  0x3e   :  { %v449_v61 = vld [vmem:[%s9167_s2 + $0x568] sm:$0xff]  ;;  %v448_v5 = vld [vmem:[%s9167_s2 + $0x560] sm:$0xff]  ;;  %4522 = vmatpush1.bf16.msra.mxu0 %v4521_v63 }
  0x3f   :  { %v4523_v4 = vpack.c.bf16 %v449_v61, %v445_v60  ;;  %v325_v6 = vld [vmem:[%s9167_s2 + $0x188] sm:$0xff]  ;;  %4460 = vmatprep.subr.bf16.mxu1 %v4459_v0  ;;  %v4525_v11 = vpack.c.bf16 %v448_v5, %v444_v3  ;;  %v324_v13 = vld [vmem:[%s9167_s2 + $0x180] sm:$0xff] }
  0x40   :  { %v329_v7 = vld [vmem:[%s9167_s2 + $0x1a8] sm:$0xff]  ;;  %v328_v14 = vld [vmem:[%s9167_s2 + $0x1a0] sm:$0xff]  ;;  %4462 = vmatpush1.bf16.msra.mxu1 %v4461_v10 }
  0x41   :  { %v453_v8 = vld [vmem:[%s9167_s2 + $0x588] sm:$0xff]  ;;  %v4463_v12 = vpack.c.bf16 %v329_v7, %v325_v6  ;;  %v452_v15 = vld [vmem:[%s9167_s2 + $0x580] sm:$0xff]  ;;  %4524 = vmatprep.subr.bf16.mxu0 %v4523_v4  ;;  %v4465_v22 = vpack.c.bf16 %v328_v14, %v324_v13 }
  0x42   :  { %v457_v9 = vld [vmem:[%s9167_s2 + $0x5a8] sm:$0xff]  ;;  %v456_v17 = vld [vmem:[%s9167_s2 + $0x5a0] sm:$0xff]  ;;  %4526 = vmatpush1.bf16.msra.mxu0 %v4525_v11 }
  0x43   :  { %v4527_v16 = vpack.c.bf16 %v457_v9, %v453_v8  ;;  %v333_v18 = vld [vmem:[%s9167_s2 + $0x1c8] sm:$0xff]  ;;  %4464 = vmatprep.subr.bf16.mxu1 %v4463_v12  ;;  %v4529_v23 = vpack.c.bf16 %v456_v17, %v452_v15  ;;  %v332_v25 = vld [vmem:[%s9167_s2 + $0x1c0] sm:$0xff] }
  0x44   :  { %v337_v19 = vld [vmem:[%s9167_s2 + $0x1e8] sm:$0xff]  ;;  %v336_v26 = vld [vmem:[%s9167_s2 + $0x1e0] sm:$0xff]  ;;  %4466 = vmatpush1.bf16.msra.mxu1 %v4465_v22 }
  0x45   :  { %v461_v20 = vld [vmem:[%s9167_s2 + $0x5c8] sm:$0xff]  ;;  %v4467_v24 = vpack.c.bf16 %v337_v19, %v333_v18  ;;  %v460_v27 = vld [vmem:[%s9167_s2 + $0x5c0] sm:$0xff]  ;;  %4528 = vmatprep.subr.bf16.mxu0 %v4527_v16  ;;  %v4469_v34 = vpack.c.bf16 %v336_v26, %v332_v25  ;;  %v55_v19 = vld [vmem:[%s9165_s0 + $0x18] sm:$0xff] }
  0x46   :  { %v465_v21 = vld [vmem:[%s9167_s2 + $0x5e8] sm:$0xff]  ;;  %v464_v29 = vld [vmem:[%s9167_s2 + $0x5e0] sm:$0xff]  ;;  %4530 = vmatpush1.bf16.msra.mxu0 %v4529_v23  ;;  %1108 = vmatprep.mubr.f32.mxu0 %v55_v19  ;;  %v59_v19 = vld [vmem:[%s9165_s0 + $0x38] sm:$0xff] }
  0x47   :  { %v4531_v28 = vpack.c.bf16 %v465_v21, %v461_v20  ;;  %v341_v30 = vld [vmem:[%s9167_s2 + $0x208] sm:$0xff]  ;;  %4468 = vmatprep.subr.bf16.mxu1 %v4467_v24  ;;  %v4533_v35 = vpack.c.bf16 %v464_v29, %v460_v27  ;;  %v340_v37 = vld [vmem:[%s9167_s2 + $0x200] sm:$0xff] }
  0x48   :  { %v345_v31 = vld [vmem:[%s9167_s2 + $0x228] sm:$0xff]  ;;  %v344_v38 = vld [vmem:[%s9167_s2 + $0x220] sm:$0xff]  ;;  %4470 = vmatpush1.bf16.msra.mxu1 %v4469_v34 }
  0x49   :  { %v469_v32 = vld [vmem:[%s9167_s2 + $0x608] sm:$0xff]  ;;  %v4471_v36 = vpack.c.bf16 %v345_v31, %v341_v30  ;;  %v468_v39 = vld [vmem:[%s9167_s2 + $0x600] sm:$0xff]  ;;  %4532 = vmatprep.subr.bf16.mxu0 %v4531_v28  ;;  %v4473_v46 = vpack.c.bf16 %v344_v38, %v340_v37 }
  0x4a   :  { %v473_v33 = vld [vmem:[%s9167_s2 + $0x628] sm:$0xff]  ;;  %v472_v41 = vld [vmem:[%s9167_s2 + $0x620] sm:$0xff]  ;;  %4534 = vmatpush1.bf16.msra.mxu0 %v4533_v35 }
  0x4b   :  { %v4535_v40 = vpack.c.bf16 %v473_v33, %v469_v32  ;;  %v349_v42 = vld [vmem:[%s9167_s2 + $0x248] sm:$0xff]  ;;  %4472 = vmatprep.subr.bf16.mxu1 %v4471_v36  ;;  %v4537_v47 = vpack.c.bf16 %v472_v41, %v468_v39  ;;  %v348_v49 = vld [vmem:[%s9167_s2 + $0x240] sm:$0xff] }
  0x4c   :  { %v353_v43 = vld [vmem:[%s9167_s2 + $0x268] sm:$0xff]  ;;  %v352_v50 = vld [vmem:[%s9167_s2 + $0x260] sm:$0xff]  ;;  %4474 = vmatpush1.bf16.msra.mxu1 %v4473_v46 }
  0x4d   :  { %v477_v44 = vld [vmem:[%s9167_s2 + $0x648] sm:$0xff]  ;;  %v4475_v48 = vpack.c.bf16 %v353_v43, %v349_v42  ;;  %v476_v51 = vld [vmem:[%s9167_s2 + $0x640] sm:$0xff]  ;;  %4536 = vmatprep.subr.bf16.mxu0 %v4535_v40  ;;  %v4477_v58 = vpack.c.bf16 %v352_v50, %v348_v49 }
  0x4e   :  { %v481_v45 = vld [vmem:[%s9167_s2 + $0x668] sm:$0xff]  ;;  %v480_v53 = vld [vmem:[%s9167_s2 + $0x660] sm:$0xff]  ;;  %4538 = vmatpush1.bf16.msra.mxu0 %v4537_v47 }
  0x4f   :  { %v4539_v52 = vpack.c.bf16 %v481_v45, %v477_v44  ;;  %v357_v54 = vld [vmem:[%s9167_s2 + $0x288] sm:$0xff]  ;;  %4476 = vmatprep.subr.bf16.mxu1 %v4475_v48  ;;  %v4541_v59 = vpack.c.bf16 %v480_v53, %v476_v51  ;;  %v356_v61 = vld [vmem:[%s9167_s2 + $0x280] sm:$0xff] }
  0x50   :  { %v361_v55 = vld [vmem:[%s9167_s2 + $0x2a8] sm:$0xff]  ;;  %v360_v62 = vld [vmem:[%s9167_s2 + $0x2a0] sm:$0xff]  ;;  %4478 = vmatpush1.bf16.msra.mxu1 %v4477_v58 }
  0x51   :  { %v485_v56 = vld [vmem:[%s9167_s2 + $0x688] sm:$0xff]  ;;  %v4479_v60 = vpack.c.bf16 %v361_v55, %v357_v54  ;;  %v484_v63 = vld [vmem:[%s9167_s2 + $0x680] sm:$0xff]  ;;  %4540 = vmatprep.subr.bf16.mxu0 %v4539_v52  ;;  %v4481_v6 = vpack.c.bf16 %v360_v62, %v356_v61 }
  0x52   :  { %v489_v57 = vld [vmem:[%s9167_s2 + $0x6a8] sm:$0xff]  ;;  %v488_v1 = vld [vmem:[%s9167_s2 + $0x6a0] sm:$0xff]  ;;  %4542 = vmatpush1.bf16.msra.mxu0 %v4541_v59 }
  0x53   :  { %v4543_v0 = vpack.c.bf16 %v489_v57, %v485_v56  ;;  %v365_v2 = vld [vmem:[%s9167_s2 + $0x2c8] sm:$0xff]  ;;  %v364_v7 = vld [vmem:[%s9167_s2 + $0x2c0] sm:$0xff]  ;;  %4480 = vmatprep.subr.bf16.mxu1 %v4479_v60  ;;  %v4545_v8 = vpack.c.bf16 %v488_v1, %v484_v63  ;;  %v283_v1 = vld [vmem:[%s9167_s2 + $0x38] sm:$0xff] }
  0x54   :  { %v369_v3 = vld [vmem:[%s9167_s2 + $0x2e8] sm:$0xff]  ;;  %v368_v10 = vld [vmem:[%s9167_s2 + $0x2e0] sm:$0xff]  ;;  %4482 = vmatpush1.bf16.msra.mxu1 %v4481_v6  ;;  %v282_v6 = vld [vmem:[%s9167_s2 + $0x30] sm:$0xff] }
  0x55   :  { %v493_v4 = vld [vmem:[%s9167_s2 + $0x6c8] sm:$0xff]  ;;  %v4483_v9 = vpack.c.bf16 %v369_v3, %v365_v2  ;;  %v492_v11 = vld [vmem:[%s9167_s2 + $0x6c0] sm:$0xff]  ;;  %4544 = vmatprep.subr.bf16.mxu0 %v4543_v0  ;;  %v4485_v20 = vpack.c.bf16 %v368_v10, %v364_v7  ;;  %v279_v0 = vld [vmem:[%s9167_s2 + $0x18] sm:$0xff] }
  0x56   :  { %v497_v5 = vld [vmem:[%s9167_s2 + $0x6e8] sm:$0xff]  ;;  %v496_v12 = vld [vmem:[%s9167_s2 + $0x6e0] sm:$0xff]  ;;  %4546 = vmatpush1.bf16.msra.mxu0 %v4545_v8  ;;  %v287_v7 = vld [vmem:[%s9167_s2 + $0x58] sm:$0xff] }
  0x57   :  { %v4547_v13 = vpack.c.bf16 %v497_v5, %v493_v4  ;;  %v373_v14 = vld [vmem:[%s9167_s2 + $0x308] sm:$0xff]  ;;  %4484 = vmatprep.subr.bf16.mxu1 %v4483_v9  ;;  %v4549_v21 = vpack.c.bf16 %v496_v12, %v492_v11  ;;  %v372_v23 = vld [vmem:[%s9167_s2 + $0x300] sm:$0xff]  ;;  %v4635_v4 = vpack.c.bf16 %v283_v1, %v279_v0  ;;  %v278_v5 = vld [vmem:[%s9167_s2 + $0x10] sm:$0xff] }
  0x58   :  { %v377_v15 = vld [vmem:[%s9167_s2 + $0x328] sm:$0xff]  ;;  %v376_v24 = vld [vmem:[%s9167_s2 + $0x320] sm:$0xff]  ;;  %4486 = vmatpush1.bf16.msra.mxu1 %v4485_v20  ;;  %v291_v8 = vld [vmem:[%s9167_s2 + $0x78] sm:$0xff]  ;;  %v4637_v10 = vpack.c.bf16 %v282_v6, %v278_v5 }
  0x59   :  { %v53_v16 = vld [vmem:[%s9165_s0 + $0x8] sm:$0xff]  ;;  %v4487_v22 = vpack.c.bf16 %v377_v15, %v373_v14  ;;  %v500_v25 = vld [vmem:[%s9167_s2 + $0x700] sm:$0xff]  ;;  %4548 = vmatprep.subr.bf16.mxu0 %v4547_v13  ;;  %v4489_v32 = vpack.c.bf16 %v376_v24, %v372_v23  ;;  %v54_v11 = vld [vmem:[%s9165_s0 + $0x10] sm:$0xff]  ;;  %v4639_v14 = vpack.c.bf16 %v291_v8, %v287_v7 }
  0x5a   :  { %v501_v17 = vld [vmem:[%s9167_s2 + $0x708] sm:$0xff]  ;;  %851 = vmatprep.mubr.f32.mxu1 %v53_v16  ;;  %v504_v27 = vld [vmem:[%s9167_s2 + $0x720] sm:$0xff]  ;;  %4550 = vmatpush1.bf16.msra.mxu0 %v4549_v21  ;;  %v62_v13 = vld [vmem:[%s9165_s0 + $0x50] sm:$0xff] }
  0x5b   :  { %v505_v18 = vld [vmem:[%s9167_s2 + $0x728] sm:$0xff]  ;;  %4488 = vmatprep.subr.bf16.mxu1 %v4487_v22  ;;  %v4553_v33 = vpack.c.bf16 %v504_v27, %v500_v25  ;;  %v380_v35 = vld [vmem:[%s9167_s2 + $0x340] sm:$0xff]  ;;  %v286_v15 = vld [vmem:[%s9167_s2 + $0x50] sm:$0xff] }
  0x5c   :  { %v4551_v26 = vpack.c.bf16 %v505_v18, %v501_v17  ;;  %v381_v28 = vld [vmem:[%s9167_s2 + $0x348] sm:$0xff]  ;;  %v384_v36 = vld [vmem:[%s9167_s2 + $0x360] sm:$0xff]  ;;  %4490 = vmatpush1.bf16.msra.mxu1 %v4489_v32  ;;  %v290_v16 = vld [vmem:[%s9167_s2 + $0x70] sm:$0xff] }
  0x5d   :  { %v385_v29 = vld [vmem:[%s9167_s2 + $0x368] sm:$0xff]  ;;  %v508_v37 = vld [vmem:[%s9167_s2 + $0x740] sm:$0xff]  ;;  %v4493_v44 = vpack.c.bf16 %v384_v36, %v380_v35  ;;  %v295_v17 = vld [vmem:[%s9167_s2 + $0x98] sm:$0xff]  ;;  %v4641_v22 = vpack.c.bf16 %v290_v16, %v286_v15 }
  0x5e   :  { %v509_v30 = vld [vmem:[%s9167_s2 + $0x748] sm:$0xff]  ;;  %v4491_v34 = vpack.c.bf16 %v385_v29, %v381_v28  ;;  %4552 = vmatprep.subr.bf16.mxu0 %v4551_v26  ;;  %v512_v39 = vld [vmem:[%s9167_s2 + $0x760] sm:$0xff]  ;;  %v299_v18 = vld [vmem:[%s9167_s2 + $0xb8] sm:$0xff] }
  0x5f   :  { %v513_v31 = vld [vmem:[%s9167_s2 + $0x768] sm:$0xff]  ;;  %4554 = vmatpush1.bf16.msra.mxu0 %v4553_v33  ;;  %v4557_v45 = vpack.c.bf16 %v512_v39, %v508_v37  ;;  %v388_v47 = vld [vmem:[%s9167_s2 + $0x380] sm:$0xff]  ;;  %v67_v21 = vld [vmem:[%s9165_s0 + $0x78] sm:$0xff]  ;;  %v4643_v24 = vpack.c.bf16 %v299_v18, %v295_v17 }
  0x60   :  { %v4555_v38 = vpack.c.bf16 %v513_v31, %v509_v30  ;;  %v389_v40 = vld [vmem:[%s9167_s2 + $0x388] sm:$0xff]  ;;  %4492 = vmatprep.subr.bf16.mxu1 %v4491_v34  ;;  %v392_v48 = vld [vmem:[%s9167_s2 + $0x3a0] sm:$0xff]  ;;  %v294_v25 = vld [vmem:[%s9167_s2 + $0x90] sm:$0xff] }
  0x61   :  { %v393_v41 = vld [vmem:[%s9167_s2 + $0x3a8] sm:$0xff]  ;;  %v516_v49 = vld [vmem:[%s9167_s2 + $0x780] sm:$0xff]  ;;  %4494 = vmatpush1.bf16.msra.mxu1 %v4493_v44  ;;  %v4497_v56 = vpack.c.bf16 %v392_v48, %v388_v47  ;;  %v298_v26 = vld [vmem:[%s9167_s2 + $0xb0] sm:$0xff] }
  0x62   :  { %v517_v42 = vld [vmem:[%s9167_s2 + $0x788] sm:$0xff]  ;;  %v4495_v46 = vpack.c.bf16 %v393_v41, %v389_v40  ;;  %4556 = vmatprep.subr.bf16.mxu0 %v4555_v38  ;;  %v520_v51 = vld [vmem:[%s9167_s2 + $0x7a0] sm:$0xff]  ;;  %v303_v27 = vld [vmem:[%s9167_s2 + $0xd8] sm:$0xff]  ;;  %v4645_v33 = vpack.c.bf16 %v298_v26, %v294_v25 }
  0x63   :  { %v521_v43 = vld [vmem:[%s9167_s2 + $0x7a8] sm:$0xff]  ;;  %4558 = vmatpush1.bf16.msra.mxu0 %v4557_v45  ;;  %v4561_v57 = vpack.c.bf16 %v520_v51, %v516_v49  ;;  %v396_v59 = vld [vmem:[%s9167_s2 + $0x3c0] sm:$0xff]  ;;  %v307_v28 = vld [vmem:[%s9167_s2 + $0xf8] sm:$0xff] }
  0x64   :  { %v4559_v50 = vpack.c.bf16 %v521_v43, %v517_v42  ;;  %v397_v52 = vld [vmem:[%s9167_s2 + $0x3c8] sm:$0xff]  ;;  %4496 = vmatprep.subr.bf16.mxu1 %v4495_v46  ;;  %v400_v60 = vld [vmem:[%s9167_s2 + $0x3e0] sm:$0xff]  ;;  %v66_v29 = vld [vmem:[%s9165_s0 + $0x70] sm:$0xff]  ;;  %v4647_v35 = vpack.c.bf16 %v307_v28, %v303_v27 }
  0x65   :  { %v401_v53 = vld [vmem:[%s9167_s2 + $0x3e8] sm:$0xff]  ;;  %v524_v61 = vld [vmem:[%s9167_s2 + $0x7c0] sm:$0xff]  ;;  %4498 = vmatpush1.bf16.msra.mxu1 %v4497_v56  ;;  %v4501_v2 = vpack.c.bf16 %v400_v60, %v396_v59  ;;  %v74_v31 = vld [vmem:[%s9165_s0 + $0xb0] sm:$0xff] }
  0x66   :  { %v525_v54 = vld [vmem:[%s9167_s2 + $0x7c8] sm:$0xff]  ;;  %v4499_v58 = vpack.c.bf16 %v401_v53, %v397_v52  ;;  %4560 = vmatprep.subr.bf16.mxu0 %v4559_v50  ;;  %v528_v63 = vld [vmem:[%s9167_s2 + $0x7e0] sm:$0xff]  ;;  %v302_v36 = vld [vmem:[%s9167_s2 + $0xd0] sm:$0xff] }
  0x67   :  { %v529_v55 = vld [vmem:[%s9167_s2 + $0x7e8] sm:$0xff]  ;;  %4562 = vmatpush1.bf16.msra.mxu0 %v4561_v57  ;;  %v4565_v3 = vpack.c.bf16 %v528_v63, %v524_v61  ;;  %v52_v9 = vld [vmem:[%s9165_s0] sm:$0xff]  ;;  %v306_v37 = vld [vmem:[%s9167_s2 + $0xf0] sm:$0xff] }
  0x68   :  { %v4563_v62 = vpack.c.bf16 %v529_v55, %v525_v54  ;;  %4500 = vmatprep.subr.bf16.mxu1 %v4499_v58  ;;  %v60_v12 = vld [vmem:[%s9165_s0 + $0x40] sm:$0xff]  ;;  %v61_v20 = vld [vmem:[%s9165_s0 + $0x48] sm:$0xff]  ;;  %v75_v38 = vld [vmem:[%s9165_s0 + $0xb8] sm:$0xff]  ;;  %v4649_v45 = vpack.c.bf16 %v306_v37, %v302_v36 }
  0x69   :  { %4502 = vmatpush1.bf16.msra.mxu1 %v4501_v2  ;;  %v69_v23 = vld [vmem:[%s9165_s0 + $0x88] sm:$0xff]  ;;  %v68_v30 = vld [vmem:[%s9165_s0 + $0x80] sm:$0xff]  ;;  %v311_v39 = vld [vmem:[%s9167_s2 + $0x118] sm:$0xff] }
  0x6a   :  { %4564 = vmatprep.subr.bf16.mxu0 %v4563_v62  ;;  %4636 = vmatprep.subr.bf16.mxu1 %v4635_v4  ;;  %v76_v32 = vld [vmem:[%s9165_s0 + $0xc0] sm:$0xff]  ;;  %v73_v34 = vld [vmem:[%s9165_s0 + $0xa8] sm:$0xff]  ;;  %v315_v40 = vld [vmem:[%s9167_s2 + $0x138] sm:$0xff] }
  0x6b   :  { %4566 = vmatpush1.bf16.msra.mxu0 %v4565_v3  ;;  %v81_v41 = vld [vmem:[%s9165_s0 + $0xe8] sm:$0xff]  ;;  %v83_v44 = vld [vmem:[%s9165_s0 + $0xf8] sm:$0xff]  ;;  %v532_v47 = vld [vmem:[%s9167_s2 + $0x800] sm:$0xff]  ;;  %v4651_v50 = vpack.c.bf16 %v315_v40, %v311_v39 }
  0x6c   :  { %852 = vmatmul.mubr.f32.vlgmr.msra.gmra.mrb[0].mxu1 %v52_v9  ;;  %v533_v42 = vld [vmem:[%s9167_s2 + $0x808] sm:$0xff]  ;;  %v536_v48 = vld [vmem:[%s9167_s2 + $0x820] sm:$0xff]  ;;  %v310_v51 = vld [vmem:[%s9167_s2 + $0x110] sm:$0xff] }
  0x6d   :  { %4638 = vmatpush1.bf16.msra.mxu1 %v4637_v10  ;;  %857 = vmatprep.mubr.f32.mxu1 %v60_v12  ;;  %v537_v43 = vld [vmem:[%s9167_s2 + $0x828] sm:$0xff]  ;;  %v80_v49 = vld [vmem:[%s9165_s0 + $0xe0] sm:$0xff]  ;;  %v314_v52 = vld [vmem:[%s9167_s2 + $0x130] sm:$0xff]  ;;  %v4569_v53 = vpack.c.bf16 %v536_v48, %v532_v47 }
  0x6e   :  { %1109 = vmatmul.mubr.f32.vlgmr.msra.gmra.mrb[0].mxu0 %v54_v11  ;;  %4640 = vmatprep.subr.bf16.mxu1 %v4639_v14  ;;  %v4567_v46 = vpack.c.bf16 %v537_v43, %v533_v42  ;;  %v82_v54 = vld [vmem:[%s9165_s0 + $0xf0] sm:$0xff]  ;;  %v319_v55 = vld [vmem:[%s9167_s2 + $0x158] sm:$0xff]  ;;  %v541_v57 = vld [vmem:[%s9167_s2 + $0x848] sm:$0xff]  ;;  %v4653_v62 = vpack.c.bf16 %v314_v52, %v310_v51 }
  0x6f   :  { %1114 = vmatprep.mubr.f32.mxu0 %v62_v13  ;;  %v323_v56 = vld [vmem:[%s9167_s2 + $0x178] sm:$0xff]  ;;  %v545_v58 = vld [vmem:[%s9167_s2 + $0x868] sm:$0xff]  ;;  %v540_v59 = vld [vmem:[%s9167_s2 + $0x840] sm:$0xff] }
  0x70   :  { %858 = vmatmul.mubr.f32.gmra.mrb[2].mxu1 %v59_v19  ;;  %4568 = vmatprep.subr.bf16.mxu0 %v4567_v46  ;;  %v6553_v60 = vld [vmem:[%s9165_s0 + $0x120] sm:$0xff]  ;;  %v90_v61 = vld [vmem:[%s9165_s0 + $0x130] sm:$0xff]  ;;  %v4571_v63 = vpack.c.bf16 %v545_v58, %v541_v57  ;;  %v87_v1 = vld [vmem:[%s9165_s0 + $0x118] sm:$0xff]  ;;  %v4655_v2 = vpack.c.bf16 %v323_v56, %v319_v55 }
  0x71   :  { %863 = vmatprep.mubr.f32.mxu1 %v67_v21  ;;  %4642 = vmatpush1.bf16.msra.mxu1 %v4641_v22  ;;  %v544_v0 = vld [vmem:[%s9167_s2 + $0x860] sm:$0xff]  ;;  %v318_v3 = vld [vmem:[%s9167_s2 + $0x150] sm:$0xff]  ;;  %v549_v6 = vld [vmem:[%s9167_s2 + $0x888] sm:$0xff] }
  0x72   :  { %1115 = vmatmul.mubr.f32.gmra.mrb[2].mxu0 %v61_v20  ;;  %4644 = vmatprep.subr.bf16.mxu1 %v4643_v24  ;;  %v322_v4 = vld [vmem:[%s9167_s2 + $0x170] sm:$0xff]  ;;  %v4573_v5 = vpack.c.bf16 %v544_v0, %v540_v59  ;;  %v89_v7 = vld [vmem:[%s9165_s0 + $0x128] sm:$0xff]  ;;  %v327_v8 = vld [vmem:[%s9167_s2 + $0x198] sm:$0xff] }
  0x73   :  { %1120 = vmatprep.mubr.f32.mxu0 %v69_v23  ;;  %4570 = vmatpush1.bf16.msra.mxu0 %v4569_v53  ;;  %v331_v9 = vld [vmem:[%s9167_s2 + $0x1b8] sm:$0xff]  ;;  %v553_v10 = vld [vmem:[%s9167_s2 + $0x8a8] sm:$0xff]  ;;  %v548_v13 = vld [vmem:[%s9167_s2 + $0x880] sm:$0xff]  ;;  %v4657_v16 = vpack.c.bf16 %v322_v4, %v318_v3 }
  0x74   :  { %864 = vmatmul.mubr.f32.gmra.mrb[4].mxu1 %v66_v29  ;;  %4572 = vmatprep.subr.bf16.mxu0 %v4571_v63  ;;  %v6589_v11 = vld [vmem:[%s9165_s0 + $0x158] sm:$0xff]  ;;  %v4575_v12 = vpack.c.bf16 %v553_v10, %v549_v6  ;;  %v552_v14 = vld [vmem:[%s9167_s2 + $0x8a0] sm:$0xff]  ;;  %v97_v15 = vld [vmem:[%s9165_s0 + $0x168] sm:$0xff]  ;;  %v4659_v19 = vpack.c.bf16 %v331_v9, %v327_v8 }
  0x75   :  { %869 = vmatprep.mubr.f32.mxu1 %v74_v31  ;;  %4646 = vmatpush1.bf16.msra.mxu1 %v4645_v33  ;;  %v326_v17 = vld [vmem:[%s9167_s2 + $0x190] sm:$0xff]  ;;  %v335_v20 = vld [vmem:[%s9167_s2 + $0x1d8] sm:$0xff]  ;;  %v4577_v22 = vpack.c.bf16 %v552_v14, %v548_v13  ;;  %v557_v23 = vld [vmem:[%s9167_s2 + $0x8c8] sm:$0xff] }
  0x76   :  { %1121 = vmatmul.mubr.f32.gmra.mrb[4].mxu0 %v68_v30  ;;  %4648 = vmatprep.subr.bf16.mxu1 %v4647_v35  ;;  %v330_v18 = vld [vmem:[%s9167_s2 + $0x1b0] sm:$0xff]  ;;  %v339_v21 = vld [vmem:[%s9167_s2 + $0x1f8] sm:$0xff]  ;;  %v561_v24 = vld [vmem:[%s9167_s2 + $0x8e8] sm:$0xff] }
  0x77   :  { %1126 = vmatprep.mubr.f32.mxu0 %v76_v32  ;;  %4574 = vmatpush1.bf16.msra.mxu0 %v4573_v5  ;;  %v556_v25 = vld [vmem:[%s9167_s2 + $0x8c0] sm:$0xff]  ;;  %v6628_v27 = vld [vmem:[%s9165_s0 + $0x150] sm:$0xff]  ;;  %v4579_v30 = vpack.c.bf16 %v561_v24, %v557_v23  ;;  %v4661_v32 = vpack.c.bf16 %v330_v18, %v326_v17  ;;  %v565_v33 = vld [vmem:[%s9167_s2 + $0x908] sm:$0xff]  ;;  %v4663_v35 = vpack.c.bf16 %v339_v21, %v335_v20 }
  0x78   :  { %870 = vmatmul.mubr.f32.gmra.mrb[6].mxu1 %v73_v34  ;;  %4576 = vmatprep.subr.bf16.mxu0 %v4575_v12  ;;  %v560_v26 = vld [vmem:[%s9167_s2 + $0x8e0] sm:$0xff]  ;;  %v6636_v29 = vld [vmem:[%s9165_s0 + $0x190] sm:$0xff]  ;;  %v569_v34 = vld [vmem:[%s9167_s2 + $0x928] sm:$0xff] }
  0x79   :  { %875 = vmatprep.mubr.f32.mxu1 %v81_v41  ;;  %4650 = vmatpush1.bf16.msra.mxu1 %v4649_v45  ;;  %v96_v28 = vld [vmem:[%s9165_s0 + $0x160] sm:$0xff]  ;;  %v334_v36 = vld [vmem:[%s9167_s2 + $0x1d0] sm:$0xff]  ;;  %v4581_v39 = vpack.c.bf16 %v560_v26, %v556_v25  ;;  %v347_v40 = vld [vmem:[%s9167_s2 + $0x238] sm:$0xff]  ;;  %v4583_v41 = vpack.c.bf16 %v569_v34, %v565_v33 }
  0x7a   :  { %1127 = vmatmul.mubr.f32.gmra.mrb[6].mxu0 %v75_v38  ;;  %4652 = vmatprep.subr.bf16.mxu1 %v4651_v50  ;;  %v104_v31 = vld [vmem:[%s9165_s0 + $0x1a0] sm:$0xff]  ;;  %v338_v37 = vld [vmem:[%s9167_s2 + $0x1f0] sm:$0xff]  ;;  %v343_v38 = vld [vmem:[%s9167_s2 + $0x218] sm:$0xff] }
  0x7b   :  { %1132 = vmatprep.mubr.f32.mxu0 %v83_v44  ;;  %4578 = vmatpush1.bf16.msra.mxu0 %v4577_v22  ;;  %v564_v42 = vld [vmem:[%s9167_s2 + $0x900] sm:$0xff]  ;;  %v6670_v44 = vld [vmem:[%s9165_s0 + $0x188] sm:$0xff]  ;;  %v103_v45 = vld [vmem:[%s9165_s0 + $0x198] sm:$0xff]  ;;  %v4665_v48 = vpack.c.bf16 %v338_v37, %v334_v36  ;;  %v4667_v51 = vpack.c.bf16 %v347_v40, %v343_v38 }
  0x7c   :  { %876 = vmatmul.mubr.f32.gmra.mrb[8].mxu1 %v80_v49  ;;  %4580 = vmatprep.subr.bf16.mxu0 %v4579_v30  ;;  %v568_v43 = vld [vmem:[%s9167_s2 + $0x920] sm:$0xff]  ;;  %v6678_v46 = vld [vmem:[%s9165_s0 + $0x1c8] sm:$0xff]  ;;  %v111_v47 = vld [vmem:[%s9165_s0 + $0x1d8] sm:$0xff] }
  0x7d   :  { %881 = vmatprep.mubr.f32.mxu1 %v6553_v60  ;;  %4654 = vmatpush1.bf16.msra.mxu1 %v4653_v62  ;;  %v573_v49 = vld [vmem:[%s9167_s2 + $0x948] sm:$0xff]  ;;  %v342_v52 = vld [vmem:[%s9167_s2 + $0x210] sm:$0xff]  ;;  %v4585_v55 = vpack.c.bf16 %v568_v43, %v564_v42  ;;  %v355_v56 = vld [vmem:[%s9167_s2 + $0x278] sm:$0xff] }
  0x7e   :  { %1133 = vmatmul.mubr.f32.gmra.mrb[8].mxu0 %v82_v54  ;;  %4656 = vmatprep.subr.bf16.mxu1 %v4655_v2  ;;  %v577_v50 = vld [vmem:[%s9167_s2 + $0x968] sm:$0xff]  ;;  %v346_v53 = vld [vmem:[%s9167_s2 + $0x230] sm:$0xff]  ;;  %v351_v54 = vld [vmem:[%s9167_s2 + $0x258] sm:$0xff] }
  0x7f   :  { %1138 = vmatprep.mubr.f32.mxu0 %v90_v61  ;;  %4582 = vmatpush1.bf16.msra.mxu0 %v4581_v39  ;;  %v4587_v57 = vpack.c.bf16 %v577_v50, %v573_v49  ;;  %v572_v58 = vld [vmem:[%s9167_s2 + $0x940] sm:$0xff]  ;;  %v581_v62 = vld [vmem:[%s9167_s2 + $0x988] sm:$0xff]  ;;  %v110_v0 = vld [vmem:[%s9165_s0 + $0x1d0] sm:$0xff]  ;;  %v4669_v3 = vpack.c.bf16 %v346_v53, %v342_v52  ;;  %v4671_v4 = vpack.c.bf16 %v355_v56, %v351_v54 }
  0x80   :  { %882 = vmatmul.mubr.f32.gmra.mrb[10].mxu1 %v87_v1  ;;  %4584 = vmatprep.subr.bf16.mxu0 %v4583_v41  ;;  %v576_v59 = vld [vmem:[%s9167_s2 + $0x960] sm:$0xff]  ;;  %v585_v63 = vld [vmem:[%s9167_s2 + $0x9a8] sm:$0xff]  ;;  %v118_v2 = vld [vmem:[%s9165_s0 + $0x210] sm:$0xff] }
  0x81   :  { %887 = vmatprep.mubr.f32.mxu1 %v6589_v11  ;;  %4658 = vmatpush1.bf16.msra.mxu1 %v4657_v16  ;;  %v6712_v61 = vld [vmem:[%s9165_s0 + $0x1c0] sm:$0xff]  ;;  %v350_v5 = vld [vmem:[%s9167_s2 + $0x250] sm:$0xff]  ;;  %v4589_v8 = vpack.c.bf16 %v576_v59, %v572_v58  ;;  %v363_v9 = vld [vmem:[%s9167_s2 + $0x2b8] sm:$0xff]  ;;  %v4591_v10 = vpack.c.bf16 %v585_v63, %v581_v62 }
  0x82   :  { %1139 = vmatmul.mubr.f32.gmra.mrb[10].mxu0 %v89_v7  ;;  %4660 = vmatprep.subr.bf16.mxu1 %v4659_v19  ;;  %v6726_v1 = vld [vmem:[%s9165_s0 + $0x200] sm:$0xff]  ;;  %v354_v6 = vld [vmem:[%s9167_s2 + $0x270] sm:$0xff]  ;;  %v359_v7 = vld [vmem:[%s9167_s2 + $0x298] sm:$0xff] }
  0x83   :  { %1144 = vmatprep.mubr.f32.mxu0 %v97_v15  ;;  %4586 = vmatpush1.bf16.msra.mxu0 %v4585_v55  ;;  %v580_v12 = vld [vmem:[%s9167_s2 + $0x980] sm:$0xff]  ;;  %v6754_v14 = vld [vmem:[%s9165_s0 + $0x1f8] sm:$0xff]  ;;  %v589_v15 = vld [vmem:[%s9167_s2 + $0x9c8] sm:$0xff]  ;;  %v4673_v20 = vpack.c.bf16 %v354_v6, %v350_v5  ;;  %v4675_v21 = vpack.c.bf16 %v363_v9, %v359_v7 }
  0x84   :  { %888 = vmatmul.mubr.f32.gmra.mrb[12].mxu1 %v6628_v27  ;;  %4588 = vmatprep.subr.bf16.mxu0 %v4587_v57  ;;  %v584_v13 = vld [vmem:[%s9167_s2 + $0x9a0] sm:$0xff]  ;;  %v593_v16 = vld [vmem:[%s9167_s2 + $0x9e8] sm:$0xff]  ;;  %v6768_v18 = vld [vmem:[%s9165_s0 + $0x238] sm:$0xff] }
  0x85   :  { %893 = vmatprep.mubr.f32.mxu1 %v6636_v29  ;;  %4662 = vmatpush1.bf16.msra.mxu1 %v4661_v32  ;;  %v117_v17 = vld [vmem:[%s9165_s0 + $0x208] sm:$0xff]  ;;  %v358_v22 = vld [vmem:[%s9167_s2 + $0x290] sm:$0xff]  ;;  %v367_v24 = vld [vmem:[%s9167_s2 + $0x2d8] sm:$0xff]  ;;  %v4593_v25 = vpack.c.bf16 %v584_v13, %v580_v12 }
  0x86   :  { %1145 = vmatmul.mubr.f32.gmra.mrb[12].mxu0 %v96_v28  ;;  %4664 = vmatprep.subr.bf16.mxu1 %v4663_v35  ;;  %v125_v19 = vld [vmem:[%s9165_s0 + $0x248] sm:$0xff]  ;;  %v362_v23 = vld [vmem:[%s9167_s2 + $0x2b0] sm:$0xff]  ;;  %v371_v26 = vld [vmem:[%s9167_s2 + $0x2f8] sm:$0xff]  ;;  %v4595_v28 = vpack.c.bf16 %v593_v16, %v589_v15 }
  0x87   :  { %1150 = vmatprep.mubr.f32.mxu0 %v104_v31  ;;  %4590 = vmatpush1.bf16.msra.mxu0 %v4589_v8  ;;  %v588_v30 = vld [vmem:[%s9167_s2 + $0x9c0] sm:$0xff]  ;;  %v6796_v32 = vld [vmem:[%s9165_s0 + $0x230] sm:$0xff]  ;;  %v597_v33 = vld [vmem:[%s9167_s2 + $0xa08] sm:$0xff]  ;;  %v4677_v38 = vpack.c.bf16 %v362_v23, %v358_v22  ;;  %v4679_v39 = vpack.c.bf16 %v371_v26, %v367_v24 }
  0x88   :  { %894 = vmatmul.mubr.f32.gmra.mrb[14].mxu1 %v6670_v44  ;;  %4592 = vmatprep.subr.bf16.mxu0 %v4591_v10  ;;  %v592_v31 = vld [vmem:[%s9167_s2 + $0x9e0] sm:$0xff]  ;;  %v601_v34 = vld [vmem:[%s9167_s2 + $0xa28] sm:$0xff]  ;;  %v6810_v36 = vld [vmem:[%s9165_s0 + $0x270] sm:$0xff] }
  0x89   :  { %899 = vmatprep.mubr.f32.mxu1 %v6678_v46  ;;  %4666 = vmatpush1.bf16.msra.mxu1 %v4665_v48  ;;  %v124_v35 = vld [vmem:[%s9165_s0 + $0x240] sm:$0xff]  ;;  %v366_v40 = vld [vmem:[%s9167_s2 + $0x2d0] sm:$0xff]  ;;  %v4597_v42 = vpack.c.bf16 %v592_v31, %v588_v30  ;;  %v375_v43 = vld [vmem:[%s9167_s2 + $0x318] sm:$0xff] }
  0x8a   :  { %1151 = vmatmul.mubr.f32.gmra.mrb[14].mxu0 %v103_v45  ;;  %4668 = vmatprep.subr.bf16.mxu1 %v4667_v51  ;;  %v132_v37 = vld [vmem:[%s9165_s0 + $0x280] sm:$0xff]  ;;  %v370_v41 = vld [vmem:[%s9167_s2 + $0x2f0] sm:$0xff]  ;;  %v4599_v45 = vpack.c.bf16 %v601_v34, %v597_v33  ;;  %v6838_v50 = vld [vmem:[%s9165_s0 + $0x268] sm:$0xff] }
  0x8b   :  { %1156 = vmatprep.mubr.f32.mxu0 %v111_v47  ;;  %4594 = vmatpush1.bf16.msra.mxu0 %v4593_v25  ;;  %v379_v47 = vld [vmem:[%s9167_s2 + $0x338] sm:$0xff]  ;;  %v596_v48 = vld [vmem:[%s9167_s2 + $0xa00] sm:$0xff]  ;;  %v605_v51 = vld [vmem:[%s9167_s2 + $0xa48] sm:$0xff]  ;;  %v4681_v56 = vpack.c.bf16 %v370_v41, %v366_v40 }
  0x8c   :  { %900 = vmatmul.mubr.f32.gmra.mrb[16].mxu1 %v6712_v61  ;;  %4596 = vmatprep.subr.bf16.mxu0 %v4595_v28  ;;  %v600_v49 = vld [vmem:[%s9167_s2 + $0xa20] sm:$0xff]  ;;  %v609_v52 = vld [vmem:[%s9167_s2 + $0xa68] sm:$0xff]  ;;  %v131_v53 = vld [vmem:[%s9165_s0 + $0x278] sm:$0xff]  ;;  %v4683_v57 = vpack.c.bf16 %v379_v47, %v375_v43 }
  0x8d   :  { %905 = vmatprep.mubr.f32.mxu1 %v6726_v1  ;;  %4670 = vmatpush1.bf16.msra.mxu1 %v4669_v3  ;;  %v6852_v54 = vld [vmem:[%s9165_s0 + $0x2a8] sm:$0xff]  ;;  %v139_v55 = vld [vmem:[%s9165_s0 + $0x2b8] sm:$0xff]  ;;  %v4601_v58 = vpack.c.bf16 %v600_v49, %v596_v48  ;;  %v374_v59 = vld [vmem:[%s9167_s2 + $0x310] sm:$0xff] }
  0x8e   :  { %1157 = vmatmul.mubr.f32.gmra.mrb[16].mxu0 %v110_v0  ;;  %4672 = vmatprep.subr.bf16.mxu1 %v4671_v4  ;;  %v378_v62 = vld [vmem:[%s9167_s2 + $0x330] sm:$0xff]  ;;  %v604_v63 = vld [vmem:[%s9167_s2 + $0xa40] sm:$0xff]  ;;  %v4603_v0 = vpack.c.bf16 %v609_v52, %v605_v51  ;;  %v383_v3 = vld [vmem:[%s9167_s2 + $0x358] sm:$0xff] }
  0x8f   :  { %1162 = vmatprep.mubr.f32.mxu0 %v118_v2  ;;  %4598 = vmatpush1.bf16.msra.mxu0 %v4597_v42  ;;  %v608_v2 = vld [vmem:[%s9167_s2 + $0xa60] sm:$0xff]  ;;  %v387_v4 = vld [vmem:[%s9167_s2 + $0x378] sm:$0xff]  ;;  %v613_v6 = vld [vmem:[%s9167_s2 + $0xa88] sm:$0xff]  ;;  %v4685_v10 = vpack.c.bf16 %v378_v62, %v374_v59 }
  0x90   :  { %906 = vmatmul.mubr.f32.gmra.mrb[18].mxu1 %v6754_v14  ;;  %4600 = vmatprep.subr.bf16.mxu0 %v4599_v45  ;;  %v6880_v5 = vld [vmem:[%s9165_s0 + $0x2a0] sm:$0xff]  ;;  %v617_v7 = vld [vmem:[%s9167_s2 + $0xaa8] sm:$0xff]  ;;  %v138_v8 = vld [vmem:[%s9165_s0 + $0x2b0] sm:$0xff]  ;;  %v4605_v13 = vpack.c.bf16 %v608_v2, %v604_v63  ;;  %v4687_v15 = vpack.c.bf16 %v387_v4, %v383_v3 }
  0x91   :  { %911 = vmatprep.mubr.f32.mxu1 %v6768_v18  ;;  %4674 = vmatpush1.bf16.msra.mxu1 %v4673_v20  ;;  %v6894_v9 = vld [vmem:[%s9165_s0 + $0x2e0] sm:$0xff]  ;;  %v146_v12 = vld [vmem:[%s9165_s0 + $0x2f0] sm:$0xff]  ;;  %v4607_v20 = vpack.c.bf16 %v617_v7, %v613_v6  ;;  %v621_v23 = vld [vmem:[%s9167_s2 + $0xac8] sm:$0xff] }
  0x92   :  { %1163 = vmatmul.mubr.f32.gmra.mrb[18].mxu0 %v117_v17  ;;  %4676 = vmatprep.subr.bf16.mxu1 %v4675_v21  ;;  %v382_v16 = vld [vmem:[%s9167_s2 + $0x350] sm:$0xff]  ;;  %v612_v21 = vld [vmem:[%s9167_s2 + $0xa80] sm:$0xff]  ;;  %v625_v24 = vld [vmem:[%s9167_s2 + $0xae8] sm:$0xff] }
  0x93   :  { %1168 = vmatprep.mubr.f32.mxu0 %v125_v19  ;;  %4602 = vmatpush1.bf16.msra.mxu0 %v4601_v58  ;;  %v386_v17 = vld [vmem:[%s9167_s2 + $0x370] sm:$0xff]  ;;  %v6909_v19 = vld [vmem:[%s9165_s0 + $0x2d8] sm:$0xff]  ;;  %v616_v22 = vld [vmem:[%s9167_s2 + $0xaa0] sm:$0xff] }
  0x94   :  { %912 = vmatmul.mubr.f32.gmra.mrb[20].mxu1 %v6796_v32  ;;  %4604 = vmatprep.subr.bf16.mxu0 %v4603_v0  ;;  %v391_v25 = vld [vmem:[%s9167_s2 + $0x398] sm:$0xff]  ;;  %v145_v26 = vld [vmem:[%s9165_s0 + $0x2e8] sm:$0xff]  ;;  %v4689_v30 = vpack.c.bf16 %v386_v17, %v382_v16  ;;  %v4609_v34 = vpack.c.bf16 %v616_v22, %v612_v21  ;;  %v620_v40 = vld [vmem:[%s9167_s2 + $0xac0] sm:$0xff] }
  0x95   :  { %917 = vmatprep.mubr.f32.mxu1 %v6810_v36  ;;  %4678 = vmatpush1.bf16.msra.mxu1 %v4677_v38  ;;  %v6933_v28 = vld [vmem:[%s9165_s0 + $0x318] sm:$0xff]  ;;  %v153_v33 = vld [vmem:[%s9165_s0 + $0x328] sm:$0xff]  ;;  %v394_v38 = vld [vmem:[%s9167_s2 + $0x3b0] sm:$0xff] }
  0x96   :  { %1169 = vmatmul.mubr.f32.gmra.mrb[20].mxu0 %v124_v35  ;;  %4680 = vmatprep.subr.bf16.mxu1 %v4679_v39  ;;  %v395_v31 = vld [vmem:[%s9167_s2 + $0x3b8] sm:$0xff]  ;;  %v4611_v39 = vpack.c.bf16 %v625_v24, %v621_v23  ;;  %v624_v41 = vld [vmem:[%s9167_s2 + $0xae0] sm:$0xff]  ;;  %v6958_v42 = vld [vmem:[%s9165_s0 + $0x310] sm:$0xff] }
  0x97   :  { %1174 = vmatprep.mubr.f32.mxu0 %v132_v37  ;;  %4606 = vmatpush1.bf16.msra.mxu0 %v4605_v13  ;;  %v4691_v35 = vpack.c.bf16 %v395_v31, %v391_v25  ;;  %v390_v37 = vld [vmem:[%s9167_s2 + $0x390] sm:$0xff]  ;;  %v629_v43 = vld [vmem:[%s9167_s2 + $0xb08] sm:$0xff]  ;;  %v152_v47 = vld [vmem:[%s9165_s0 + $0x320] sm:$0xff] }
  0x98   :  { %918 = vmatmul.mubr.f32.gmra.mrb[22].mxu1 %v6838_v50  ;;  %4608 = vmatprep.subr.bf16.mxu0 %v4607_v20  ;;  %v633_v45 = vld [vmem:[%s9167_s2 + $0xb28] sm:$0xff]  ;;  %v6972_v48 = vld [vmem:[%s9165_s0 + $0x350] sm:$0xff]  ;;  %v4693_v49 = vpack.c.bf16 %v394_v38, %v390_v37  ;;  %v160_v51 = vld [vmem:[%s9165_s0 + $0x360] sm:$0xff] }
  0x99   :  { %923 = vmatprep.mubr.f32.mxu1 %v6852_v54  ;;  %4682 = vmatpush1.bf16.msra.mxu1 %v4681_v56  ;;  %v6980_v52 = vld [vmem:[%s9165_s0 + $0x348] sm:$0xff]  ;;  %v4615_v56 = vpack.c.bf16 %v633_v45, %v629_v43  ;;  %v399_v58 = vld [vmem:[%s9167_s2 + $0x3d8] sm:$0xff]  ;;  %v398_v2 = vld [vmem:[%s9167_s2 + $0x3d0] sm:$0xff] }
  0x9a   :  { %1175 = vmatmul.mubr.f32.gmra.mrb[22].mxu0 %v131_v53  ;;  %4684 = vmatprep.subr.bf16.mxu1 %v4683_v57  ;;  %v4613_v53 = vpack.c.bf16 %v624_v41, %v620_v40  ;;  %v632_v57 = vld [vmem:[%s9167_s2 + $0xb20] sm:$0xff]  ;;  %v403_v59 = vld [vmem:[%s9167_s2 + $0x3f8] sm:$0xff]  ;;  %v637_v62 = vld [vmem:[%s9167_s2 + $0xb48] sm:$0xff] }
  0x9b   :  { %1180 = vmatprep.mubr.f32.mxu0 %v139_v55  ;;  %4610 = vmatpush1.bf16.msra.mxu0 %v4609_v34  ;;  %v628_v55 = vld [vmem:[%s9167_s2 + $0xb00] sm:$0xff]  ;;  %v641_v63 = vld [vmem:[%s9167_s2 + $0xb68] sm:$0xff]  ;;  %v4695_v0 = vpack.c.bf16 %v403_v59, %v399_v58  ;;  %v159_v3 = vld [vmem:[%s9165_s0 + $0x358] sm:$0xff] }
  0x9c   :  { %924 = vmatmul.mubr.f32.gmra.mrb[24].mxu1 %v6880_v5  ;;  %4612 = vmatprep.subr.bf16.mxu0 %v4611_v39  ;;  %v7011_v4 = vld [vmem:[%s9165_s0 + $0x388] sm:$0xff]  ;;  %v402_v6 = vld [vmem:[%s9167_s2 + $0x3f0] sm:$0xff]  ;;  %v167_v7 = vld [vmem:[%s9165_s0 + $0x398] sm:$0xff]  ;;  %v4619_v13 = vpack.c.bf16 %v641_v63, %v637_v62 }
  0x9d   :  { %929 = vmatprep.mubr.f32.mxu1 %v6894_v9  ;;  %4686 = vmatpush1.bf16.msra.mxu1 %v4685_v10  ;;  %v4697_v10 = vpack.c.bf16 %v402_v6, %v398_v2  ;;  %v640_v16 = vld [vmem:[%s9167_s2 + $0xb60] sm:$0xff]  ;;  %v645_v17 = vld [vmem:[%s9167_s2 + $0xb88] sm:$0xff]  ;;  %v407_v21 = vld [vmem:[%s9167_s2 + $0x418] sm:$0xff] }
  0x9e   :  { %1181 = vmatmul.mubr.f32.gmra.mrb[24].mxu0 %v138_v8  ;;  %4688 = vmatprep.subr.bf16.mxu1 %v4687_v15  ;;  %v4617_v8 = vpack.c.bf16 %v632_v57, %v628_v55  ;;  %v636_v15 = vld [vmem:[%s9167_s2 + $0xb40] sm:$0xff]  ;;  %v649_v20 = vld [vmem:[%s9167_s2 + $0xba8] sm:$0xff]  ;;  %v166_v22 = vld [vmem:[%s9165_s0 + $0x390] sm:$0xff] }
  0x9f   :  { %1186 = vmatprep.mubr.f32.mxu0 %v146_v12  ;;  %4614 = vmatpush1.bf16.msra.mxu0 %v4613_v53  ;;  %v7023_v12 = vld [vmem:[%s9165_s0 + $0x380] sm:$0xff]  ;;  %v411_v24 = vld [vmem:[%s9167_s2 + $0x438] sm:$0xff]  ;;  %v174_v25 = vld [vmem:[%s9165_s0 + $0x3d0] sm:$0xff]  ;;  %v4623_v31 = vpack.c.bf16 %v649_v20, %v645_v17 }
  0xa0   :  { %930 = vmatmul.mubr.f32.gmra.mrb[26].mxu1 %v6909_v19  ;;  %4616 = vmatprep.subr.bf16.mxu0 %v4615_v56  ;;  %v7047_v23 = vld [vmem:[%s9165_s0 + $0x3c0] sm:$0xff]  ;;  %v653_v37 = vld [vmem:[%s9167_s2 + $0xbc8] sm:$0xff]  ;;  %v7080_v40 = vld [vmem:[%s9165_s0 + $0x3f8] sm:$0xff] }
  0xa1   :  { %935 = vmatprep.mubr.f32.mxu1 %v6933_v28  ;;  %4690 = vmatpush1.bf16.msra.mxu1 %v4689_v30  ;;  %v4699_v30 = vpack.c.bf16 %v411_v24, %v407_v21  ;;  %v648_v34 = vld [vmem:[%s9167_s2 + $0xba0] sm:$0xff]  ;;  %v657_v38 = vld [vmem:[%s9167_s2 + $0xbe8] sm:$0xff]  ;;  %v7104_v55 = vld [vmem:[%s9165_s0 + $0x430] sm:$0xff] }
  0xa2   :  { %1187 = vmatmul.mubr.f32.gmra.mrb[26].mxu0 %v145_v26  ;;  %4692 = vmatprep.subr.bf16.mxu1 %v4691_v35  ;;  %v4621_v26 = vpack.c.bf16 %v640_v16, %v636_v15  ;;  %v7066_v35 = vld [vmem:[%s9165_s0 + $0x3b8] sm:$0xff]  ;;  %v173_v39 = vld [vmem:[%s9165_s0 + $0x3c8] sm:$0xff]  ;;  %v4627_v45 = vpack.c.bf16 %v657_v38, %v653_v37  ;;  %v180_v53 = vld [vmem:[%s9165_s0 + $0x400] sm:$0xff] }
  0xa3   :  { %1192 = vmatprep.mubr.f32.mxu0 %v153_v33  ;;  %4618 = vmatpush1.bf16.msra.mxu0 %v4617_v8  ;;  %v644_v33 = vld [vmem:[%s9167_s2 + $0xb80] sm:$0xff]  ;;  %v181_v41 = vld [vmem:[%s9165_s0 + $0x408] sm:$0xff]  ;;  %v187_v59 = vld [vmem:[%s9165_s0 + $0x438] sm:$0xff] }
  0xa4   :  { %936 = vmatmul.mubr.f32.gmra.mrb[28].mxu1 %v6958_v42  ;;  %4620 = vmatprep.subr.bf16.mxu0 %v4619_v13  ;;  %v4625_v43 = vpack.c.bf16 %v648_v34, %v644_v33  ;;  %v188_v56 = vld [vmem:[%s9165_s0 + $0x440] sm:$0xff]  ;;  %v7114_v58 = vld [vmem:[%s9165_s0 + $0x428] sm:$0xff]  ;;  %v195_v63 = vld [vmem:[%s9165_s0 + $0x478] sm:$0xff] }
  0xa5   :  { %941 = vmatprep.mubr.f32.mxu1 %v6972_v48  ;;  %4694 = vmatpush1.bf16.msra.mxu1 %v4693_v49  ;;  %v656_v49 = vld [vmem:[%s9167_s2 + $0xbe0] sm:$0xff]  ;;  %v7122_v62 = vld [vmem:[%s9165_s0 + $0x468] sm:$0xff]  ;;  %v194_v2 = vld [vmem:[%s9165_s0 + $0x470] sm:$0xff] }
  0xa6   :  { %1193 = vmatmul.mubr.f32.gmra.mrb[28].mxu0 %v152_v47  ;;  %4696 = vmatprep.subr.bf16.mxu1 %v4695_v0  ;;  %v652_v47 = vld [vmem:[%s9167_s2 + $0xbc0] sm:$0xff]  ;;  %v202_v6 = vld [vmem:[%s9165_s0 + $0x4b0] sm:$0xff]  ;;  %v201_v8 = vld [vmem:[%s9165_s0 + $0x4a8] sm:$0xff] }
  0xa7   :  { %1198 = vmatprep.mubr.f32.mxu0 %v160_v51  ;;  %4622 = vmatpush1.bf16.msra.mxu0 %v4621_v26  ;;  %v7096_v51 = vld [vmem:[%s9165_s0 + $0x3f0] sm:$0xff]  ;;  %v4629_v57 = vpack.c.bf16 %v656_v49, %v652_v47  ;;  %v7132_v0 = vld [vmem:[%s9165_s0 + $0x460] sm:$0xff]  ;;  %v209_v13 = vld [vmem:[%s9165_s0 + $0x4e8] sm:$0xff] }
  0xa8   :  { %942 = vmatmul.mubr.f32.gmra.mrb[30].mxu1 %v6980_v52  ;;  %4624 = vmatprep.subr.bf16.mxu0 %v4623_v31  ;;  %v7168_v15 = vld [vmem:[%s9165_s0 + $0x4d0] sm:$0xff]  ;;  %v208_v16 = vld [vmem:[%s9165_s0 + $0x4e0] sm:$0xff]  ;;  %v7186_v21 = vld [vmem:[%s9165_s0 + $0x508] sm:$0xff] }
  0xa9   :  { %947 = vmatprep.mubr.f32.mxu1 %v7011_v4  ;;  %4698 = vmatpush1.bf16.msra.mxu1 %v4697_v10  ;;  %v7158_v10 = vld [vmem:[%s9165_s0 + $0x4d8] sm:$0xff]  ;;  %v7176_v17 = vld [vmem:[%s9165_s0 + $0x510] sm:$0xff]  ;;  %v216_v20 = vld [vmem:[%s9165_s0 + $0x520] sm:$0xff] }
  0xaa   :  { %1199 = vmatmul.mubr.f32.gmra.mrb[30].mxu0 %v159_v3  ;;  %4700 = vmatprep.subr.bf16.mxu1 %v4699_v30  ;;  %v7140_v3 = vld [vmem:[%s9165_s0 + $0x4a0] sm:$0xff]  ;;  %v7194_v24 = vld [vmem:[%s9165_s0 + $0x548] sm:$0xff]  ;;  %v222_v30 = vld [vmem:[%s9165_s0 + $0x550] sm:$0xff] }
  0xab   :  { %1204 = vmatprep.mubr.f32.mxu0 %v167_v7  ;;  %4626 = vmatpush1.bf16.msra.mxu0 %v4625_v43  ;;  %v7150_v7 = vld [vmem:[%s9165_s0 + $0x498] sm:$0xff]  ;;  %v7204_v26 = vld [vmem:[%s9165_s0 + $0x540] sm:$0xff]  ;;  %v230_v33 = vld [vmem:[%s9165_s0 + $0x590] sm:$0xff] }
  0xac   :  { %948 = vmatmul.mubr.f32.gmra.mrb[32].mxu1 %v7023_v12  ;;  %4628 = vmatprep.subr.bf16.mxu0 %v4627_v45  ;;  %v7212_v31 = vld [vmem:[%s9165_s0 + $0x580] sm:$0xff]  ;;  %v7222_v34 = vld [vmem:[%s9165_s0 + $0x578] sm:$0xff]  ;;  %v229_v37 = vld [vmem:[%s9165_s0 + $0x588] sm:$0xff] }
  0xad   :  { %953 = vmatprep.mubr.f32.mxu1 %v7047_v23  ;;  %v7230_v38 = vld [vmem:[%s9165_s0 + $0x5b8] sm:$0xff]  ;;  %v236_v43 = vld [vmem:[%s9165_s0 + $0x5c0] sm:$0xff]  ;;  %v7248_v45 = vld [vmem:[%s9165_s0 + $0x5f0] sm:$0xff] }
  0xae   :  { %1205 = vmatmul.mubr.f32.gmra.mrb[32].mxu0 %v166_v22  ;;  %v215_v22 = vld [vmem:[%s9165_s0 + $0x518] sm:$0xff]  ;;  %v244_v47 = vld [vmem:[%s9165_s0 + $0x600] sm:$0xff]  ;;  %v7258_v49 = vld [vmem:[%s9165_s0 + $0x5e8] sm:$0xff] }
  0xaf   :  { %1210 = vmatprep.mubr.f32.mxu0 %v174_v25  ;;  %4630 = vmatpush1.bf16.msra.mxu0 %v4629_v57  ;;  %v223_v25 = vld [vmem:[%s9165_s0 + $0x558] sm:$0xff] }
  0xb0   :  { %954 = vmatmul.mubr.f32.gmra.mrb[34].mxu1 %v7066_v35  ;;  %v251_v57 = vld [vmem:[%s9165_s0 + $0x638] sm:$0xff] }
  0xb1   :  { %959 = vmatprep.mubr.f32.mxu1 %v7080_v40 }
  0xb2   :  { %1211 = vmatmul.mubr.f32.gmra.mrb[34].mxu0 %v173_v39  ;;  %v237_v39 = vld [vmem:[%s9165_s0 + $0x5c8] sm:$0xff] }
  0xb3   :  { %1216 = vmatprep.mubr.f32.mxu0 %v181_v41  ;;  %v7240_v41 = vld [vmem:[%s9165_s0 + $0x5b0] sm:$0xff] }
  0xb4   :  { %960 = vmatmul.mubr.f32.gmra.mrb[36].mxu1 %v7096_v51 }
  0xb5   :  { %965 = vmatprep.mubr.f32.mxu1 %v7104_v55 }
  0xb6   :  { %1217 = vmatmul.mubr.f32.gmra.mrb[36].mxu0 %v180_v53  ;;  %v243_v53 = vld [vmem:[%s9165_s0 + $0x5f8] sm:$0xff] }
  0xb7   :  { %1222 = vmatprep.mubr.f32.mxu0 %v188_v56  ;;  %v7266_v56 = vld [vmem:[%s9165_s0 + $0x628] sm:$0xff] }
  0xb8   :  { %966 = vmatmul.mubr.f32.gmra.mrb[38].mxu1 %v7114_v58 }
  0xb9   :  { %971 = vmatprep.mubr.f32.mxu1 %v7122_v62 }
  0xba   :  { %1223 = vmatmul.mubr.f32.gmra.mrb[38].mxu0 %v187_v59  ;;  %v7276_v59 = vld [vmem:[%s9165_s0 + $0x620] sm:$0xff] }
  0xbb   :  { %1228 = vmatprep.mubr.f32.mxu0 %v195_v63  ;;  %v250_v63 = vld [vmem:[%s9165_s0 + $0x630] sm:$0xff] }
  0xbc   :  { %972 = vmatmul.mubr.f32.gmra.mrb[40].mxu1 %v7132_v0 }
  0xbd   :  { %977 = vmatprep.mubr.f32.mxu1 %v7140_v3 }
  0xbe   :  { %1229 = vmatmul.mubr.f32.gmra.mrb[40].mxu0 %v194_v2  ;;  %v7284_v2 = vld [vmem:[%s9165_s0 + $0x660] sm:$0xff] }
  0xbf   :  { %1234 = vmatprep.mubr.f32.mxu0 %v202_v6  ;;  %v258_v6 = vld [vmem:[%s9165_s0 + $0x670] sm:$0xff] }
  0xc0   :  { %978 = vmatmul.mubr.f32.gmra.mrb[42].mxu1 %v7150_v7 }
  0xc1   :  { %983 = vmatprep.mubr.f32.mxu1 %v7158_v10 }
  0xc2   :  { %1235 = vmatmul.mubr.f32.gmra.mrb[42].mxu0 %v201_v8  ;;  %v7294_v8 = vld [vmem:[%s9165_s0 + $0x658] sm:$0xff] }
  0xc3   :  { %1240 = vmatprep.mubr.f32.mxu0 %v209_v13  ;;  %v257_v13 = vld [vmem:[%s9165_s0 + $0x668] sm:$0xff] }
  0xc4   :  { %984 = vmatmul.mubr.f32.gmra.mrb[44].mxu1 %v7168_v15 }
  0xc5   :  { %989 = vmatprep.mubr.f32.mxu1 %v7176_v17 }
  0xc6   :  { %1241 = vmatmul.mubr.f32.gmra.mrb[44].mxu0 %v208_v16  ;;  %v7302_v16 = vld [vmem:[%s9165_s0 + $0x698] sm:$0xff] }
  0xc7   :  { %1246 = vmatprep.mubr.f32.mxu0 %v216_v20  ;;  %v265_v20 = vld [vmem:[%s9165_s0 + $0x6a8] sm:$0xff] }
  0xc8   :  { %990 = vmatmul.mubr.f32.gmra.mrb[46].mxu1 %v7186_v21 }
  0xc9   :  { %995 = vmatprep.mubr.f32.mxu1 %v7194_v24 }
  0xca   :  { %1247 = vmatmul.mubr.f32.gmra.mrb[46].mxu0 %v215_v22  ;;  %v7312_v22 = vld [vmem:[%s9165_s0 + $0x690] sm:$0xff] }
  0xcb   :  { %1252 = vmatprep.mubr.f32.mxu0 %v223_v25  ;;  %9181 = vst [vmem:[#allocation11_spill] sm:$0xff] %v7312_v22  ;;  %v264_v25 = vld [vmem:[%s9165_s0 + $0x6a0] sm:$0xff] }
  0xcc   :  { %996 = vmatmul.mubr.f32.gmra.mrb[48].mxu1 %v7204_v26 }
  0xcd   :  { %1001 = vmatprep.mubr.f32.mxu1 %v7212_v31 }
  0xce   :  { %1253 = vmatmul.mubr.f32.gmra.mrb[48].mxu0 %v222_v30  ;;  %v7320_v30 = vld [vmem:[%s9165_s0 + $0x6d0] sm:$0xff] }
  0xcf   :  { %1258 = vmatprep.mubr.f32.mxu0 %v230_v33  ;;  %9182 = vst [vmem:[#allocation12_spill] sm:$0xff] %v7320_v30  ;;  %v272_v33 = vld [vmem:[%s9165_s0 + $0x6e0] sm:$0xff] }
  0xd0   :  { %1002 = vmatmul.mubr.f32.gmra.mrb[50].mxu1 %v7222_v34 }
  0xd1   :  { %1007 = vmatprep.mubr.f32.mxu1 %v7230_v38 }
  0xd2   :  { %1259 = vmatmul.mubr.f32.gmra.mrb[50].mxu0 %v229_v37  ;;  %v7330_v37 = vld [vmem:[%s9165_s0 + $0x6c8] sm:$0xff] }
  0xd3   :  { %1264 = vmatprep.mubr.f32.mxu0 %v237_v39  ;;  %9183 = vst [vmem:[#allocation13_spill] sm:$0xff] %v7330_v37  ;;  %v271_v39 = vld [vmem:[%s9165_s0 + $0x6d8] sm:$0xff] }
  0xd4   :  { %1008 = vmatmul.mubr.f32.gmra.mrb[52].mxu1 %v7240_v41 }
  0xd5   :  { %1013 = vmatprep.mubr.f32.mxu1 %v7248_v45 }
  0xd6   :  { %1265 = vmatmul.mubr.f32.gmra.mrb[52].mxu0 %v236_v43  ;;  %v406_v43 = vld [vmem:[%s9167_s2 + $0x410] sm:$0xff] }
  0xd7   :  { %1270 = vmatprep.mubr.f32.mxu0 %v244_v47  ;;  %v410_v47 = vld [vmem:[%s9167_s2 + $0x430] sm:$0xff] }
  0xd8   :  { %1014 = vmatmul.mubr.f32.gmra.mrb[54].mxu1 %v7258_v49 }
  0xd9   :  { %1019 = vmatprep.mubr.f32.mxu1 %v7266_v56 }
  0xda   :  { %1271 = vmatmul.mubr.f32.gmra.mrb[54].mxu0 %v243_v53  ;;  %v661_v53 = vld [vmem:[%s9167_s2 + $0xc08] sm:$0xff] }
  0xdb   :  { %1276 = vmatprep.mubr.f32.mxu0 %v251_v57  ;;  %v665_v57 = vld [vmem:[%s9167_s2 + $0xc28] sm:$0xff] }
  0xdc   :  { %1020 = vmatmul.mubr.f32.gmra.mrb[56].mxu1 %v7276_v59 }
  0xdd   :  { %1025 = vmatprep.mubr.f32.mxu1 %v7284_v2 }
  0xde   :  { %1277 = vmatmul.mubr.f32.gmra.mrb[56].mxu0 %v250_v63  ;;  %v57_v63 = vld [vmem:[%s9165_s0 + $0x28] sm:$0xff] }
  0xdf   :  { %1282 = vmatprep.mubr.f32.mxu0 %v258_v6  ;;  %v415_v6 = vld [vmem:[%s9167_s2 + $0x458] sm:$0xff] }
  0xe0   :  { %1026 = vmatmul.mubr.f32.gmra.mrb[58].mxu1 %v7294_v8 }
  0xe1   :  { %1031 = vmatprep.mubr.f32.mxu1 %v7302_v16 }
  0xe2   :  { %1283 = vmatmul.mubr.f32.gmra.mrb[58].mxu0 %v257_v13  ;;  %v4631_v13 = vpack.c.bf16 %v665_v57, %v661_v53  ;;  %v4701_v53 = vpack.c.bf16 %v410_v47, %v406_v43  ;;  %v56_v57 = vld [vmem:[%s9165_s0 + $0x20] sm:$0xff] }
  0xe3   :  { %1288 = vmatprep.mubr.f32.mxu0 %v265_v20  ;;  %v419_v20 = vld [vmem:[%s9167_s2 + $0x478] sm:$0xff]  ;;  %v5705_v47 = vld [vmem:[%s9165_s0] sm:$0xff] }
  0xe4   :  { %1032 = vmatmul.mubr.f32.gmra.mrb[60].mxu1 %v7312_v22  ;;  %4632 = vmatprep.subr.bf16.mxu0 %v4631_v13  ;;  %v4703_v22 = vpack.c.bf16 %v419_v20, %v415_v6  ;;  %v427_v6 = vld [vmem:[%s9167_s2 + $0x4b8] sm:$0xff]  ;;  %v5706_v13 = vld [vmem:[%s9165_s0 + $0x40] sm:$0xff] }
  0xe5   :  { %1037 = vmatprep.mubr.f32.mxu1 %v7320_v30  ;;  %v5704_v30 = vld [vmem:[%s9165_s0 + $0x8] sm:$0xff]  ;;  %v63_v20 = vld [vmem:[%s9165_s0 + $0x58] sm:$0xff] }
  0xe6   :  { %1289 = vmatmul.mubr.f32.gmra.mrb[60].mxu0 %v264_v25  ;;  %v660_v25 = vld [vmem:[%s9167_s2 + $0xc00] sm:$0xff] }
  0xe7   :  { %1294 = vmatprep.mubr.f32.mxu0 %v272_v33  ;;  %v664_v33 = vld [vmem:[%s9167_s2 + $0xc20] sm:$0xff] }
  0xe8   :  { %1038 = vmatmul.mubr.f32.gmra.mrb[62].mxu1 %v7330_v37  ;;  %v64_v37 = vld [vmem:[%s9165_s0 + $0x60] sm:$0xff]  ;;  %v4633_v43 = vpack.c.bf16 %v664_v33, %v660_v25  ;;  %v71_v33 = vld [vmem:[%s9165_s0 + $0x98] sm:$0xff] }
  0xe9   :  { %1879 = vmatprep.mubr.f32.mxu1 %v5704_v30  ;;  %v418_v30 = vld [vmem:[%s9167_s2 + $0x470] sm:$0xff] }
  0xea   :  { %1295 = vmatmul.mubr.f32.gmra.mrb[62].mxu0 %v271_v39  ;;  %v414_v39 = vld [vmem:[%s9167_s2 + $0x450] sm:$0xff] }
  0xeb   :  { %1365 = vmatprep.mubr.f32.mxu0 %v57_v63  ;;  %v423_v63 = vld [vmem:[%s9167_s2 + $0x498] sm:$0xff]  ;;  %v4705_v25 = vpack.c.bf16 %v418_v30, %v414_v39 }
  0xec   :  { %1880 = vmatmul.mubr.f32.vlgmr.msra.gmra.mrb[64].mxu1 %v5705_v47  ;;  %v4707_v47 = vpack.c.bf16 %v427_v6, %v423_v63  ;;  %v431_v39 = vld [vmem:[%s9167_s2 + $0x4d8] sm:$0xff]  ;;  %v78_v6 = vld [vmem:[%s9165_s0 + $0xd0] sm:$0xff] }
  0xed   :  { %4702 = vmatpush1.bf16.msra.mxu1 %v4701_v53  ;;  %1885 = vmatprep.mubr.f32.mxu1 %v5706_v13  ;;  %v426_v53 = vld [vmem:[%s9167_s2 + $0x4b0] sm:$0xff]  ;;  %v5708_v30 = vld [vmem:[%s9165_s0 + $0x78] sm:$0xff] }
  0xee   :  { %1366 = vmatmul.mubr.f32.vlgmr.msra.gmra.mrb[0].mxu0 %v56_v57  ;;  %4704 = vmatprep.subr.bf16.mxu1 %v4703_v22  ;;  %v5707_v57 = vld [vmem:[%s9165_s0 + $0x38] sm:$0xff] }
  0xef   :  { %1371 = vmatprep.mubr.f32.mxu0 %v64_v37  ;;  %v422_v37 = vld [vmem:[%s9167_s2 + $0x490] sm:$0xff]  ;;  %4634 = vmatpush1.bf16.msra.mxu0 %v4633_v43  ;;  %v435_v22 = vld [vmem:[%s9167_s2 + $0x4f8] sm:$0xff] }
  0xf0   :  { %1886 = vmatmul.mubr.f32.gmra.mrb[66].mxu1 %v5707_v57  ;;  %v70_v43 = vld [vmem:[%s9165_s0 + $0x90] sm:$0xff]  ;;  %v4709_v63 = vpack.c.bf16 %v426_v53, %v422_v37  ;;  %v4711_v13 = vpack.c.bf16 %v435_v22, %v431_v39  ;;  %v77_v53 = vld [vmem:[%s9165_s0 + $0xc8] sm:$0xff] }
  0xf1   :  { %1891 = vmatprep.mubr.f32.mxu1 %v5708_v30  ;;  %4706 = vmatpush1.bf16.msra.mxu1 %v4705_v25  ;;  %v5709_v57 = vld [vmem:[%s9165_s0 + $0x70] sm:$0xff]  ;;  %v439_v25 = vld [vmem:[%s9167_s2 + $0x518] sm:$0xff]  ;;  %v85_v22 = vld [vmem:[%s9165_s0 + $0x108] sm:$0xff] }
  0xf2   :  { %1372 = vmatmul.mubr.f32.gmra.mrb[2].mxu0 %v63_v20  ;;  %4708 = vmatprep.subr.bf16.mxu1 %v4707_v47  ;;  %v430_v20 = vld [vmem:[%s9167_s2 + $0x4d0] sm:$0xff]  ;;  %v443_v47 = vld [vmem:[%s9167_s2 + $0x538] sm:$0xff] }
  0xf3   :  { %1377 = vmatprep.mubr.f32.mxu0 %v71_v33  ;;  %v434_v33 = vld [vmem:[%s9167_s2 + $0x4f0] sm:$0xff]  ;;  %v4715_v30 = vpack.c.bf16 %v443_v47, %v439_v25  ;;  %v92_v47 = vld [vmem:[%s9165_s0 + $0x140] sm:$0xff] }
  0xf4   :  { %1892 = vmatmul.mubr.f32.gmra.mrb[68].mxu1 %v5709_v57  ;;  %v5710_v37 = vld [vmem:[%s9165_s0 + $0xb0] sm:$0xff]  ;;  %v4713_v39 = vpack.c.bf16 %v434_v33, %v430_v20  ;;  %v5711_v57 = vld [vmem:[%s9165_s0 + $0xa8] sm:$0xff]  ;;  %v84_v33 = vld [vmem:[%s9165_s0 + $0x100] sm:$0xff] }
  0xf5   :  { %1897 = vmatprep.mubr.f32.mxu1 %v5710_v37  ;;  %4710 = vmatpush1.bf16.msra.mxu1 %v4709_v63  ;;  %v447_v63 = vld [vmem:[%s9167_s2 + $0x558] sm:$0xff]  ;;  %v5712_v20 = vld [vmem:[%s9165_s0 + $0xe8] sm:$0xff] }
  0xf6   :  { %1378 = vmatmul.mubr.f32.gmra.mrb[4].mxu0 %v70_v43  ;;  %4712 = vmatprep.subr.bf16.mxu1 %v4711_v13  ;;  %v438_v43 = vld [vmem:[%s9167_s2 + $0x510] sm:$0xff]  ;;  %v451_v13 = vld [vmem:[%s9167_s2 + $0x578] sm:$0xff] }
  0xf7   :  { %1383 = vmatprep.mubr.f32.mxu0 %v78_v6  ;;  %v442_v6 = vld [vmem:[%s9167_s2 + $0x530] sm:$0xff]  ;;  %v4719_v37 = vpack.c.bf16 %v451_v13, %v447_v63  ;;  %v99_v63 = vld [vmem:[%s9165_s0 + $0x178] sm:$0xff] }
  0xf8   :  { %1898 = vmatmul.mubr.f32.gmra.mrb[70].mxu1 %v5711_v57  ;;  %v4717_v25 = vpack.c.bf16 %v442_v6, %v438_v43  ;;  %v5713_v57 = vld [vmem:[%s9165_s0 + $0xe0] sm:$0xff]  ;;  %v91_v43 = vld [vmem:[%s9165_s0 + $0x138] sm:$0xff] }
  0xf9   :  { %1903 = vmatprep.mubr.f32.mxu1 %v5712_v20  ;;  %4714 = vmatpush1.bf16.msra.mxu1 %v4713_v39  ;;  %v455_v39 = vld [vmem:[%s9167_s2 + $0x598] sm:$0xff]  ;;  %v454_v20 = vld [vmem:[%s9167_s2 + $0x590] sm:$0xff] }
  0xfa   :  { %1384 = vmatmul.mubr.f32.gmra.mrb[6].mxu0 %v77_v53  ;;  %4716 = vmatprep.subr.bf16.mxu1 %v4715_v30  ;;  %v446_v53 = vld [vmem:[%s9167_s2 + $0x550] sm:$0xff]  ;;  %v459_v30 = vld [vmem:[%s9167_s2 + $0x5b8] sm:$0xff] }
  0xfb   :  { %1389 = vmatprep.mubr.f32.mxu0 %v85_v22  ;;  %v450_v22 = vld [vmem:[%s9167_s2 + $0x570] sm:$0xff]  ;;  %v4723_v13 = vpack.c.bf16 %v459_v30, %v455_v39  ;;  %v471_v30 = vld [vmem:[%s9167_s2 + $0x618] sm:$0xff] }
  0xfc   :  { %1904 = vmatmul.mubr.f32.gmra.mrb[72].mxu1 %v5713_v57  ;;  %v4721_v6 = vpack.c.bf16 %v450_v22, %v446_v53  ;;  %v106_v22 = vld [vmem:[%s9165_s0 + $0x1b0] sm:$0xff] }
  0xfd   :  { %1909 = vmatprep.mubr.f32.mxu1 %v6553_v60  ;;  %4718 = vmatpush1.bf16.msra.mxu1 %v4717_v25  ;;  %v458_v60 = vld [vmem:[%s9167_s2 + $0x5b0] sm:$0xff]  ;;  %v463_v25 = vld [vmem:[%s9167_s2 + $0x5d8] sm:$0xff] }
  0xfe   :  { %1390 = vmatmul.mubr.f32.gmra.mrb[8].mxu0 %v84_v33  ;;  %4720 = vmatprep.subr.bf16.mxu1 %v4719_v37  ;;  %v5714_v33 = vld [vmem:[%s9165_s0 + $0x118] sm:$0xff]  ;;  %v98_v37 = vld [vmem:[%s9165_s0 + $0x170] sm:$0xff]  ;;  %v4725_v53 = vpack.c.bf16 %v458_v60, %v454_v20 }
  0xff   :  { %1395 = vmatprep.mubr.f32.mxu0 %v92_v47  ;;  %v467_v47 = vld [vmem:[%s9167_s2 + $0x5f8] sm:$0xff]  ;;  %v462_v39 = vld [vmem:[%s9167_s2 + $0x5d0] sm:$0xff] }
 0x100   :  { %1910 = vmatmul.mubr.f32.gmra.mrb[74].mxu1 %v5714_v33  ;;  %v4727_v57 = vpack.c.bf16 %v467_v47, %v463_v25  ;;  %v470_v20 = vld [vmem:[%s9167_s2 + $0x610] sm:$0xff]  ;;  %v479_v60 = vld [vmem:[%s9167_s2 + $0x658] sm:$0xff]  ;;  %v112_v25 = vld [vmem:[%s9165_s0 + $0x1e0] sm:$0xff] }
 0x101   :  { %1915 = vmatprep.mubr.f32.mxu1 %v6589_v11  ;;  %4722 = vmatpush1.bf16.msra.mxu1 %v4721_v6  ;;  %v466_v11 = vld [vmem:[%s9167_s2 + $0x5f0] sm:$0xff]  ;;  %v105_v6 = vld [vmem:[%s9165_s0 + $0x1a8] sm:$0xff]  ;;  %v483_v33 = vld [vmem:[%s9167_s2 + $0x678] sm:$0xff] }
 0x102   :  { %1396 = vmatmul.mubr.f32.gmra.mrb[10].mxu0 %v91_v43  ;;  %4724 = vmatprep.subr.bf16.mxu1 %v4723_v13  ;;  %v475_v43 = vld [vmem:[%s9167_s2 + $0x638] sm:$0xff] }
 0x103   :  { %1401 = vmatprep.mubr.f32.mxu0 %v99_v63  ;;  %v4729_v63 = vpack.c.bf16 %v466_v11, %v462_v39  ;;  %v4731_v13 = vpack.c.bf16 %v475_v43, %v471_v30  ;;  %v119_v39 = vld [vmem:[%s9165_s0 + $0x218] sm:$0xff]  ;;  %v486_v43 = vld [vmem:[%s9167_s2 + $0x690] sm:$0xff] }
 0x104   :  { %1916 = vmatmul.mubr.f32.gmra.mrb[76].mxu1 %v6628_v27  ;;  %v113_v27 = vld [vmem:[%s9165_s0 + $0x1e8] sm:$0xff] }
 0x105   :  { %1921 = vmatprep.mubr.f32.mxu1 %v6636_v29  ;;  %4726 = vmatpush1.bf16.msra.mxu1 %v4725_v53  ;;  %v474_v29 = vld [vmem:[%s9167_s2 + $0x630] sm:$0xff] }
 0x106   :  { %1402 = vmatmul.mubr.f32.gmra.mrb[12].mxu0 %v98_v37  ;;  %4728 = vmatprep.subr.bf16.mxu1 %v4727_v57  ;;  %v4733_v47 = vpack.c.bf16 %v474_v29, %v470_v20  ;;  %v4735_v37 = vpack.c.bf16 %v483_v33, %v479_v60  ;;  %v478_v53 = vld [vmem:[%s9167_s2 + $0x650] sm:$0xff]  ;;  %v491_v57 = vld [vmem:[%s9167_s2 + $0x6b8] sm:$0xff] }
 0x107   :  { %1407 = vmatprep.mubr.f32.mxu0 %v106_v22  ;;  %v487_v22 = vld [vmem:[%s9167_s2 + $0x698] sm:$0xff]  ;;  %v494_v29 = vld [vmem:[%s9167_s2 + $0x6d0] sm:$0xff] }
 0x108   :  { %1922 = vmatmul.mubr.f32.gmra.mrb[78].mxu1 %v6670_v44  ;;  %v120_v44 = vld [vmem:[%s9165_s0 + $0x220] sm:$0xff]  ;;  %v4739_v30 = vpack.c.bf16 %v491_v57, %v487_v22  ;;  %v503_v60 = vld [vmem:[%s9167_s2 + $0x718] sm:$0xff] }
 0x109   :  { %1927 = vmatprep.mubr.f32.mxu1 %v6678_v46  ;;  %4730 = vmatpush1.bf16.msra.mxu1 %v4729_v63  ;;  %v482_v46 = vld [vmem:[%s9167_s2 + $0x670] sm:$0xff]  ;;  %v499_v63 = vld [vmem:[%s9167_s2 + $0x6f8] sm:$0xff]  ;;  %v140_v22 = vld [vmem:[%s9165_s0 + $0x2c0] sm:$0xff] }
 0x10a   :  { %1408 = vmatmul.mubr.f32.gmra.mrb[14].mxu0 %v105_v6  ;;  %4732 = vmatprep.subr.bf16.mxu1 %v4731_v13  ;;  %v4737_v11 = vpack.c.bf16 %v482_v46, %v478_v53  ;;  %v495_v6 = vld [vmem:[%s9167_s2 + $0x6d8] sm:$0xff] }
 0x10b   :  { %1413 = vmatprep.mubr.f32.mxu0 %v113_v27  ;;  %v126_v27 = vld [vmem:[%s9165_s0 + $0x250] sm:$0xff]  ;;  %v4743_v20 = vpack.c.bf16 %v499_v63, %v495_v6  ;;  %v507_v33 = vld [vmem:[%s9167_s2 + $0x738] sm:$0xff] }
 0x10c   :  { %1928 = vmatmul.mubr.f32.gmra.mrb[80].mxu1 %v6712_v61  ;;  %v127_v61 = vld [vmem:[%s9165_s0 + $0x258] sm:$0xff]  ;;  %v518_v63 = vld [vmem:[%s9167_s2 + $0x790] sm:$0xff] }
 0x10d   :  { %1933 = vmatprep.mubr.f32.mxu1 %v6726_v1  ;;  %4734 = vmatpush1.bf16.msra.mxu1 %v4733_v47  ;;  %v490_v1 = vld [vmem:[%s9167_s2 + $0x6b0] sm:$0xff]  ;;  %v511_v53 = vld [vmem:[%s9167_s2 + $0x758] sm:$0xff] }
 0x10e   :  { %1414 = vmatmul.mubr.f32.gmra.mrb[16].mxu0 %v112_v25  ;;  %4736 = vmatprep.subr.bf16.mxu1 %v4735_v37  ;;  %v4741_v13 = vpack.c.bf16 %v490_v1, %v486_v43  ;;  %v133_v25 = vld [vmem:[%s9165_s0 + $0x288] sm:$0xff]  ;;  %v502_v37 = vld [vmem:[%s9167_s2 + $0x710] sm:$0xff]  ;;  %v515_v46 = vld [vmem:[%s9167_s2 + $0x778] sm:$0xff] }
 0x10f   :  { %1419 = vmatprep.mubr.f32.mxu0 %v120_v44  ;;  %v4747_v44 = vpack.c.bf16 %v507_v33, %v503_v60  ;;  %v147_v43 = vld [vmem:[%s9165_s0 + $0x2f8] sm:$0xff] }
 0x110   :  { %1934 = vmatmul.mubr.f32.gmra.mrb[82].mxu1 %v6754_v14  ;;  %v134_v14 = vld [vmem:[%s9165_s0 + $0x290] sm:$0xff]  ;;  %v535_v60 = vld [vmem:[%s9167_s2 + $0x818] sm:$0xff] }
 0x111   :  { %1939 = vmatprep.mubr.f32.mxu1 %v6768_v18  ;;  %4738 = vmatpush1.bf16.msra.mxu1 %v4737_v11  ;;  %v498_v18 = vld [vmem:[%s9167_s2 + $0x6f0] sm:$0xff]  ;;  %v539_v33 = vld [vmem:[%s9167_s2 + $0x838] sm:$0xff] }
 0x112   :  { %1420 = vmatmul.mubr.f32.gmra.mrb[18].mxu0 %v119_v39  ;;  %4740 = vmatprep.subr.bf16.mxu1 %v4739_v30  ;;  %v4745_v47 = vpack.c.bf16 %v498_v18, %v494_v29  ;;  %v4751_v39 = vpack.c.bf16 %v515_v46, %v511_v53  ;;  %v510_v11 = vld [vmem:[%s9167_s2 + $0x750] sm:$0xff]  ;;  %v523_v30 = vld [vmem:[%s9167_s2 + $0x7b8] sm:$0xff] }
 0x113   :  { %1425 = vmatprep.mubr.f32.mxu0 %v127_v61  ;;  %v519_v61 = vld [vmem:[%s9167_s2 + $0x798] sm:$0xff]  ;;  %v526_v18 = vld [vmem:[%s9167_s2 + $0x7d0] sm:$0xff] }
 0x114   :  { %1940 = vmatmul.mubr.f32.gmra.mrb[84].mxu1 %v6796_v32  ;;  %v141_v32 = vld [vmem:[%s9165_s0 + $0x2c8] sm:$0xff]  ;;  %v4755_v6 = vpack.c.bf16 %v523_v30, %v519_v61  ;;  %v218_v53 = vld [vmem:[%s9165_s0 + $0x530] sm:$0xff] }
 0x115   :  { %1945 = vmatprep.mubr.f32.mxu1 %v6810_v36  ;;  %4742 = vmatpush1.bf16.msra.mxu1 %v4741_v13  ;;  %v506_v36 = vld [vmem:[%s9167_s2 + $0x730] sm:$0xff]  ;;  %v531_v13 = vld [vmem:[%s9167_s2 + $0x7f8] sm:$0xff] }
 0x116   :  { %1426 = vmatmul.mubr.f32.gmra.mrb[20].mxu0 %v126_v27  ;;  %4744 = vmatprep.subr.bf16.mxu1 %v4743_v20  ;;  %v4749_v57 = vpack.c.bf16 %v506_v36, %v502_v37  ;;  %v527_v27 = vld [vmem:[%s9167_s2 + $0x7d8] sm:$0xff]  ;;  %v246_v61 = vld [vmem:[%s9165_s0 + $0x610] sm:$0xff] }
 0x117   :  { %1431 = vmatprep.mubr.f32.mxu0 %v134_v14  ;;  %v154_v14 = vld [vmem:[%s9165_s0 + $0x330] sm:$0xff]  ;;  %v4759_v29 = vpack.c.bf16 %v531_v13, %v527_v27  ;;  %v211_v37 = vld [vmem:[%s9165_s0 + $0x4f8] sm:$0xff] }
 0x118   :  { %1946 = vmatmul.mubr.f32.gmra.mrb[86].mxu1 %v6838_v50  ;;  %v148_v50 = vld [vmem:[%s9165_s0 + $0x300] sm:$0xff]  ;;  %v274_v27 = vld [vmem:[%s9165_s0 + $0x6f0] sm:$0xff] }
 0x119   :  { %1951 = vmatprep.mubr.f32.mxu1 %v6852_v54  ;;  %4746 = vmatpush1.bf16.msra.mxu1 %v4745_v47  ;;  %v514_v54 = vld [vmem:[%s9167_s2 + $0x770] sm:$0xff] }
 0x11a   :  { %1432 = vmatmul.mubr.f32.gmra.mrb[22].mxu0 %v133_v25  ;;  %4748 = vmatprep.subr.bf16.mxu1 %v4747_v44  ;;  %v4753_v1 = vpack.c.bf16 %v514_v54, %v510_v11  ;;  %v161_v25 = vld [vmem:[%s9165_s0 + $0x368] sm:$0xff]  ;;  %v176_v44 = vld [vmem:[%s9165_s0 + $0x3e0] sm:$0xff]  ;;  %v239_v11 = vld [vmem:[%s9165_s0 + $0x5d8] sm:$0xff] }
 0x11b   :  { %1437 = vmatprep.mubr.f32.mxu0 %v141_v32  ;;  %v4763_v32 = vpack.c.bf16 %v539_v33, %v535_v60  ;;  %v543_v60 = vld [vmem:[%s9167_s2 + $0x858] sm:$0xff] }
 0x11c   :  { %1952 = vmatmul.mubr.f32.gmra.mrb[88].mxu1 %v6880_v5  ;;  %v155_v5 = vld [vmem:[%s9165_s0 + $0x338] sm:$0xff] }
 0x11d   :  { %1957 = vmatprep.mubr.f32.mxu1 %v6894_v9  ;;  %4750 = vmatpush1.bf16.msra.mxu1 %v4749_v57  ;;  %v522_v9 = vld [vmem:[%s9167_s2 + $0x7b0] sm:$0xff]  ;;  %v547_v33 = vld [vmem:[%s9167_s2 + $0x878] sm:$0xff] }
 0x11e   :  { %1438 = vmatmul.mubr.f32.gmra.mrb[24].mxu0 %v140_v22  ;;  %4752 = vmatprep.subr.bf16.mxu1 %v4751_v39  ;;  %v4757_v20 = vpack.c.bf16 %v522_v9, %v518_v63  ;;  %v225_v22 = vld [vmem:[%s9165_s0 + $0x568] sm:$0xff]  ;;  %v267_v63 = vld [vmem:[%s9165_s0 + $0x6b8] sm:$0xff] }
 0x11f   :  { %1443 = vmatprep.mubr.f32.mxu0 %v148_v50  ;;  %v232_v50 = vld [vmem:[%s9165_s0 + $0x5a0] sm:$0xff] }
 0x120   :  { %1958 = vmatmul.mubr.f32.gmra.mrb[90].mxu1 %v6909_v19  ;;  %v162_v19 = vld [vmem:[%s9165_s0 + $0x370] sm:$0xff] }
 0x121   :  { %1963 = vmatprep.mubr.f32.mxu1 %v6933_v28  ;;  %4754 = vmatpush1.bf16.msra.mxu1 %v4753_v1  ;;  %v530_v28 = vld [vmem:[%s9167_s2 + $0x7f0] sm:$0xff] }
 0x122   :  { %1444 = vmatmul.mubr.f32.gmra.mrb[26].mxu0 %v147_v43  ;;  %4756 = vmatprep.subr.bf16.mxu1 %v4755_v6  ;;  %v4761_v47 = vpack.c.bf16 %v530_v28, %v526_v18  ;;  %v253_v43 = vld [vmem:[%s9165_s0 + $0x648] sm:$0xff]  ;;  %v9186_v28 = vld [vmem:[#allocation13_spill] sm:$0xff] }
 0x123   :  { %1449 = vmatprep.mubr.f32.mxu0 %v155_v5  ;;  %v260_v5 = vld [vmem:[%s9165_s0 + $0x680] sm:$0xff] }
 0x124   :  { %1964 = vmatmul.mubr.f32.gmra.mrb[92].mxu1 %v6958_v42  ;;  %v169_v42 = vld [vmem:[%s9165_s0 + $0x3a8] sm:$0xff] }
 0x125   :  { %1969 = vmatprep.mubr.f32.mxu1 %v6972_v48  ;;  %4758 = vmatpush1.bf16.msra.mxu1 %v4757_v20  ;;  %v168_v48 = vld [vmem:[%s9165_s0 + $0x3a0] sm:$0xff]  ;;  %v534_v20 = vld [vmem:[%s9167_s2 + $0x810] sm:$0xff] }
 0x126   :  { %1450 = vmatmul.mubr.f32.gmra.mrb[28].mxu0 %v154_v14  ;;  %4760 = vmatprep.subr.bf16.mxu1 %v4759_v29  ;;  %v9184_v14 = vld [vmem:[#allocation11_spill] sm:$0xff] }
 0x127   :  { %1455 = vmatprep.mubr.f32.mxu0 %v162_v19  ;;  %v538_v19 = vld [vmem:[%s9167_s2 + $0x830] sm:$0xff] }
 0x128   :  { %1970 = vmatmul.mubr.f32.gmra.mrb[94].mxu1 %v6980_v52  ;;  %v175_v52 = vld [vmem:[%s9165_s0 + $0x3d8] sm:$0xff] }
 0x129   :  { %1975 = vmatprep.mubr.f32.mxu1 %v7011_v4  ;;  %4762 = vmatpush1.bf16.msra.mxu1 %v4761_v47  ;;  %v183_v4 = vld [vmem:[%s9165_s0 + $0x418] sm:$0xff]  ;;  %v4765_v47 = vpack.c.bf16 %v538_v19, %v534_v20 }
 0x12a   :  { %1456 = vmatmul.mubr.f32.gmra.mrb[30].mxu0 %v161_v25  ;;  %4764 = vmatprep.subr.bf16.mxu1 %v4763_v32  ;;  %v5715_v25 = vld [vmem:[%s9165_s0 + $0x18] sm:$0xff]  ;;  %v58_v32 = vld [vmem:[%s9165_s0 + $0x30] sm:$0xff] }
 0x12b   :  { %1461 = vmatprep.mubr.f32.mxu0 %v169_v42  ;;  %v9177_v42 = vmov 0.0  }
 0x12c   :  { %1976 = vmatmul.mubr.f32.gmra.mrb[96].mxu1 %v7023_v12  ;;  %v182_v12 = vld [vmem:[%s9165_s0 + $0x410] sm:$0xff] }
 0x12d   :  { %1981 = vmatprep.mubr.f32.mxu1 %v7047_v23  ;;  %v190_v23 = vld [vmem:[%s9165_s0 + $0x450] sm:$0xff] }
 0x12e   :  { %1462 = vmatmul.mubr.f32.gmra.mrb[32].mxu0 %v168_v48 }
 0x12f   :  { %1467 = vmatprep.mubr.f32.mxu0 %v176_v44  ;;  %v4767_v44 = vpack.c.bf16 %v547_v33, %v543_v60  ;;  %v570_v60 = vld [vmem:[%s9167_s2 + $0x930] sm:$0xff] }
 0x130   :  { %1982 = vmatmul.mubr.f32.gmra.mrb[98].mxu1 %v7066_v35  ;;  %v189_v35 = vld [vmem:[%s9165_s0 + $0x448] sm:$0xff] }
 0x131   :  { %1987 = vmatprep.mubr.f32.mxu1 %v7080_v40  ;;  %v197_v40 = vld [vmem:[%s9165_s0 + $0x488] sm:$0xff] }
 0x132   :  { %1468 = vmatmul.mubr.f32.gmra.mrb[34].mxu0 %v175_v52  ;;  %v542_v52 = vld [vmem:[%s9167_s2 + $0x850] sm:$0xff] }
 0x133   :  { %1473 = vmatprep.mubr.f32.mxu0 %v183_v4  ;;  %v546_v4 = vld [vmem:[%s9167_s2 + $0x870] sm:$0xff] }
 0x134   :  { %1988 = vmatmul.mubr.f32.gmra.mrb[100].mxu1 %v7096_v51  ;;  %v196_v51 = vld [vmem:[%s9165_s0 + $0x480] sm:$0xff] }
 0x135   :  { %1993 = vmatprep.mubr.f32.mxu1 %v7104_v55  ;;  %v204_v55 = vld [vmem:[%s9165_s0 + $0x4c0] sm:$0xff] }
 0x136   :  { %1474 = vmatmul.mubr.f32.gmra.mrb[36].mxu0 %v182_v12 }
 0x137   :  { %1479 = vmatprep.mubr.f32.mxu0 %v190_v23  ;;  %v5716_v23 = vld [vmem:[%s9165_s0 + $0x10] sm:$0xff] }
 0x138   :  { %1994 = vmatmul.mubr.f32.gmra.mrb[102].mxu1 %v7114_v58  ;;  %v203_v58 = vld [vmem:[%s9165_s0 + $0x4b8] sm:$0xff] }
 0x139   :  { %1999 = vmatprep.mubr.f32.mxu1 %v7122_v62 }
 0x13a   :  { %1480 = vmatmul.mubr.f32.gmra.mrb[38].mxu0 %v189_v35  ;;  %v551_v35 = vld [vmem:[%s9167_s2 + $0x898] sm:$0xff] }
 0x13b   :  { %1485 = vmatprep.mubr.f32.mxu0 %v197_v40  ;;  %v555_v40 = vld [vmem:[%s9167_s2 + $0x8b8] sm:$0xff] }
 0x13c   :  { %2000 = vmatmul.mubr.f32.gmra.mrb[104].mxu1 %v7132_v0  ;;  %v210_v0 = vld [vmem:[%s9165_s0 + $0x4f0] sm:$0xff] }
 0x13d   :  { %2005 = vmatprep.mubr.f32.mxu1 %v7140_v3 }
 0x13e   :  { %1486 = vmatmul.mubr.f32.gmra.mrb[40].mxu0 %v196_v51  ;;  %v5717_v51 = vld [vmem:[%s9165_s0 + $0x50] sm:$0xff] }
 0x13f   :  { %1491 = vmatprep.mubr.f32.mxu0 %v204_v55  ;;  %v7737_v62 = vpop.f32.mrb[0].mxu1  ;;  %v65_v55 = vld [vmem:[%s9165_s0 + $0x68] sm:$0xff] }
 0x140   :  { %v7742_v36 = vpop.f32.mrb[1].mxu1  ;;  %2006 = vmatmul.mubr.f32.gmra.mrb[106].mxu1 %v7150_v7  ;;  %v217_v7 = vld [vmem:[%s9165_s0 + $0x528] sm:$0xff] }
 0x141   :  { %2011 = vmatprep.mubr.f32.mxu1 %v7158_v10 }
 0x142   :  { %1492 = vmatmul.mubr.f32.gmra.mrb[42].mxu0 %v203_v58  ;;  %v4769_v58 = vpack.c.bf16 %v546_v4, %v542_v52  ;;  %v86_v52 = vld [vmem:[%s9165_s0 + $0x110] sm:$0xff] }
 0x143   :  { %1497 = vmatprep.mubr.f32.mxu0 %v211_v37  ;;  %v7749_v3 = vpop.f32.mrb[2].mxu1 }
 0x144   :  { %v7754_v46 = vpop.f32.mrb[3].mxu1  ;;  %2012 = vmatmul.mubr.f32.gmra.mrb[108].mxu1 %v7168_v15  ;;  %v224_v15 = vld [vmem:[%s9165_s0 + $0x560] sm:$0xff] }
 0x145   :  { %2017 = vmatprep.mubr.f32.mxu1 %v7176_v17 }
 0x146   :  { %1498 = vmatmul.mubr.f32.gmra.mrb[44].mxu0 %v210_v0  ;;  %v4771_v0 = vpack.c.bf16 %v555_v40, %v551_v35  ;;  %v574_v40 = vld [vmem:[%s9167_s2 + $0x950] sm:$0xff] }
 0x147   :  { %1503 = vmatprep.mubr.f32.mxu0 %v218_v53  ;;  %v7761_v10 = vpop.f32.mrb[4].mxu1  ;;  %v550_v53 = vld [vmem:[%s9167_s2 + $0x890] sm:$0xff] }
 0x148   :  { %v7766_v57 = vpop.f32.mrb[5].mxu1  ;;  %2018 = vmatmul.mubr.f32.gmra.mrb[110].mxu1 %v7186_v21  ;;  %v231_v21 = vld [vmem:[%s9165_s0 + $0x598] sm:$0xff] }
 0x149   :  { %2023 = vmatprep.mubr.f32.mxu1 %v7194_v24 }
 0x14a   :  { %1504 = vmatmul.mubr.f32.gmra.mrb[46].mxu0 %v217_v7  ;;  %v554_v7 = vld [vmem:[%s9167_s2 + $0x8b0] sm:$0xff] }
 0x14b   :  { %1509 = vmatprep.mubr.f32.mxu0 %v225_v22  ;;  %v7773_v17 = vpop.f32.mrb[6].mxu1 }
 0x14c   :  { %v7778_v39 = vpop.f32.mrb[7].mxu1  ;;  %2024 = vmatmul.mubr.f32.gmra.mrb[112].mxu1 %v7204_v26  ;;  %v238_v26 = vld [vmem:[%s9165_s0 + $0x5d0] sm:$0xff] }
 0x14d   :  { %2029 = vmatprep.mubr.f32.mxu1 %v7212_v31 }
 0x14e   :  { %1510 = vmatmul.mubr.f32.gmra.mrb[48].mxu0 %v224_v15  ;;  %v5718_v15 = vld [vmem:[%s9165_s0 + $0x48] sm:$0xff] }
 0x14f   :  { %1515 = vmatprep.mubr.f32.mxu0 %v232_v50  ;;  %v7785_v24 = vpop.f32.mrb[8].mxu1  ;;  %v559_v50 = vld [vmem:[%s9167_s2 + $0x8d8] sm:$0xff] }
 0x150   :  { %v7790_v54 = vpop.f32.mrb[9].mxu1  ;;  %2030 = vmatmul.mubr.f32.gmra.mrb[114].mxu1 %v7222_v34  ;;  %v245_v34 = vld [vmem:[%s9165_s0 + $0x608] sm:$0xff] }
 0x151   :  { %2035 = vmatprep.mubr.f32.mxu1 %v7230_v38 }
 0x152   :  { %1516 = vmatmul.mubr.f32.gmra.mrb[50].mxu0 %v231_v21  ;;  %v563_v21 = vld [vmem:[%s9167_s2 + $0x8f8] sm:$0xff] }
 0x153   :  { %1521 = vmatprep.mubr.f32.mxu0 %v239_v11  ;;  %v7797_v31 = vpop.f32.mrb[10].mxu1  ;;  %v5719_v11 = vld [vmem:[%s9165_s0 + $0x88] sm:$0xff] }
 0x154   :  { %v7802_v30 = vpop.f32.mrb[11].mxu1  ;;  %2036 = vmatmul.mubr.f32.gmra.mrb[116].mxu1 %v7240_v41  ;;  %v252_v41 = vld [vmem:[%s9165_s0 + $0x640] sm:$0xff] }
 0x155   :  { %2041 = vmatprep.mubr.f32.mxu1 %v7248_v45 }
 0x156   :  { %1522 = vmatmul.mubr.f32.gmra.mrb[52].mxu0 %v238_v26  ;;  %v72_v26 = vld [vmem:[%s9165_s0 + $0xa0] sm:$0xff] }
 0x157   :  { %1527 = vmatprep.mubr.f32.mxu0 %v246_v61  ;;  %v7809_v38 = vpop.f32.mrb[12].mxu1  ;;  %v4773_v61 = vpack.c.bf16 %v554_v7, %v550_v53  ;;  %v587_v53 = vld [vmem:[%s9167_s2 + $0x9b8] sm:$0xff]  ;;  %v5725_v7 = vld [vmem:[%s9165_s0 + $0x130] sm:$0xff] }
 0x158   :  { %v7814_v1 = vpop.f32.mrb[13].mxu1  ;;  %2042 = vmatmul.mubr.f32.gmra.mrb[118].mxu1 %v7258_v49  ;;  %v259_v49 = vld [vmem:[%s9165_s0 + $0x678] sm:$0xff] }
 0x159   :  { %2047 = vmatprep.mubr.f32.mxu1 %v7266_v56 }
 0x15a   :  { %1528 = vmatmul.mubr.f32.gmra.mrb[54].mxu0 %v245_v34 }
 0x15b   :  { %1533 = vmatprep.mubr.f32.mxu0 %v253_v43  ;;  %v7821_v45 = vpop.f32.mrb[14].mxu1  ;;  %v4775_v43 = vpack.c.bf16 %v563_v21, %v559_v50 }
 0x15c   :  { %v7826_v6 = vpop.f32.mrb[15].mxu1  ;;  %2048 = vmatmul.mubr.f32.gmra.mrb[120].mxu1 %v7276_v59  ;;  %v266_v59 = vld [vmem:[%s9165_s0 + $0x6b0] sm:$0xff] }
 0x15d   :  { %2053 = vmatprep.mubr.f32.mxu1 %v7284_v2 }
 0x15e   :  { %1534 = vmatmul.mubr.f32.gmra.mrb[56].mxu0 %v252_v41  ;;  %v558_v41 = vld [vmem:[%s9167_s2 + $0x8d0] sm:$0xff] }
 0x15f   :  { %1539 = vmatprep.mubr.f32.mxu0 %v260_v5  ;;  %v7833_v56 = vpop.f32.mrb[16].mxu1  ;;  %v562_v5 = vld [vmem:[%s9167_s2 + $0x8f0] sm:$0xff] }
 0x160   :  { %v7838_v9 = vpop.f32.mrb[17].mxu1  ;;  %2054 = vmatmul.mubr.f32.gmra.mrb[122].mxu1 %v7294_v8  ;;  %v9185_v8 = vld [vmem:[#allocation12_spill] sm:$0xff] }
 0x161   :  { %2059 = vmatprep.mubr.f32.mxu1 %v7302_v16  ;;  %v273_v16 = vld [vmem:[%s9165_s0 + $0x6e8] sm:$0xff] }
 0x162   :  { %1540 = vmatmul.mubr.f32.gmra.mrb[58].mxu0 %v259_v49 }
 0x163   :  { %1545 = vmatprep.mubr.f32.mxu0 %v267_v63  ;;  %v7845_v2 = vpop.f32.mrb[18].mxu1  ;;  %v5720_v63 = vld [vmem:[%s9165_s0 + $0x80] sm:$0xff] }
 0x164   :  { %v7850_v13 = vpop.f32.mrb[19].mxu1  ;;  %2060 = vmatmul.mubr.f32.gmra.mrb[124].mxu1 %v9184_v14  ;;  %v5721_v14 = vld [vmem:[%s9165_s0 + $0xc0] sm:$0xff] }
 0x165   :  { %2065 = vmatprep.mubr.f32.mxu1 %v9185_v8  ;;  %v79_v8 = vld [vmem:[%s9165_s0 + $0xd8] sm:$0xff] }
 0x166   :  { %1546 = vmatmul.mubr.f32.gmra.mrb[60].mxu0 %v266_v59  ;;  %v567_v59 = vld [vmem:[%s9167_s2 + $0x918] sm:$0xff] }
 0x167   :  { %1551 = vmatprep.mubr.f32.mxu0 %v274_v27  ;;  %v7863_v29 = vpop.f32.mrb[20].mxu1  ;;  %v571_v27 = vld [vmem:[%s9167_s2 + $0x938] sm:$0xff] }
 0x168   :  { %v7865_v18 = vpop.f32.mrb[21].mxu1  ;;  %2066 = vmatmul.mubr.f32.gmra.mrb[126].mxu1 %v9186_v28  ;;  %v4779_v19 = vpack.c.bf16 %v571_v27, %v567_v59  ;;  %v566_v28 = vld [vmem:[%s9167_s2 + $0x910] sm:$0xff]  ;;  %v5727_v59 = vld [vmem:[%s9165_s0 + $0x168] sm:$0xff]  ;;  %v100_v27 = vld [vmem:[%s9165_s0 + $0x180] sm:$0xff] }
 0x169   :  { %2136 = vmatprep.mubr.f32.mxu1 %v5715_v25  ;;  %v5722_v25 = vld [vmem:[%s9165_s0 + $0xb8] sm:$0xff]  ;;  %v4781_v4 = vpack.c.bf16 %v570_v60, %v566_v28  ;;  %v594_v28 = vld [vmem:[%s9167_s2 + $0x9f0] sm:$0xff] }
 0x16a   :  { %1552 = vmatmul.mubr.f32.gmra.mrb[62].mxu0 %v273_v16  ;;  %v4777_v16 = vpack.c.bf16 %v562_v5, %v558_v41  ;;  %v5726_v41 = vld [vmem:[%s9165_s0 + $0x128] sm:$0xff]  ;;  %v591_v5 = vld [vmem:[%s9167_s2 + $0x9d8] sm:$0xff] }
 0x16b   :  { %1622 = vmatprep.mubr.f32.mxu0 %v9177_v42  ;;  %v7881_v48 = vpop.f32.mrb[22].mxu1 }
 0x16c   :  { %v7889_v12 = vpop.f32.mrb[23].mxu1  ;;  %2137 = vmatmul.mubr.f32.vlgmr.msra.gmra.mrb[64].mxu1 %v5716_v23 }
 0x16d   :  { %4766 = vmatpush1.bf16.msra.mxu1 %v4765_v47  ;;  %2142 = vmatprep.mubr.f32.mxu1 %v5717_v51  ;;  %v575_v47 = vld [vmem:[%s9167_s2 + $0x958] sm:$0xff]  ;;  %v578_v51 = vld [vmem:[%s9167_s2 + $0x970] sm:$0xff] }
 0x16e   :  { %4214 = vmatmul.mubr.msk.f32.vlgmr.msra.gmra.mrb[0].mxu0 %vm690_vm0, %v58_v32  ;;  %4768 = vmatprep.subr.bf16.mxu1 %v4767_v44  ;;  %v579_v32 = vld [vmem:[%s9167_s2 + $0x978] sm:$0xff]  ;;  %v4785_v50 = vpack.c.bf16 %v578_v51, %v574_v40 }
 0x16f   :  { %1628 = vmatprep.mubr.f32.mxu0 %v9177_v42  ;;  %v7908_v37 = vpop.f32.mrb[24].mxu1  ;;  %v5723_v44 = vld [vmem:[%s9165_s0 + $0xf8] sm:$0xff]  ;;  %v4783_v35 = vpack.c.bf16 %v579_v32, %v575_v47 }
 0x170   :  { %v7916_v22 = vpop.f32.mrb[25].mxu1  ;;  %2143 = vmatmul.mubr.f32.gmra.mrb[66].mxu1 %v5718_v15  ;;  %v93_v15 = vld [vmem:[%s9165_s0 + $0x148] sm:$0xff]  ;;  %v599_v47 = vld [vmem:[%s9167_s2 + $0xa18] sm:$0xff] }
 0x171   :  { %2148 = vmatprep.mubr.f32.mxu1 %v5719_v11  ;;  %4770 = vmatpush1.bf16.msra.mxu1 %v4769_v58  ;;  %v5724_v58 = vld [vmem:[%s9165_s0 + $0xf0] sm:$0xff]  ;;  %v603_v32 = vld [vmem:[%s9167_s2 + $0xa38] sm:$0xff] }
 0x172   :  { %4215 = vmatmul.mubr.msk.f32.gmra.mrb[2].mxu0 %vm690_vm0, %v65_v55  ;;  %4772 = vmatprep.subr.bf16.mxu1 %v4771_v0  ;;  %v583_v0 = vld [vmem:[%s9167_s2 + $0x998] sm:$0xff] }
 0x173   :  { %1634 = vmatprep.mubr.f32.mxu0 %v9177_v42  ;;  %v7935_v34 = vpop.f32.mrb[26].mxu1  ;;  %v4787_v11 = vpack.c.bf16 %v587_v53, %v583_v0  ;;  %v4795_v0 = vpack.c.bf16 %v603_v32, %v599_v47  ;;  %v598_v53 = vld [vmem:[%s9167_s2 + $0xa10] sm:$0xff] }
 0x174   :  { %v7943_v49 = vpop.f32.mrb[27].mxu1  ;;  %2149 = vmatmul.mubr.f32.gmra.mrb[68].mxu1 %v5720_v63  ;;  %v595_v63 = vld [vmem:[%s9167_s2 + $0x9f8] sm:$0xff]  ;;  %v5732_v32 = vld [vmem:[%s9165_s0 + $0x1d0] sm:$0xff] }
 0x175   :  { %2154 = vmatprep.mubr.f32.mxu1 %v5721_v14  ;;  %4774 = vmatpush1.bf16.msra.mxu1 %v4773_v61  ;;  %v586_v61 = vld [vmem:[%s9167_s2 + $0x9b0] sm:$0xff] }
 0x176   :  { %4216 = vmatmul.mubr.msk.f32.gmra.mrb[4].mxu0 %vm690_vm0, %v72_v26  ;;  %4776 = vmatprep.subr.bf16.mxu1 %v4775_v43  ;;  %v582_v26 = vld [vmem:[%s9167_s2 + $0x990] sm:$0xff] }
 0x177   :  { %1640 = vmatprep.mubr.f32.mxu0 %v9177_v42  ;;  %v7962_v20 = vpop.f32.mrb[28].mxu1  ;;  %v4789_v14 = vpack.c.bf16 %v586_v61, %v582_v26  ;;  %v607_v26 = vld [vmem:[%s9167_s2 + $0xa58] sm:$0xff] }
 0x178   :  { %v7970_v33 = vpop.f32.mrb[29].mxu1  ;;  %2155 = vmatmul.mubr.f32.gmra.mrb[70].mxu1 %v5722_v25  ;;  %v5728_v25 = vld [vmem:[%s9165_s0 + $0x160] sm:$0xff]  ;;  %v611_v61 = vld [vmem:[%s9167_s2 + $0xa78] sm:$0xff] }
 0x179   :  { %2160 = vmatprep.mubr.f32.mxu1 %v5723_v44  ;;  %4778 = vmatpush1.bf16.msra.mxu1 %v4777_v16  ;;  %v4791_v16 = vpack.c.bf16 %v595_v63, %v591_v5  ;;  %v5729_v44 = vld [vmem:[%s9165_s0 + $0x1a0] sm:$0xff]  ;;  %v3357_v5 = vld [vmem:[#allocation5 + $0x10] sm:$0xff]  ;;  %v3358_v63 = vld [vmem:[#allocation5 + $0x18] sm:$0xff] }
 0x17a   :  { %4217 = vmatmul.mubr.msk.f32.gmra.mrb[6].mxu0 %vm690_vm0, %v79_v8  ;;  %4780 = vmatprep.subr.bf16.mxu1 %v4779_v19  ;;  %v590_v19 = vld [vmem:[%s9167_s2 + $0x9d0] sm:$0xff] }
 0x17b   :  { %1646 = vmatprep.mubr.f32.mxu0 %v9177_v42  ;;  %v7989_v23 = vpop.f32.mrb[30].mxu1  ;;  %v4793_v40 = vpack.c.bf16 %v594_v28, %v590_v19  ;;  %v4799_v19 = vpack.c.bf16 %v611_v61, %v607_v26  ;;  %v606_v28 = vld [vmem:[%s9167_s2 + $0xa50] sm:$0xff] }
 0x17c   :  { %v7997_v55 = vpop.f32.mrb[31].mxu1  ;;  %2161 = vmatmul.mubr.f32.gmra.mrb[72].mxu1 %v5724_v58  ;;  %v614_v26 = vld [vmem:[%s9167_s2 + $0xa90] sm:$0xff] }
 0x17d   :  { %2166 = vmatprep.mubr.f32.mxu1 %v5725_v7  ;;  %4782 = vmatpush1.bf16.msra.mxu1 %v4781_v4  ;;  %v3356_v4 = vld [vmem:[#allocation5 + $0x8] sm:$0xff]  ;;  %v602_v7 = vld [vmem:[%s9167_s2 + $0xa30] sm:$0xff] }
 0x17e   :  { %4218 = vmatmul.mubr.msk.f32.gmra.mrb[8].mxu0 %vm690_vm0, %v86_v52  ;;  %4784 = vmatprep.subr.bf16.mxu1 %v4783_v35  ;;  %v3355_v52 = vld [vmem:[#allocation5] sm:$0xff]  ;;  %v107_v35 = vld [vmem:[%s9165_s0 + $0x1b8] sm:$0xff]  ;;  %v618_v61 = vld [vmem:[%s9167_s2 + $0xab0] sm:$0xff] }
 0x17f   :  { %1652 = vmatprep.mubr.f32.mxu0 %v9177_v42  ;;  %v8016_v21 = vpop.f32.mrb[32].mxu1  ;;  %v4832_v51 = vpack.c.bf16 %v3356_v4, %v3355_v52  ;;  %v619_v52 = vld [vmem:[%s9167_s2 + $0xab8] sm:$0xff]  ;;  %v5733_v4 = vld [vmem:[%s9165_s0 + $0x210] sm:$0xff] }
 0x180   :  { %v8024_v43 = vpop.f32.mrb[33].mxu1  ;;  %2167 = vmatmul.mubr.f32.gmra.mrb[74].mxu1 %v5726_v41  ;;  %v5731_v41 = vld [vmem:[%s9165_s0 + $0x1d8] sm:$0xff] }
 0x181   :  { %2172 = vmatprep.mubr.f32.mxu1 %v5727_v59  ;;  %4786 = vmatpush1.bf16.msra.mxu1 %v4785_v50  ;;  %v114_v59 = vld [vmem:[%s9165_s0 + $0x1f0] sm:$0xff] }
 0x182   :  { %4219 = vmatmul.mubr.msk.f32.gmra.mrb[10].mxu0 %vm690_vm0, %v93_v15  ;;  %4788 = vmatprep.subr.bf16.mxu1 %v4787_v11  ;;  %v9175_v15 = vmov 0.0|0.0   ;;  %v5730_v11 = vld [vmem:[%s9165_s0 + $0x198] sm:$0xff] }
 0x183   :  { %1658 = vmatprep.mubr.f32.mxu0 %v9177_v42  ;;  %v8043_v8 = vpop.f32.mrb[34].mxu1  ;;  %4831 = vmatprep.subr.bf16.mxu0 %v9175_v15 }
 0x184   :  { %v8051_v60 = vpop.f32.mrb[35].mxu1  ;;  %2173 = vmatmul.mubr.f32.gmra.mrb[76].mxu1 %v5728_v25  ;;  %4833 = vmatpush1.bf16.msra.mxu0 %v4832_v51  ;;  %v610_v25 = vld [vmem:[%s9167_s2 + $0xa70] sm:$0xff]  ;;  %v121_v51 = vld [vmem:[%s9165_s0 + $0x228] sm:$0xff] }
 0x185   :  { %2178 = vmatprep.mubr.f32.mxu1 %v5729_v44  ;;  %4790 = vmatpush1.bf16.msra.mxu1 %v4789_v14  ;;  %v4835_v14 = vpack.c.bf16 %v3358_v63, %v3357_v5  ;;  %v615_v44 = vld [vmem:[%s9167_s2 + $0xa98] sm:$0xff]  ;;  %v5734_v5 = vld [vmem:[%s9165_s0 + $0x208] sm:$0xff] }
 0x186   :  { %4220 = vmatmul.mubr.msk.f32.gmra.mrb[12].mxu0 %vm690_vm0, %v100_v27  ;;  %4792 = vmatprep.subr.bf16.mxu1 %v4791_v16  ;;  %v4797_v27 = vpack.c.bf16 %v602_v7, %v598_v53  ;;  %v623_v63 = vld [vmem:[%s9167_s2 + $0xad8] sm:$0xff] }
 0x187   :  { %1664 = vmatprep.mubr.f32.mxu0 %v9177_v42  ;;  %v8070_v58 = vpop.f32.mrb[36].mxu1  ;;  %4834 = vmatprep.subr.bf16.mxu0 %v9175_v15 }
 0x188   :  { %v8079_v50 = vpop.f32.mrb[37].mxu1  ;;  %2179 = vmatmul.mubr.f32.gmra.mrb[78].mxu1 %v5730_v11  ;;  %4836 = vmatpush1.bf16.msra.mxu0 %v4835_v14  ;;  %v4803_v11 = vpack.c.bf16 %v619_v52, %v615_v44  ;;  %v3361_v14 = vld [vmem:[#allocation5 + $0x30] sm:$0xff] }
 0x189   :  { %2184 = vmatprep.mubr.f32.mxu1 %v5731_v41  ;;  %4794 = vmatpush1.bf16.msra.mxu1 %v4793_v40  ;;  %v3360_v40 = vld [vmem:[#allocation5 + $0x28] sm:$0xff] }
 0x18a   :  { %4221 = vmatmul.mubr.msk.f32.gmra.mrb[14].mxu0 %vm690_vm0, %v107_v35  ;;  %4796 = vmatprep.subr.bf16.mxu1 %v4795_v0  ;;  %v3359_v35 = vld [vmem:[#allocation5 + $0x20] sm:$0xff]  ;;  %v4801_v0 = vpack.c.bf16 %v610_v25, %v606_v28  ;;  %v4805_v25 = vpack.c.bf16 %v618_v61, %v614_v26  ;;  %v3364_v61 = vld [vmem:[#allocation5 + $0x48] sm:$0xff] }
 0x18b   :  { %1670 = vmatprep.mubr.f32.mxu0 %v9177_v42  ;;  %v8098_v16 = vpop.f32.mrb[38].mxu1  ;;  %v4838_v53 = vpack.c.bf16 %v3360_v40, %v3359_v35  ;;  %4837 = vmatprep.subr.bf16.mxu0 %v9175_v15  ;;  %v128_v28 = vld [vmem:[%s9165_s0 + $0x260] sm:$0xff]  ;;  %v626_v35 = vld [vmem:[%s9167_s2 + $0xaf0] sm:$0xff] }
 0x18c   :  { %v8107_v47 = vpop.f32.mrb[39].mxu1  ;;  %2185 = vmatmul.mubr.f32.gmra.mrb[80].mxu1 %v5732_v32  ;;  %v3363_v26 = vld [vmem:[#allocation5 + $0x40] sm:$0xff] }
 0x18d   :  { %2190 = vmatprep.mubr.f32.mxu1 %v5733_v4  ;;  %4798 = vmatpush1.bf16.msra.mxu1 %v4797_v27  ;;  %v5735_v27 = vld [vmem:[%s9165_s0 + $0x248] sm:$0xff]  ;;  %v622_v4 = vld [vmem:[%s9167_s2 + $0xad0] sm:$0xff] }
 0x18e   :  { %4222 = vmatmul.mubr.msk.f32.gmra.mrb[16].mxu0 %vm690_vm0, %v114_v59  ;;  %4800 = vmatprep.subr.bf16.mxu1 %v4799_v19  ;;  %v627_v59 = vld [vmem:[%s9167_s2 + $0xaf8] sm:$0xff] }
 0x18f   :  { %1676 = vmatprep.mubr.f32.mxu0 %v9177_v42  ;;  %v8126_v7 = vpop.f32.mrb[40].mxu1  ;;  %4839 = vmatpush1.bf16.msra.mxu0 %v4838_v53  ;;  %v3362_v19 = vld [vmem:[#allocation5 + $0x38] sm:$0xff]  ;;  %v4807_v52 = vpack.c.bf16 %v627_v59, %v623_v63  ;;  %v4809_v63 = vpack.c.bf16 %v626_v35, %v622_v4  ;;  %v4844_v59 = vpack.c.bf16 %v3364_v61, %v3363_v26 }
 0x190   :  { %v8135_v41 = vpop.f32.mrb[41].mxu1  ;;  %2191 = vmatmul.mubr.f32.gmra.mrb[82].mxu1 %v5734_v5  ;;  %v4841_v32 = vpack.c.bf16 %v3362_v19, %v3361_v14  ;;  %4840 = vmatprep.subr.bf16.mxu0 %v9175_v15  ;;  %v635_v53 = vld [vmem:[%s9167_s2 + $0xb38] sm:$0xff]  ;;  %v630_v19 = vld [vmem:[%s9167_s2 + $0xb10] sm:$0xff] }
 0x191   :  { %2196 = vmatprep.mubr.f32.mxu1 %v5735_v27  ;;  %4802 = vmatpush1.bf16.msra.mxu1 %v4801_v0  ;;  %v631_v0 = vld [vmem:[%s9167_s2 + $0xb18] sm:$0xff] }
 0x192   :  { %4223 = vmatmul.mubr.msk.f32.gmra.mrb[18].mxu0 %vm690_vm0, %v121_v51  ;;  %4804 = vmatprep.subr.bf16.mxu1 %v4803_v11  ;;  %v5736_v51 = vld [vmem:[%s9165_s0 + $0x240] sm:$0xff]  ;;  %v135_v5 = vld [vmem:[%s9165_s0 + $0x298] sm:$0xff]  ;;  %v4811_v14 = vpack.c.bf16 %v635_v53, %v631_v0  ;;  %v142_v53 = vld [vmem:[%s9165_s0 + $0x2d0] sm:$0xff] }
 0x193   :  { %1682 = vmatprep.mubr.f32.mxu0 %v9177_v42  ;;  %v8154_v44 = vpop.f32.mrb[42].mxu1  ;;  %4842 = vmatpush1.bf16.msra.mxu0 %v4841_v32  ;;  %v5737_v11 = vld [vmem:[%s9165_s0 + $0x280] sm:$0xff]  ;;  %v643_v4 = vld [vmem:[%s9167_s2 + $0xb78] sm:$0xff] }
 0x194   :  { %v8163_v40 = vpop.f32.mrb[43].mxu1  ;;  %2197 = vmatmul.mubr.f32.gmra.mrb[84].mxu1 %v5736_v51  ;;  %4843 = vmatprep.subr.bf16.mxu0 %v9175_v15  ;;  %v5739_v35 = vld [vmem:[%s9165_s0 + $0x2b8] sm:$0xff]  ;;  %v3365_v51 = vld [vmem:[#allocation5 + $0x50] sm:$0xff] }
 0x195   :  { %2202 = vmatprep.mubr.f32.mxu1 %v5737_v11  ;;  %4806 = vmatpush1.bf16.msra.mxu1 %v4805_v25  ;;  %v5738_v25 = vld [vmem:[%s9165_s0 + $0x278] sm:$0xff] }
 0x196   :  { %4224 = vmatmul.mubr.msk.f32.gmra.mrb[20].mxu0 %vm690_vm0, %v128_v28  ;;  %4808 = vmatprep.subr.bf16.mxu1 %v4807_v52  ;;  %v634_v28 = vld [vmem:[%s9167_s2 + $0xb30] sm:$0xff]  ;;  %v639_v52 = vld [vmem:[%s9167_s2 + $0xb58] sm:$0xff] }
 0x197   :  { %1688 = vmatprep.mubr.f32.mxu0 %v9177_v42  ;;  %v8182_v27 = vpop.f32.mrb[44].mxu1  ;;  %4845 = vmatpush1.bf16.msra.mxu0 %v4844_v59  ;;  %v3366_v0 = vld [vmem:[#allocation5 + $0x58] sm:$0xff]  ;;  %v4813_v11 = vpack.c.bf16 %v634_v28, %v630_v19  ;;  %v638_v59 = vld [vmem:[%s9167_s2 + $0xb50] sm:$0xff] }
 0x198   :  { %v8191_v32 = vpop.f32.mrb[45].mxu1  ;;  %2203 = vmatmul.mubr.f32.gmra.mrb[86].mxu1 %v5738_v25  ;;  %v4847_v26 = vpack.c.bf16 %v3366_v0, %v3365_v51  ;;  %v642_v25 = vld [vmem:[%s9167_s2 + $0xb70] sm:$0xff]  ;;  %4846 = vmatprep.subr.bf16.mxu0 %v9175_v15  ;;  %v651_v19 = vld [vmem:[%s9167_s2 + $0xbb8] sm:$0xff]  ;;  %v149_v51 = vld [vmem:[%s9165_s0 + $0x308] sm:$0xff] }
 0x199   :  { %2208 = vmatprep.mubr.f32.mxu1 %v5739_v35  ;;  %4810 = vmatpush1.bf16.msra.mxu1 %v4809_v63  ;;  %v5740_v63 = vld [vmem:[%s9165_s0 + $0x2b0] sm:$0xff]  ;;  %v4817_v0 = vpack.c.bf16 %v642_v25, %v638_v59  ;;  %v659_v59 = vld [vmem:[%s9167_s2 + $0xbf8] sm:$0xff]  ;;  %v5743_v25 = vld [vmem:[%s9165_s0 + $0x328] sm:$0xff] }
 0x19a   :  { %4225 = vmatmul.mubr.msk.f32.gmra.mrb[22].mxu0 %vm690_vm0, %v135_v5  ;;  %4812 = vmatprep.subr.bf16.mxu1 %v4811_v14  ;;  %v4815_v5 = vpack.c.bf16 %v643_v4, %v639_v52  ;;  %v647_v14 = vld [vmem:[%s9167_s2 + $0xb98] sm:$0xff]  ;;  %v5741_v28 = vld [vmem:[%s9165_s0 + $0x2f0] sm:$0xff]  ;;  %v3367_v52 = vld [vmem:[#allocation5 + $0x60] sm:$0xff] }
 0x19b   :  { %1694 = vmatprep.mubr.f32.mxu0 %v9177_v42  ;;  %v8210_v61 = vpop.f32.mrb[46].mxu1  ;;  %4848 = vmatpush1.bf16.msra.mxu0 %v4847_v26  ;;  %v3368_v4 = vld [vmem:[#allocation5 + $0x68] sm:$0xff]  ;;  %v646_v26 = vld [vmem:[%s9167_s2 + $0xb90] sm:$0xff] }
 0x19c   :  { %9187 = vst [vmem:[#allocation11_spill] sm:$0xff] %v8210_v61  ;;  %v8219_v35 = vpop.f32.mrb[47].mxu1  ;;  %2209 = vmatmul.mubr.f32.gmra.mrb[88].mxu1 %v5740_v63  ;;  %v4850_v63 = vpack.c.bf16 %v3368_v4, %v3367_v52  ;;  %v9192_v52 = vmov 0.0   ;;  %v156_v4 = vld [vmem:[%s9165_s0 + $0x340] sm:$0xff] }
 0x19d   :  { %9188 = vst [vmem:[#allocation12_spill] sm:$0xff] %v8219_v35  ;;  %2214 = vmatprep.mubr.f32.mxu1 %v5741_v28  ;;  %4814 = vmatpush1.bf16.msra.mxu1 %v4813_v11  ;;  %v650_v28 = vld [vmem:[%s9167_s2 + $0xbb0] sm:$0xff]  ;;  %v5742_v11 = vld [vmem:[%s9165_s0 + $0x2e8] sm:$0xff] }
 0x19e   :  { %4226 = vmatmul.mubr.msk.f32.gmra.mrb[24].mxu0 %vm690_vm0, %v142_v53  ;;  %4816 = vmatprep.subr.bf16.mxu1 %v4815_v5  ;;  %v4819_v53 = vpack.c.bf16 %v651_v19, %v647_v14  ;;  %v655_v5 = vld [vmem:[%s9167_s2 + $0xbd8] sm:$0xff]  ;;  %v3369_v14 = vld [vmem:[#allocation5 + $0x70] sm:$0xff] }
 0x19f   :  { %1700 = vmatprep.mubr.f32.mxu0 %v9177_v42  ;;  %v8238_v15 = vpop.f32.mrb[48].mxu1  ;;  %v9190_v42 = vmov 0.0|0.0   ;;  %v3370_v19 = vld [vmem:[#allocation5 + $0x78] sm:$0xff] }
 0x1a0   :  { %9189 = vst [vmem:[#allocation13_spill] sm:$0xff] %v8238_v15  ;;  %4849 = vmatprep.subr.bf16.mxu0 %v9190_v42  ;;  %v8247_v35 = vpop.f32.mrb[49].mxu1  ;;  %2215 = vmatmul.mubr.f32.gmra.mrb[90].mxu1 %v5742_v11  ;;  %v4821_v11 = vpack.c.bf16 %v650_v28, %v646_v26  ;;  %v667_v26 = vld [vmem:[%s9167_s2 + $0xc38] sm:$0xff]  ;;  %v5745_v28 = vld [vmem:[%s9165_s0 + $0x360] sm:$0xff] }
 0x1a1   :  { %9191 = vst [vmem:[#allocation14_spill] sm:$0xff] %v8247_v35  ;;  %4851 = vmatpush1.bf16.msra.mxu0 %v4850_v63  ;;  %2220 = vmatprep.mubr.f32.mxu1 %v5743_v25  ;;  %v4853_v35 = vpack.c.bf16 %v3370_v19, %v3369_v14  ;;  %v654_v63 = vld [vmem:[%s9167_s2 + $0xbd0] sm:$0xff]  ;;  %v163_v14 = vld [vmem:[%s9165_s0 + $0x378] sm:$0xff] }
 0x1a2   :  { %4227 = vmatmul.mubr.msk.f32.gmra.mrb[26].mxu0 %vm690_vm0, %v149_v51  ;;  %4818 = vmatpush1.bf16.msra.mxu1 %v4817_v0  ;;  %v4823_v51 = vpack.c.bf16 %v659_v59, %v655_v5  ;;  %v658_v25 = vld [vmem:[%s9167_s2 + $0xbf0] sm:$0xff]  ;;  %v5744_v0 = vld [vmem:[%s9165_s0 + $0x320] sm:$0xff]  ;;  %v3372_v59 = vld [vmem:[#allocation5 + $0x88] sm:$0xff] }
 0x1a3   :  { %1706 = vmatprep.mubr.f32.mxu0 %v9192_v52  ;;  %v8266_v15 = vpop.f32.mrb[50].mxu1  ;;  %4820 = vmatprep.subr.bf16.mxu1 %v4819_v53  ;;  %v663_v53 = vld [vmem:[%s9167_s2 + $0xc18] sm:$0xff]  ;;  %v3371_v5 = vld [vmem:[#allocation5 + $0x80] sm:$0xff]  ;;  %v4825_v19 = vpack.c.bf16 %v658_v25, %v654_v63  ;;  %v3373_v63 = vld [vmem:[#allocation5 + $0x90] sm:$0xff] }
 0x1a4   :  { %9193 = vst [vmem:[#allocation15_spill] sm:$0xff] %v8266_v15  ;;  %4852 = vmatprep.subr.bf16.mxu0 %v9190_v42  ;;  %v8275_v61 = vpop.f32.mrb[51].mxu1  ;;  %2221 = vmatmul.mubr.f32.gmra.mrb[92].mxu1 %v5744_v0  ;;  %v4856_v0 = vpack.c.bf16 %v3372_v59, %v3371_v5  ;;  %v170_v25 = vld [vmem:[%s9165_s0 + $0x3b0] sm:$0xff] }
 0x1a5   :  { %9194 = vst [vmem:[#allocation16_spill] sm:$0xff] %v8275_v61  ;;  %4854 = vmatpush1.bf16.msra.mxu0 %v4853_v35  ;;  %2226 = vmatprep.mubr.f32.mxu1 %v5745_v28  ;;  %v4827_v35 = vpack.c.bf16 %v667_v26, %v663_v53  ;;  %v5746_v28 = vld [vmem:[%s9165_s0 + $0x358] sm:$0xff]  ;;  %v5748_v59 = vld [vmem:[%s9165_s0 + $0x390] sm:$0xff] }
 0x1a6   :  { %4228 = vmatmul.mubr.msk.f32.gmra.mrb[28].mxu0 %vm690_vm0, %v156_v4  ;;  %4822 = vmatpush1.bf16.msra.mxu1 %v4821_v11  ;;  %v5747_v11 = vld [vmem:[%s9165_s0 + $0x398] sm:$0xff] }
 0x1a7   :  { %1712 = vmatprep.mubr.f32.mxu0 %v9192_v52  ;;  %v8294_v61 = vpop.f32.mrb[52].mxu1  ;;  %4824 = vmatprep.subr.bf16.mxu1 %v4823_v51  ;;  %v3374_v51 = vld [vmem:[#allocation5 + $0x98] sm:$0xff] }
 0x1a8   :  { %9195 = vst [vmem:[#allocation17_spill] sm:$0xff] %v8294_v61  ;;  %4855 = vmatprep.subr.bf16.mxu0 %v9190_v42  ;;  %v8297_v4 = vpop.f32.mrb[53].mxu1  ;;  %2227 = vmatmul.mubr.f32.gmra.mrb[94].mxu1 %v5746_v28  ;;  %v4859_v53 = vpack.c.bf16 %v3374_v51, %v3373_v63  ;;  %v5750_v51 = vld [vmem:[%s9165_s0 + $0x3c8] sm:$0xff] }
 0x1a9   :  { %9196 = vst [vmem:[#allocation18_spill] sm:$0xff] %v8297_v4  ;;  %4857 = vmatpush1.bf16.msra.mxu0 %v4856_v0  ;;  %2232 = vmatprep.mubr.f32.mxu1 %v5747_v11  ;;  %v3376_v0 = vld [vmem:[#allocation5 + $0xa8] sm:$0xff] }
 0x1aa   :  { %4229 = vmatmul.mubr.msk.f32.gmra.mrb[30].mxu0 %vm690_vm0, %v163_v14  ;;  %4826 = vmatpush1.bf16.msra.mxu1 %v4825_v19  ;;  %v5749_v14 = vld [vmem:[%s9165_s0 + $0x3d0] sm:$0xff]  ;;  %v3375_v19 = vld [vmem:[#allocation5 + $0xa0] sm:$0xff] }
 0x1ab   :  { %1718 = vmatprep.mubr.f32.mxu0 %v9192_v52  ;;  %v8310_v26 = vpop.f32.mrb[54].mxu1  ;;  %4828 = vmatprep.subr.bf16.mxu1 %v4827_v35  ;;  %v177_v35 = vld [vmem:[%s9165_s0 + $0x3e8] sm:$0xff]  ;;  %v4862_v28 = vpack.c.bf16 %v3376_v0, %v3375_v19 }
 0x1ac   :  { %9197 = vst [vmem:[#allocation19_spill] sm:$0xff] %v8310_v26  ;;  %4858 = vmatprep.subr.bf16.mxu0 %v9190_v42  ;;  %v8313_v5 = vpop.f32.mrb[55].mxu1  ;;  %2233 = vmatmul.mubr.f32.gmra.mrb[96].mxu1 %v5748_v59  ;;  %v3378_v59 = vld [vmem:[#allocation5 + $0xb8] sm:$0xff] }
 0x1ad   :  { %9198 = vst [vmem:[#allocation20_spill] sm:$0xff] %v8313_v5  ;;  %4860 = vmatpush1.bf16.msra.mxu0 %v4859_v53  ;;  %2238 = vmatprep.mubr.f32.mxu1 %v5749_v14  ;;  %v3377_v53 = vld [vmem:[#allocation5 + $0xb0] sm:$0xff]  ;;  %v184_v14 = vld [vmem:[%s9165_s0 + $0x420] sm:$0xff] }
 0x1ae   :  { %4230 = vmatmul.mubr.msk.f32.gmra.mrb[32].mxu0 %vm690_vm0, %v170_v25  ;;  %4861 = vmatprep.subr.bf16.mxu0 %v9190_v42  ;;  %v5751_v25 = vld [vmem:[%s9165_s0 + $0x408] sm:$0xff]  ;;  %v4865_v19 = vpack.c.bf16 %v3378_v59, %v3377_v53  ;;  %v191_v53 = vld [vmem:[%s9165_s0 + $0x458] sm:$0xff] }
 0x1af   :  { %1724 = vmatprep.mubr.f32.mxu0 %v9192_v52  ;;  %v8327_v11 = vpop.f32.mrb[56].mxu1 }
 0x1b0   :  { %9199 = vst [vmem:[#allocation21_spill] sm:$0xff] %v8327_v11  ;;  %v8329_v63 = vpop.f32.mrb[57].mxu1  ;;  %2239 = vmatmul.mubr.f32.gmra.mrb[98].mxu1 %v5750_v51  ;;  %v5753_v51 = vld [vmem:[%s9165_s0 + $0x440] sm:$0xff]  ;;  %v5823_v11 = vld [vmem:[%s9165_s0 + $0x4f8] sm:$0xff] }
 0x1b1   :  { %9200 = vst [vmem:[#allocation22_spill] sm:$0xff] %v8329_v63  ;;  %4863 = vmatpush1.bf16.msra.mxu0 %v4862_v28  ;;  %2244 = vmatprep.mubr.f32.mxu1 %v5751_v25  ;;  %v3379_v25 = vld [vmem:[#allocation5 + $0xc0] sm:$0xff]  ;;  %v3380_v63 = vld [vmem:[#allocation5 + $0xc8] sm:$0xff] }
 0x1b2   :  { %4231 = vmatmul.mubr.msk.f32.gmra.mrb[34].mxu0 %vm690_vm0, %v177_v35  ;;  %4864 = vmatprep.subr.bf16.mxu0 %v9190_v42  ;;  %v5752_v35 = vld [vmem:[%s9165_s0 + $0x400] sm:$0xff]  ;;  %v4868_v59 = vpack.c.bf16 %v3380_v63, %v3379_v25  ;;  %v198_v63 = vld [vmem:[%s9165_s0 + $0x490] sm:$0xff] }
 0x1b3   :  { %1730 = vmatprep.mubr.f32.mxu0 %v9192_v52  ;;  %v8343_v0 = vpop.f32.mrb[58].mxu1 }
 0x1b4   :  { %9201 = vst [vmem:[#allocation23_spill] sm:$0xff] %v8343_v0  ;;  %v8345_v28 = vpop.f32.mrb[59].mxu1  ;;  %2245 = vmatmul.mubr.f32.gmra.mrb[100].mxu1 %v5752_v35  ;;  %v3382_v0 = vld [vmem:[#allocation5 + $0xd8] sm:$0xff] }
 0x1b5   :  { %9202 = vst [vmem:[#allocation24_spill] sm:$0xff] %v8345_v28  ;;  %4866 = vmatpush1.bf16.msra.mxu0 %v4865_v19  ;;  %2250 = vmatprep.mubr.f32.mxu1 %v5753_v51  ;;  %v5755_v51 = vld [vmem:[%s9165_s0 + $0x478] sm:$0xff]  ;;  %v3381_v28 = vld [vmem:[#allocation5 + $0xd0] sm:$0xff] }
 0x1b6   :  { %4232 = vmatmul.mubr.msk.f32.gmra.mrb[36].mxu0 %vm690_vm0, %v184_v14  ;;  %4867 = vmatprep.subr.bf16.mxu0 %v9190_v42  ;;  %v5754_v14 = vld [vmem:[%s9165_s0 + $0x438] sm:$0xff]  ;;  %v4871_v25 = vpack.c.bf16 %v3382_v0, %v3381_v28  ;;  %v205_v0 = vld [vmem:[%s9165_s0 + $0x4c8] sm:$0xff] }
 0x1b7   :  { %1736 = vmatprep.mubr.f32.mxu0 %v9192_v52  ;;  %v8359_v35 = vpop.f32.mrb[60].mxu1 }
 0x1b8   :  { %9203 = vst [vmem:[#allocation25_spill] sm:$0xff] %v8359_v35  ;;  %v8361_v19 = vpop.f32.mrb[61].mxu1  ;;  %2251 = vmatmul.mubr.f32.gmra.mrb[102].mxu1 %v5754_v14  ;;  %v3384_v35 = vld [vmem:[#allocation5 + $0xe8] sm:$0xff] }
 0x1b9   :  { %9204 = vst [vmem:[#allocation26_spill] sm:$0xff] %v8361_v19  ;;  %4869 = vmatpush1.bf16.msra.mxu0 %v4868_v59  ;;  %2256 = vmatprep.mubr.f32.mxu1 %v5755_v51  ;;  %v5757_v51 = vld [vmem:[%s9165_s0 + $0x4b0] sm:$0xff]  ;;  %v3383_v19 = vld [vmem:[#allocation5 + $0xe0] sm:$0xff] }
 0x1ba   :  { %4233 = vmatmul.mubr.msk.f32.gmra.mrb[38].mxu0 %vm690_vm0, %v191_v53  ;;  %4870 = vmatprep.subr.bf16.mxu0 %v9190_v42  ;;  %v5756_v53 = vld [vmem:[%s9165_s0 + $0x470] sm:$0xff]  ;;  %v4874_v28 = vpack.c.bf16 %v3384_v35, %v3383_v19  ;;  %v212_v35 = vld [vmem:[%s9165_s0 + $0x500] sm:$0xff] }
 0x1bb   :  { %1742 = vmatprep.mubr.f32.mxu0 %v9192_v52  ;;  %v8375_v14 = vpop.f32.mrb[62].mxu1 }
 0x1bc   :  { %9205 = vst [vmem:[#allocation27_spill] sm:$0xff] %v8375_v14  ;;  %v8377_v59 = vpop.f32.mrb[63].mxu1  ;;  %2257 = vmatmul.mubr.f32.gmra.mrb[104].mxu1 %v5756_v53  ;;  %v3385_v53 = vld [vmem:[#allocation5 + $0xf0] sm:$0xff] }
 0x1bd   :  { %9206 = vst [vmem:[#allocation28_spill] sm:$0xff] %v8377_v59  ;;  %4872 = vmatpush1.bf16.msra.mxu0 %v4871_v25  ;;  %2262 = vmatprep.mubr.f32.mxu1 %v5757_v51  ;;  %v5759_v25 = vld [vmem:[%s9165_s0 + $0x4e8] sm:$0xff]  ;;  %v3386_v51 = vld [vmem:[#allocation5 + $0xf8] sm:$0xff]  ;;  %v5820_v59 = vld [vmem:[%s9165_s0 + $0x480] sm:$0xff] }
 0x1be   :  { %4234 = vmatmul.mubr.msk.f32.gmra.mrb[40].mxu0 %vm690_vm0, %v198_v63  ;;  %4873 = vmatprep.subr.bf16.mxu0 %v9190_v42  ;;  %v5758_v63 = vld [vmem:[%s9165_s0 + $0x4a8] sm:$0xff]  ;;  %v4877_v19 = vpack.c.bf16 %v3386_v51, %v3385_v53  ;;  %v5763_v53 = vld [vmem:[%s9165_s0 + $0x558] sm:$0xff]  ;;  %v226_v51 = vld [vmem:[%s9165_s0 + $0x570] sm:$0xff] }
 0x1bf   :  { %1748 = vmatprep.mubr.f32.mxu0 %v9192_v52 }
 0x1c0   :  { %2263 = vmatmul.mubr.f32.gmra.mrb[106].mxu1 %v5758_v63  ;;  %v219_v63 = vld [vmem:[%s9165_s0 + $0x538] sm:$0xff] }
 0x1c1   :  { %4875 = vmatpush1.bf16.msra.mxu0 %v4874_v28  ;;  %2268 = vmatprep.mubr.f32.mxu1 %v5759_v25  ;;  %v5761_v28 = vld [vmem:[%s9165_s0 + $0x520] sm:$0xff]  ;;  %v5762_v25 = vld [vmem:[%s9165_s0 + $0x518] sm:$0xff] }
 0x1c2   :  { %4235 = vmatmul.mubr.msk.f32.gmra.mrb[42].mxu0 %vm690_vm0, %v205_v0  ;;  %4876 = vmatprep.subr.bf16.mxu0 %v9190_v42  ;;  %v5760_v0 = vld [vmem:[%s9165_s0 + $0x4e0] sm:$0xff] }
 0x1c3   :  { %1754 = vmatprep.mubr.f32.mxu0 %v9192_v52 }
 0x1c4   :  { %2269 = vmatmul.mubr.f32.gmra.mrb[108].mxu1 %v5760_v0  ;;  %v233_v0 = vld [vmem:[%s9165_s0 + $0x5a8] sm:$0xff] }
 0x1c5   :  { %4878 = vmatpush1.bf16.msra.mxu0 %v4877_v19  ;;  %2274 = vmatprep.mubr.f32.mxu1 %v5761_v28  ;;  %v5765_v19 = vld [vmem:[%s9165_s0 + $0x590] sm:$0xff]  ;;  %v5766_v28 = vld [vmem:[%s9165_s0 + $0x588] sm:$0xff] }
 0x1c6   :  { %4236 = vmatmul.mubr.msk.f32.gmra.mrb[44].mxu0 %vm690_vm0, %v212_v35  ;;  %4879 = vmatprep.subr.bf16.mxu0 %v9190_v42  ;;  %v5764_v35 = vld [vmem:[%s9165_s0 + $0x550] sm:$0xff] }
 0x1c7   :  { %1760 = vmatprep.mubr.f32.mxu0 %v9192_v52 }
 0x1c8   :  { %2275 = vmatmul.mubr.f32.gmra.mrb[110].mxu1 %v5762_v25  ;;  %v240_v25 = vld [vmem:[%s9165_s0 + $0x5e0] sm:$0xff] }
 0x1c9   :  { %2280 = vmatprep.mubr.f32.mxu1 %v5763_v53  ;;  %v5768_v53 = vld [vmem:[%s9165_s0 + $0x5c0] sm:$0xff] }
 0x1ca   :  { %4237 = vmatmul.mubr.msk.f32.gmra.mrb[46].mxu0 %vm690_vm0, %v219_v63  ;;  %v5767_v63 = vld [vmem:[%s9165_s0 + $0x5c8] sm:$0xff] }
 0x1cb   :  { %1766 = vmatprep.mubr.f32.mxu0 %v9192_v52 }
 0x1cc   :  { %2281 = vmatmul.mubr.f32.gmra.mrb[112].mxu1 %v5764_v35  ;;  %v247_v35 = vld [vmem:[%s9165_s0 + $0x618] sm:$0xff] }
 0x1cd   :  { %2286 = vmatprep.mubr.f32.mxu1 %v5765_v19  ;;  %v5770_v19 = vld [vmem:[%s9165_s0 + $0x5f8] sm:$0xff] }
 0x1ce   :  { %4238 = vmatmul.mubr.msk.f32.gmra.mrb[48].mxu0 %vm690_vm0, %v226_v51  ;;  %v5769_v51 = vld [vmem:[%s9165_s0 + $0x600] sm:$0xff] }
 0x1cf   :  { %1772 = vmatprep.mubr.f32.mxu0 %v9192_v52 }
 0x1d0   :  { %2287 = vmatmul.mubr.f32.gmra.mrb[114].mxu1 %v5766_v28  ;;  %v254_v28 = vld [vmem:[%s9165_s0 + $0x650] sm:$0xff] }
 0x1d1   :  { %2292 = vmatprep.mubr.f32.mxu1 %v5767_v63  ;;  %v5772_v63 = vld [vmem:[%s9165_s0 + $0x630] sm:$0xff] }
 0x1d2   :  { %4239 = vmatmul.mubr.msk.f32.gmra.mrb[50].mxu0 %vm690_vm0, %v233_v0  ;;  %v5771_v0 = vld [vmem:[%s9165_s0 + $0x638] sm:$0xff] }
 0x1d3   :  { %1778 = vmatprep.mubr.f32.mxu0 %v9192_v52 }
 0x1d4   :  { %2293 = vmatmul.mubr.f32.gmra.mrb[116].mxu1 %v5768_v53  ;;  %v261_v53 = vld [vmem:[%s9165_s0 + $0x688] sm:$0xff] }
 0x1d5   :  { %2298 = vmatprep.mubr.f32.mxu1 %v5769_v51  ;;  %v5774_v51 = vld [vmem:[%s9165_s0 + $0x668] sm:$0xff] }
 0x1d6   :  { %4240 = vmatmul.mubr.msk.f32.gmra.mrb[52].mxu0 %vm690_vm0, %v240_v25  ;;  %v5773_v25 = vld [vmem:[%s9165_s0 + $0x670] sm:$0xff] }
 0x1d7   :  { %1784 = vmatprep.mubr.f32.mxu0 %v9192_v52 }
 0x1d8   :  { %2299 = vmatmul.mubr.f32.gmra.mrb[118].mxu1 %v5770_v19  ;;  %v268_v19 = vld [vmem:[%s9165_s0 + $0x6c0] sm:$0xff] }
 0x1d9   :  { %2304 = vmatprep.mubr.f32.mxu1 %v5771_v0  ;;  %v5776_v0 = vld [vmem:[%s9165_s0 + $0x6a0] sm:$0xff] }
 0x1da   :  { %4241 = vmatmul.mubr.msk.f32.gmra.mrb[54].mxu0 %vm690_vm0, %v247_v35  ;;  %v5775_v35 = vld [vmem:[%s9165_s0 + $0x6a8] sm:$0xff] }
 0x1db   :  { %1790 = vmatprep.mubr.f32.mxu0 %v9192_v52 }
 0x1dc   :  { %2305 = vmatmul.mubr.f32.gmra.mrb[120].mxu1 %v5772_v63  ;;  %v275_v63 = vld [vmem:[%s9165_s0 + $0x6f8] sm:$0xff] }
 0x1dd   :  { %2310 = vmatprep.mubr.f32.mxu1 %v5773_v25  ;;  %v662_v25 = vld [vmem:[%s9167_s2 + $0xc10] sm:$0xff] }
 0x1de   :  { %4242 = vmatmul.mubr.msk.f32.gmra.mrb[56].mxu0 %vm690_vm0, %v254_v28  ;;  %v5777_v28 = vld [vmem:[%s9165_s0 + $0x6e0] sm:$0xff] }
 0x1df   :  { %1796 = vmatprep.mubr.f32.mxu0 %v9192_v52 }
 0x1e0   :  { %2311 = vmatmul.mubr.f32.gmra.mrb[122].mxu1 %v5774_v51  ;;  %v5778_v51 = vld [vmem:[%s9165_s0 + $0x6d8] sm:$0xff] }
 0x1e1   :  { %2316 = vmatprep.mubr.f32.mxu1 %v5775_v35  ;;  %v5779_v35 = vld [vmem:[%s9165_s0 + $0x28] sm:$0xff] }
 0x1e2   :  { %4243 = vmatmul.mubr.msk.f32.gmra.mrb[58].mxu0 %vm690_vm0, %v261_v53  ;;  %v666_v53 = vld [vmem:[%s9167_s2 + $0xc30] sm:$0xff] }
 0x1e3   :  { %1802 = vmatprep.mubr.f32.mxu0 %v9192_v52 }
 0x1e4   :  { %2317 = vmatmul.mubr.f32.gmra.mrb[124].mxu1 %v5776_v0  ;;  %v5780_v0 = vld [vmem:[%s9165_s0 + $0x20] sm:$0xff] }
 0x1e5   :  { %2322 = vmatprep.mubr.f32.mxu1 %v5777_v28  ;;  %v5781_v28 = vld [vmem:[%s9165_s0 + $0x60] sm:$0xff] }
 0x1e6   :  { %4244 = vmatmul.mubr.msk.f32.gmra.mrb[60].mxu0 %vm690_vm0, %v268_v19  ;;  %v4829_v19 = vpack.c.bf16 %v666_v53, %v662_v25  ;;  %v5783_v25 = vld [vmem:[%s9165_s0 + $0x98] sm:$0xff]  ;;  %v5784_v53 = vld [vmem:[%s9165_s0 + $0x90] sm:$0xff] }
 0x1e7   :  { %1808 = vmatprep.mubr.f32.mxu0 %v9192_v52 }
 0x1e8   :  { %2323 = vmatmul.mubr.f32.gmra.mrb[126].mxu1 %v5778_v51  ;;  %v5785_v51 = vld [vmem:[%s9165_s0 + $0xd0] sm:$0xff] }
 0x1e9   :  { %2393 = vmatprep.mubr.f32.mxu1 %v5779_v35  ;;  %v5786_v35 = vld [vmem:[%s9165_s0 + $0xc8] sm:$0xff] }
 0x1ea   :  { %4245 = vmatmul.mubr.msk.f32.gmra.mrb[62].mxu0 %vm690_vm0, %v275_v63  ;;  %v5782_v63 = vld [vmem:[%s9165_s0 + $0x58] sm:$0xff] }
 0x1ec   :  { %2394 = vmatmul.mubr.f32.vlgmr.msra.gmra.mrb[64].mxu1 %v5780_v0  ;;  %v5788_v0 = vld [vmem:[%s9165_s0 + $0x100] sm:$0xff] }
 0x1ed   :  { %4830 = vmatpush1.bf16.msra.mxu1 %v4829_v19  ;;  %2399 = vmatprep.mubr.f32.mxu1 %v5781_v28  ;;  %v5787_v19 = vld [vmem:[%s9165_s0 + $0x108] sm:$0xff]  ;;  %v5789_v28 = vld [vmem:[%s9165_s0 + $0x140] sm:$0xff] }
 0x1f0   :  { %2400 = vmatmul.mubr.f32.gmra.mrb[66].mxu1 %v5782_v63  ;;  %v5790_v63 = vld [vmem:[%s9165_s0 + $0x138] sm:$0xff] }
 0x1f1   :  { %2405 = vmatprep.mubr.f32.mxu1 %v5783_v25  ;;  %v5791_v25 = vld [vmem:[%s9165_s0 + $0x178] sm:$0xff] }
 0x1f4   :  { %2406 = vmatmul.mubr.f32.gmra.mrb[68].mxu1 %v5784_v53  ;;  %v5792_v53 = vld [vmem:[%s9165_s0 + $0x170] sm:$0xff] }
 0x1f5   :  { %2411 = vmatprep.mubr.f32.mxu1 %v5785_v51  ;;  %v5793_v51 = vld [vmem:[%s9165_s0 + $0x1b0] sm:$0xff] }
 0x1f8   :  { %2412 = vmatmul.mubr.f32.gmra.mrb[70].mxu1 %v5786_v35  ;;  %v5794_v35 = vld [vmem:[%s9165_s0 + $0x1a8] sm:$0xff] }
 0x1f9   :  { %2417 = vmatprep.mubr.f32.mxu1 %v5787_v19  ;;  %v5795_v19 = vld [vmem:[%s9165_s0 + $0x1e8] sm:$0xff] }
 0x1fc   :  { %2418 = vmatmul.mubr.f32.gmra.mrb[72].mxu1 %v5788_v0  ;;  %v5796_v0 = vld [vmem:[%s9165_s0 + $0x1e0] sm:$0xff] }
 0x1fd   :  { %2423 = vmatprep.mubr.f32.mxu1 %v5789_v28  ;;  %v5797_v28 = vld [vmem:[%s9165_s0 + $0x220] sm:$0xff] }
 0x200   :  { %2424 = vmatmul.mubr.f32.gmra.mrb[74].mxu1 %v5790_v63  ;;  %v5798_v63 = vld [vmem:[%s9165_s0 + $0x218] sm:$0xff] }
 0x201   :  { %2429 = vmatprep.mubr.f32.mxu1 %v5791_v25  ;;  %v5799_v25 = vld [vmem:[%s9165_s0 + $0x258] sm:$0xff] }
 0x204   :  { %2430 = vmatmul.mubr.f32.gmra.mrb[76].mxu1 %v5792_v53  ;;  %v5800_v53 = vld [vmem:[%s9165_s0 + $0x250] sm:$0xff] }
 0x205   :  { %2435 = vmatprep.mubr.f32.mxu1 %v5793_v51  ;;  %v5801_v51 = vld [vmem:[%s9165_s0 + $0x290] sm:$0xff] }
 0x208   :  { %2436 = vmatmul.mubr.f32.gmra.mrb[78].mxu1 %v5794_v35  ;;  %v5802_v35 = vld [vmem:[%s9165_s0 + $0x288] sm:$0xff] }
 0x209   :  { %2441 = vmatprep.mubr.f32.mxu1 %v5795_v19  ;;  %v5803_v19 = vld [vmem:[%s9165_s0 + $0x2c8] sm:$0xff] }
 0x20c   :  { %2442 = vmatmul.mubr.f32.gmra.mrb[80].mxu1 %v5796_v0  ;;  %v5804_v0 = vld [vmem:[%s9165_s0 + $0x2c0] sm:$0xff] }
 0x20d   :  { %2447 = vmatprep.mubr.f32.mxu1 %v5797_v28  ;;  %v5805_v28 = vld [vmem:[%s9165_s0 + $0x300] sm:$0xff] }
 0x210   :  { %2448 = vmatmul.mubr.f32.gmra.mrb[82].mxu1 %v5798_v63  ;;  %v5806_v63 = vld [vmem:[%s9165_s0 + $0x2f8] sm:$0xff] }
 0x211   :  { %2453 = vmatprep.mubr.f32.mxu1 %v5799_v25  ;;  %v5807_v25 = vld [vmem:[%s9165_s0 + $0x338] sm:$0xff] }
 0x214   :  { %2454 = vmatmul.mubr.f32.gmra.mrb[84].mxu1 %v5800_v53  ;;  %v5808_v53 = vld [vmem:[%s9165_s0 + $0x330] sm:$0xff] }
 0x215   :  { %2459 = vmatprep.mubr.f32.mxu1 %v5801_v51  ;;  %v5809_v51 = vld [vmem:[%s9165_s0 + $0x370] sm:$0xff] }
 0x218   :  { %2460 = vmatmul.mubr.f32.gmra.mrb[86].mxu1 %v5802_v35  ;;  %v5810_v35 = vld [vmem:[%s9165_s0 + $0x368] sm:$0xff] }
 0x219   :  { %2465 = vmatprep.mubr.f32.mxu1 %v5803_v19  ;;  %v5811_v19 = vld [vmem:[%s9165_s0 + $0x3a8] sm:$0xff] }
 0x21c   :  { %2466 = vmatmul.mubr.f32.gmra.mrb[88].mxu1 %v5804_v0  ;;  %v5812_v0 = vld [vmem:[%s9165_s0 + $0x3a0] sm:$0xff] }
 0x21d   :  { %2471 = vmatprep.mubr.f32.mxu1 %v5805_v28  ;;  %v5813_v28 = vld [vmem:[%s9165_s0 + $0x3e0] sm:$0xff] }
 0x220   :  { %2472 = vmatmul.mubr.f32.gmra.mrb[90].mxu1 %v5806_v63  ;;  %v670_v63 = vlaneseq }
 0x221   :  { %2477 = vmatprep.mubr.f32.mxu1 %v5807_v25  ;;  %v5814_v25 = vld [vmem:[%s9165_s0 + $0x3d8] sm:$0xff] }
 0x224   :  { %2478 = vmatmul.mubr.f32.gmra.mrb[92].mxu1 %v5808_v53  ;;  %v5815_v53 = vld [vmem:[%s9165_s0 + $0x418] sm:$0xff] }
 0x225   :  { %2483 = vmatprep.mubr.f32.mxu1 %v5809_v51  ;;  %v8624_v51 = vshrl.u32 %v670_v63, 7  ;;  %v5818_v63 = vld [vmem:[%s9165_s0 + $0x448] sm:$0xff] }
 0x227   :  { %9207 = vst [vmem:[#allocation29_spill] sm:$0xff] %v8624_v51 }
 0x228   :  { %2484 = vmatmul.mubr.f32.gmra.mrb[94].mxu1 %v5810_v35  ;;  %v5816_v35 = vld [vmem:[%s9165_s0 + $0x410] sm:$0xff] }
 0x229   :  { %2489 = vmatprep.mubr.f32.mxu1 %v5811_v19  ;;  %v5817_v19 = vld [vmem:[%s9165_s0 + $0x450] sm:$0xff] }
 0x22c   :  { %2490 = vmatmul.mubr.f32.gmra.mrb[96].mxu1 %v5812_v0  ;;  %v672_v0 = vsub.s32 0, %v8624_v51 }
 0x22d   :  { %2495 = vmatprep.mubr.f32.mxu1 %v5813_v28  ;;  %v668_v28 = vld [vmem:[%s9168_s3] sm:$0xf] }
 0x230   :  { %2496 = vmatmul.mubr.f32.gmra.mrb[98].mxu1 %v5814_v25  ;;  %v676_v25 = vsub.s32 1, %v8624_v51  ;;  %v5821_v51 = vld [vmem:[%s9165_s0 + $0x4c0] sm:$0xff] }
 0x231   :  { %2501 = vmatprep.mubr.f32.mxu1 %v5815_v53  ;;  %v5819_v53 = vld [vmem:[%s9165_s0 + $0x488] sm:$0xff] }
 0x234   :  { %2502 = vmatmul.mubr.f32.gmra.mrb[100].mxu1 %v5816_v35  ;;  %v8643_v35 = vrot.slane %v668_v28, %v672_v0 }
 0x235   :  { %2507 = vmatprep.mubr.f32.mxu1 %v5817_v19  ;;  %v8645_v19 = vrot.slane %v668_v28, %v676_v25  ;;  %v5822_v28 = vld [vmem:[%s9165_s0 + $0x4b8] sm:$0xff]  ;;  %v2972_v25 = vld [vmem:[#allocation2 + $0x8] sm:$0xff] }
 0x236   :  { %vm3100_vm1 = vcmp.ge.f32.partialorder %v2972_v25, 0.2 }
 0x238   :  { %2508 = vmatmul.mubr.f32.gmra.mrb[102].mxu1 %v5818_v63  ;;  %v854_v63 = vadd.f32 %v7737_v62, %v8643_v35  ;;  %v860_v62 = vadd.f32 %v7749_v3, %v8643_v35  ;;  %v5825_v3 = vld [vmem:[%s9165_s0 + $0x530] sm:$0xff] }
 0x239   :  { %2513 = vmatprep.mubr.f32.mxu1 %v5819_v53  ;;  %v856_v53 = vadd.f32 %v7742_v36, %v8645_v19  ;;  %v862_v36 = vadd.f32 %v7754_v46, %v8645_v19  ;;  %v3388_v46 = vld [vmem:[#allocation5 + $0x108] sm:$0xff] }
 0x23c   :  { %2514 = vmatmul.mubr.f32.gmra.mrb[104].mxu1 %v5820_v59 }
 0x23d   :  { %2519 = vmatprep.mubr.f32.mxu1 %v5821_v51  ;;  %v2971_v51 = vld [vmem:[#allocation2] sm:$0xff] }
 0x23e   :  { %vm3099_vm2 = vcmp.ge.f32.partialorder %v2971_v51, 0.2 }
 0x240   :  { %2520 = vmatmul.mubr.f32.gmra.mrb[106].mxu1 %v5822_v28 }
 0x241   :  { %v1624_v0 = vpop.f32.mrb[0].mxu0  ;;  %2525 = vmatprep.mubr.f32.mxu1 %v5823_v11 }
 0x242   :  { %v4928_v14 = vadd.f32 %v1624_v0, %v854_v63  ;;  %v1626_v59 = vpop.f32.mrb[1].mxu0  ;;  %v5824_v63 = vld [vmem:[%s9165_s0 + $0x4f0] sm:$0xff]  ;;  %v2976_v0 = vld [vmem:[#allocation2 + $0x28] sm:$0xff] }
 0x243   :  { %v4930_v5 = vadd.f32 %v1626_v59, %v856_v53  ;;  %v2975_v53 = vld [vmem:[#allocation2 + $0x20] sm:$0xff]  ;;  %vm3104_vm3 = vcmp.ge.f32.partialorder %v2976_v0, 0.2 }
 0x244   :  { %2526 = vmatmul.mubr.f32.gmra.mrb[108].mxu1 %v5824_v63  ;;  %v2843_v28 = vmax.f32 %v4928_v14, 0.0  ;;  %v3387_v59 = vld [vmem:[#allocation5 + $0x100] sm:$0xff]  ;;  %v866_v63 = vadd.f32 %v7761_v10, %v8643_v35  ;;  %vm3103_vm4 = vcmp.ge.f32.partialorder %v2975_v53, 0.2  ;;  %v5827_v10 = vld [vmem:[%s9165_s0 + $0x568] sm:$0xff] }
 0x245   :  { %v2844_v26 = vmax.f32 %v4930_v5, 0.0  ;;  %v1630_v4 = vpop.f32.mrb[2].mxu0  ;;  %2531 = vmatprep.mubr.f32.mxu1 %v5825_v3  ;;  %v4880_v15 = vpack.c.bf16 %v3388_v46, %v3387_v59  ;;  %v872_v3 = vadd.f32 %v7773_v17, %v8643_v35  ;;  %v5828_v59 = vld [vmem:[%s9165_s0 + $0x560] sm:$0xff]  ;;  %v2984_v46 = vld [vmem:[#allocation2 + $0x68] sm:$0xff] }
 0x246   :  { %v4932_v11 = vadd.f32 %v1630_v4, %v860_v62  ;;  %v1632_v61 = vpop.f32.mrb[3].mxu0  ;;  %v868_v4 = vadd.f32 %v7766_v57, %v8645_v19  ;;  %v5826_v62 = vld [vmem:[%s9165_s0 + $0x528] sm:$0xff]  ;;  %v5829_v17 = vld [vmem:[%s9165_s0 + $0x5a0] sm:$0xff]  ;;  %vm3112_vm7 = vcmp.ge.f32.partialorder %v2984_v46, 0.2 }
 0x247   :  { %v4934_v5 = vadd.f32 %v1632_v61, %v862_v36  ;;  %4279 = vmatprep.mubr.msk.f32.mxu0 %vm3100_vm1, %v2844_v26  ;;  %v2980_v61 = vld [vmem:[#allocation2 + $0x48] sm:$0xff] }
 0x248   :  { %4280 = vmatmul.mubr.msk.f32.vlgmr.msra.gmra.mrb[64].mxu0 %vm3099_vm2, %v2843_v28  ;;  %2532 = vmatmul.mubr.f32.gmra.mrb[110].mxu1 %v5826_v62  ;;  %v2847_v26 = vmax.f32 %v4932_v11, 0.0  ;;  %v2979_v28 = vld [vmem:[#allocation2 + $0x40] sm:$0xff]  ;;  %vm3108_vm5 = vcmp.ge.f32.partialorder %v2980_v61, 0.2 }
 0x249   :  { %v2848_v14 = vmax.f32 %v4934_v5, 0.0  ;;  %v1636_v51 = vpop.f32.mrb[4].mxu0  ;;  %4881 = vmatpush1.bf16.msra.mxu0 %v4880_v15  ;;  %2537 = vmatprep.mubr.f32.mxu1 %v5827_v10  ;;  %v874_v15 = vadd.f32 %v7778_v39, %v8645_v19  ;;  %vm3107_vm6 = vcmp.ge.f32.partialorder %v2979_v28, 0.2  ;;  %v3390_v39 = vld [vmem:[#allocation5 + $0x118] sm:$0xff] }
 0x24a   :  { %v4936_v25 = vadd.f32 %v1636_v51, %v866_v63  ;;  %v1638_v36 = vpop.f32.mrb[5].mxu0  ;;  %4882 = vmatprep.subr.bf16.mxu0 %v9190_v42  ;;  %v5830_v28 = vld [vmem:[%s9165_s0 + $0x598] sm:$0xff] }
 0x24b   :  { %v4938_v57 = vadd.f32 %v1638_v36, %v868_v4  ;;  %4281 = vmatprep.mubr.msk.f32.mxu0 %vm3104_vm3, %v2848_v14  ;;  %v2983_v4 = vld [vmem:[#allocation2 + $0x60] sm:$0xff]  ;;  %v3389_v14 = vld [vmem:[#allocation5 + $0x110] sm:$0xff] }
 0x24c   :  { %4282 = vmatmul.mubr.msk.f32.gmra.mrb[66].mxu0 %vm3103_vm4, %v2847_v26  ;;  %2538 = vmatmul.mubr.f32.gmra.mrb[112].mxu1 %v5828_v59  ;;  %v2851_v5 = vmax.f32 %v4936_v25, 0.0  ;;  %v4883_v62 = vpack.c.bf16 %v3390_v39, %v3389_v14  ;;  %v878_v26 = vadd.f32 %v7785_v24, %v8643_v35  ;;  %v880_v25 = vadd.f32 %v7790_v54, %v8645_v19  ;;  %v5831_v24 = vld [vmem:[%s9165_s0 + $0x5d8] sm:$0xff]  ;;  %v2991_v39 = vld [vmem:[#allocation2 + $0xa0] sm:$0xff] }
 0x24d   :  { %v2852_v11 = vmax.f32 %v4938_v57, 0.0  ;;  %v1642_v53 = vpop.f32.mrb[6].mxu0  ;;  %2543 = vmatprep.mubr.f32.mxu1 %v5829_v17  ;;  %vm3111_vm8 = vcmp.ge.f32.partialorder %v2983_v4, 0.2  ;;  %v2988_v57 = vld [vmem:[#allocation2 + $0x88] sm:$0xff]  ;;  %v886_v59 = vadd.f32 %v7802_v30, %v8645_v19 }
 0x24e   :  { %v4940_v0 = vadd.f32 %v1642_v53, %v872_v3  ;;  %v1644_v63 = vpop.f32.mrb[7].mxu0  ;;  %4884 = vmatpush1.bf16.msra.mxu0 %v4883_v62  ;;  %v884_v53 = vadd.f32 %v7797_v31, %v8643_v35  ;;  %vm3116_vm9 = vcmp.ge.f32.partialorder %v2988_v57, 0.2  ;;  %v2992_v17 = vld [vmem:[#allocation2 + $0xa8] sm:$0xff]  ;;  %v5833_v31 = vld [vmem:[%s9165_s0 + $0x610] sm:$0xff] }
 0x24f   :  { %v4942_v51 = vadd.f32 %v1644_v63, %v874_v15  ;;  %4283 = vmatprep.mubr.msk.f32.mxu0 %vm3108_vm5, %v2852_v11  ;;  %v2987_v11 = vld [vmem:[#allocation2 + $0x80] sm:$0xff]  ;;  %4885 = vmatprep.subr.bf16.mxu0 %v9190_v42  ;;  %v5832_v63 = vld [vmem:[%s9165_s0 + $0x5d0] sm:$0xff]  ;;  %v3392_v30 = vld [vmem:[#allocation5 + $0x128] sm:$0xff]  ;;  %vm3120_vm11 = vcmp.ge.f32.partialorder %v2992_v17, 0.2 }
 0x250   :  { %4284 = vmatmul.mubr.msk.f32.gmra.mrb[68].mxu0 %vm3107_vm6, %v2851_v5  ;;  %2544 = vmatmul.mubr.f32.gmra.mrb[114].mxu1 %v5830_v28  ;;  %v2855_v61 = vmax.f32 %v4940_v0, 0.0  ;;  %vm3115_vm10 = vcmp.ge.f32.partialorder %v2987_v11, 0.2  ;;  %vm3119_vm12 = vcmp.ge.f32.partialorder %v2991_v39, 0.2  ;;  %v2995_v11 = vld [vmem:[#allocation2 + $0xc0] sm:$0xff] }
 0x251   :  { %v2856_v36 = vmax.f32 %v4942_v51, 0.0  ;;  %v1648_v10 = vpop.f32.mrb[8].mxu0  ;;  %2549 = vmatprep.mubr.f32.mxu1 %v5831_v24  ;;  %v3391_v51 = vld [vmem:[#allocation5 + $0x120] sm:$0xff]  ;;  %vm3123_vm14 = vcmp.ge.f32.partialorder %v2995_v11, 0.2 }
 0x252   :  { %v4944_v3 = vadd.f32 %v1648_v10, %v878_v26  ;;  %v1650_v15 = vpop.f32.mrb[9].mxu0  ;;  %v4886_v26 = vpack.c.bf16 %v3392_v30, %v3391_v51  ;;  %v902_v30 = vadd.f32 %v7833_v56, %v8643_v35  ;;  %v5839_v56 = vld [vmem:[%s9165_s0 + $0x6b8] sm:$0xff] }
 0x253   :  { %v4946_v54 = vadd.f32 %v1650_v15, %v880_v25  ;;  %4285 = vmatprep.mubr.msk.f32.mxu0 %vm3112_vm7, %v2856_v36  ;;  %v890_v25 = vadd.f32 %v7809_v38, %v8643_v35  ;;  %v892_v36 = vadd.f32 %v7814_v1, %v8645_v19  ;;  %v5835_v38 = vld [vmem:[%s9165_s0 + $0x648] sm:$0xff] }
 0x254   :  { %4286 = vmatmul.mubr.msk.f32.gmra.mrb[70].mxu0 %vm3111_vm8, %v2855_v61  ;;  %2550 = vmatmul.mubr.f32.gmra.mrb[116].mxu1 %v5832_v63  ;;  %v2859_v4 = vmax.f32 %v4944_v3, 0.0  ;;  %v5834_v61 = vld [vmem:[%s9165_s0 + $0x608] sm:$0xff] }
 0x255   :  { %v2860_v5 = vmax.f32 %v4946_v54, 0.0  ;;  %v1654_v0 = vpop.f32.mrb[10].mxu0  ;;  %2555 = vmatprep.mubr.f32.mxu1 %v5833_v31  ;;  %v2996_v3 = vld [vmem:[#allocation2 + $0xc8] sm:$0xff]  ;;  %4887 = vmatpush1.bf16.msra.mxu0 %v4886_v26  ;;  %v896_v54 = vadd.f32 %v7821_v45, %v8643_v35  ;;  %v5837_v45 = vld [vmem:[%s9165_s0 + $0x680] sm:$0xff]  ;;  %v3393_v31 = vld [vmem:[#allocation5 + $0x130] sm:$0xff] }
 0x256   :  { %v4948_v46 = vadd.f32 %v1654_v0, %v884_v53  ;;  %v1656_v14 = vpop.f32.mrb[11].mxu0  ;;  %4888 = vmatprep.subr.bf16.mxu0 %v9190_v42  ;;  %vm3124_vm13 = vcmp.ge.f32.partialorder %v2996_v3, 0.2  ;;  %v898_v53 = vadd.f32 %v7826_v6, %v8645_v19  ;;  %v5836_v0 = vld [vmem:[%s9165_s0 + $0x640] sm:$0xff]  ;;  %v3000_v63 = vld [vmem:[#allocation2 + $0xe8] sm:$0xff]  ;;  %v3394_v6 = vld [vmem:[#allocation5 + $0x138] sm:$0xff] }
 0x257   :  { %v4950_v62 = vadd.f32 %v1656_v14, %v886_v59  ;;  %4287 = vmatprep.mubr.msk.f32.mxu0 %vm3116_vm9, %v2860_v5  ;;  %v2999_v14 = vld [vmem:[#allocation2 + $0xe0] sm:$0xff]  ;;  %v4889_v51 = vpack.c.bf16 %v3394_v6, %v3393_v31  ;;  %vm3128_vm15 = vcmp.ge.f32.partialorder %v3000_v63, 0.2  ;;  %v5842_v6 = vld [vmem:[%s9165_s0 + $0x6e8] sm:$0xff] }
 0x258   :  { %4288 = vmatmul.mubr.msk.f32.gmra.mrb[72].mxu0 %vm3115_vm10, %v2859_v4  ;;  %2556 = vmatmul.mubr.f32.gmra.mrb[118].mxu1 %v5834_v61  ;;  %v2863_v57 = vmax.f32 %v4948_v46, 0.0  ;;  %vm3127_vm1 = vcmp.ge.f32.partialorder %v2999_v14, 0.2  ;;  %v3395_v63 = vld [vmem:[#allocation5 + $0x140] sm:$0xff] }
 0x259   :  { %v2864_v10 = vmax.f32 %v4950_v62, 0.0  ;;  %v1660_v28 = vpop.f32.mrb[12].mxu0  ;;  %2561 = vmatprep.mubr.f32.mxu1 %v5835_v38  ;;  %v904_v62 = vadd.f32 %v7838_v9, %v8645_v19  ;;  %4890 = vmatpush1.bf16.msra.mxu0 %v4889_v51  ;;  %v3397_v51 = vld [vmem:[#allocation5 + $0x150] sm:$0xff] }
 0x25a   :  { %v4952_v15 = vadd.f32 %v1660_v28, %v890_v25  ;;  %v1662_v24 = vpop.f32.mrb[13].mxu0  ;;  %4891 = vmatprep.subr.bf16.mxu0 %v9190_v42 }
 0x25b   :  { %v4954_v1 = vadd.f32 %v1662_v24, %v892_v36  ;;  %4289 = vmatprep.mubr.msk.f32.mxu0 %vm3120_vm11, %v2864_v10  ;;  %v5838_v36 = vld [vmem:[%s9165_s0 + $0x678] sm:$0xff]  ;;  %v3004_v10 = vld [vmem:[#allocation2 + $0x108] sm:$0xff]  ;;  %v910_v24 = vadd.f32 %v7850_v13, %v8645_v19 }
 0x25c   :  { %4290 = vmatmul.mubr.msk.f32.gmra.mrb[74].mxu0 %vm3119_vm12, %v2863_v57  ;;  %2562 = vmatmul.mubr.f32.gmra.mrb[120].mxu1 %v5836_v0  ;;  %v2867_v4 = vmax.f32 %v4952_v15, 0.0  ;;  %v3003_v57 = vld [vmem:[#allocation2 + $0x100] sm:$0xff]  ;;  %v908_v15 = vadd.f32 %v7845_v2, %v8643_v35  ;;  %vm3132_vm2 = vcmp.ge.f32.partialorder %v3004_v10, 0.2  ;;  %v5841_v2 = vld [vmem:[%s9165_s0 + $0x6f0] sm:$0xff]  ;;  %v3396_v13 = vld [vmem:[#allocation5 + $0x148] sm:$0xff] }
 0x25d   :  { %v2868_v59 = vmax.f32 %v4954_v1, 0.0  ;;  %v1666_v5 = vpop.f32.mrb[14].mxu0  ;;  %2567 = vmatprep.mubr.f32.mxu1 %v5837_v45  ;;  %v5840_v1 = vld [vmem:[%s9165_s0 + $0x6b0] sm:$0xff]  ;;  %vm3131_vm3 = vcmp.ge.f32.partialorder %v3003_v57, 0.2  ;;  %v916_v45 = vadd.f32 %v7865_v18, %v8645_v19  ;;  %v3400_v10 = vld [vmem:[#allocation5 + $0x168] sm:$0xff] }
 0x25e   :  { %v4956_v17 = vadd.f32 %v1666_v5, %v896_v54  ;;  %v1668_v46 = vpop.f32.mrb[15].mxu0  ;;  %v3008_v54 = vld [vmem:[#allocation2 + $0x128] sm:$0xff] }
 0x25f   :  { %v4958_v39 = vadd.f32 %v1668_v46, %v898_v53  ;;  %4291 = vmatprep.mubr.msk.f32.mxu0 %vm3124_vm13, %v2868_v59  ;;  %v3007_v53 = vld [vmem:[#allocation2 + $0x120] sm:$0xff]  ;;  %v914_v46 = vadd.f32 %v7863_v29, %v8643_v35  ;;  %vm3136_vm4 = vcmp.ge.f32.partialorder %v3008_v54, 0.2  ;;  %v3402_v54 = vld [vmem:[#allocation5 + $0x178] sm:$0xff] }
 0x260   :  { %4292 = vmatmul.mubr.msk.f32.gmra.mrb[76].mxu0 %vm3123_vm14, %v2867_v4  ;;  %2568 = vmatmul.mubr.f32.gmra.mrb[122].mxu1 %v5838_v36  ;;  %v2871_v28 = vmax.f32 %v4956_v17, 0.0  ;;  %v4892_v17 = vpack.c.bf16 %v3396_v13, %v3395_v63  ;;  %vm3135_vm5 = vcmp.ge.f32.partialorder %v3007_v53, 0.2  ;;  %v3399_v36 = vld [vmem:[#allocation5 + $0x160] sm:$0xff]  ;;  %v5844_v63 = vld [vmem:[%s9165_s0 + $0x68] sm:$0xff] }
 0x261   :  { %v2872_v26 = vmax.f32 %v4958_v39, 0.0  ;;  %v1672_v25 = vpop.f32.mrb[16].mxu0  ;;  %2573 = vmatprep.mubr.f32.mxu1 %v5839_v56  ;;  %v3012_v39 = vld [vmem:[#allocation2 + $0x148] sm:$0xff] }
 0x262   :  { %v4960_v61 = vadd.f32 %v1672_v25, %v902_v30  ;;  %v1674_v3 = vpop.f32.mrb[17].mxu0  ;;  %4893 = vmatpush1.bf16.msra.mxu0 %v4892_v17  ;;  %v3398_v30 = vld [vmem:[#allocation5 + $0x158] sm:$0xff]  ;;  %v3011_v25 = vld [vmem:[#allocation2 + $0x140] sm:$0xff]  ;;  %vm3140_vm6 = vcmp.ge.f32.partialorder %v3012_v39, 0.2  ;;  %v3020_v13 = vld [vmem:[#allocation2 + $0x188] sm:$0xff]  ;;  %v934_v39 = vadd.f32 %v7943_v49, %v8645_v19 }
 0x263   :  { %v4962_v9 = vadd.f32 %v1674_v3, %v904_v62  ;;  %4293 = vmatprep.mubr.msk.f32.mxu0 %vm3128_vm15, %v2872_v26  ;;  %4894 = vmatprep.subr.bf16.mxu0 %v9190_v42  ;;  %v4895_v18 = vpack.c.bf16 %v3398_v30, %v3397_v51  ;;  %v922_v3 = vadd.f32 %v7889_v12, %v8645_v19  ;;  %vm3139_vm7 = vcmp.ge.f32.partialorder %v3011_v25, 0.2  ;;  %v3401_v12 = vld [vmem:[#allocation5 + $0x170] sm:$0xff] }
 0x264   :  { %4294 = vmatmul.mubr.msk.f32.gmra.mrb[78].mxu0 %vm3127_vm1, %v2871_v28  ;;  %2574 = vmatmul.mubr.f32.gmra.mrb[124].mxu1 %v5840_v1  ;;  %v2875_v59 = vmax.f32 %v4960_v61, 0.0  ;;  %v920_v61 = vadd.f32 %v7881_v48, %v8643_v35  ;;  %v3015_v1 = vld [vmem:[#allocation2 + $0x160] sm:$0xff]  ;;  %vm3148_vm10 = vcmp.ge.f32.partialorder %v3020_v13, 0.2  ;;  %v3405_v49 = vld [vmem:[#allocation5 + $0x190] sm:$0xff] }
 0x265   :  { %v2876_v38 = vmax.f32 %v4962_v9, 0.0  ;;  %v1678_v11 = vpop.f32.mrb[18].mxu0  ;;  %2579 = vmatprep.mubr.f32.mxu1 %v5841_v2  ;;  %v5843_v9 = vld [vmem:[%s9165_s0 + $0x30] sm:$0xff]  ;;  %vm3143_vm9 = vcmp.ge.f32.partialorder %v3015_v1, 0.2  ;;  %v3408_v1 = vld [vmem:[#allocation5 + $0x1a8] sm:$0xff] }
 0x266   :  { %v4964_v5 = vadd.f32 %v1678_v11, %v908_v15  ;;  %v1680_v0 = vpop.f32.mrb[19].mxu0  ;;  %v3016_v15 = vld [vmem:[#allocation2 + $0x168] sm:$0xff]  ;;  %4896 = vmatpush1.bf16.msra.mxu0 %v4895_v18 }
 0x267   :  { %v4966_v4 = vadd.f32 %v1680_v0, %v910_v24  ;;  %4295 = vmatprep.mubr.msk.f32.mxu0 %vm3132_vm2, %v2876_v38  ;;  %v4898_v24 = vpack.c.bf16 %v3400_v10, %v3399_v36  ;;  %4897 = vmatprep.subr.bf16.mxu0 %v9190_v42  ;;  %vm3144_vm8 = vcmp.ge.f32.partialorder %v3016_v15, 0.2  ;;  %v3023_v36 = vld [vmem:[#allocation2 + $0x1a0] sm:$0xff]  ;;  %v3406_v10 = vld [vmem:[#allocation5 + $0x198] sm:$0xff]  ;;  %v3028_v15 = vld [vmem:[#allocation2 + $0x1c8] sm:$0xff] }
 0x268   :  { %4296 = vmatmul.mubr.msk.f32.gmra.mrb[80].mxu0 %vm3131_vm3, %v2875_v59  ;;  %2580 = vmatmul.mubr.f32.gmra.mrb[126].mxu1 %v5842_v6  ;;  %v2879_v62 = vmax.f32 %v4964_v5, 0.0  ;;  %v926_v59 = vadd.f32 %v7908_v37, %v8643_v35  ;;  %v928_v5 = vadd.f32 %v7916_v22, %v8645_v19  ;;  %v3403_v22 = vld [vmem:[#allocation5 + $0x180] sm:$0xff]  ;;  %v932_v6 = vadd.f32 %v7935_v34, %v8643_v35 }
 0x269   :  { %v2880_v14 = vmax.f32 %v4966_v4, 0.0  ;;  %v1684_v31 = vpop.f32.mrb[20].mxu0  ;;  %2650 = vmatprep.mubr.f32.mxu1 %v9192_v52  ;;  %v4901_v4 = vpack.c.bf16 %v3402_v54, %v3401_v12  ;;  %vm3151_vm13 = vcmp.ge.f32.partialorder %v3023_v36, 0.2  ;;  %v944_v54 = vadd.f32 %v7989_v23, %v8643_v35 }
 0x26a   :  { %v4968_v26 = vadd.f32 %v1684_v31, %v914_v46  ;;  %v1686_v29 = vpop.f32.mrb[21].mxu0  ;;  %4899 = vmatpush1.bf16.msra.mxu0 %v4898_v24  ;;  %v4907_v24 = vpack.c.bf16 %v3406_v10, %v3405_v49  ;;  %vm3156_vm14 = vcmp.ge.f32.partialorder %v3028_v15, 0.2  ;;  %v5849_v10 = vld [vmem:[%s9165_s0 + $0x180] sm:$0xff] }
 0x26b   :  { %v4970_v28 = vadd.f32 %v1686_v29, %v916_v45  ;;  %4297 = vmatprep.mubr.msk.f32.mxu0 %vm3136_vm4, %v2880_v14  ;;  %v3019_v45 = vld [vmem:[#allocation2 + $0x180] sm:$0xff]  ;;  %4900 = vmatprep.subr.bf16.mxu0 %v9190_v42  ;;  %v3404_v14 = vld [vmem:[#allocation5 + $0x188] sm:$0xff] }
 0x26c   :  { %4298 = vmatmul.mubr.msk.f32.gmra.mrb[82].mxu0 %vm3135_vm5, %v2879_v62  ;;  %4246 = vmatmul.mubr.msk.f32.vlgmr.msra.gmra.mrb[64].mxu1 %vm690_vm0, %v5843_v9  ;;  %v2883_v38 = vmax.f32 %v4968_v26, 0.0  ;;  %v5845_v62 = vld [vmem:[%s9165_s0 + $0xa0] sm:$0xff]  ;;  %vm3147_vm11 = vcmp.ge.f32.partialorder %v3019_v45, 0.2  ;;  %v3024_v26 = vld [vmem:[#allocation2 + $0x1a8] sm:$0xff]  ;;  %v4904_v29 = vpack.c.bf16 %v3404_v14, %v3403_v22  ;;  %v5846_v9 = vld [vmem:[%s9165_s0 + $0xd8] sm:$0xff]  ;;  %v950_v45 = vadd.f32 %v8016_v21, %v8643_v35 }
 0x26d   :  { %v2884_v56 = vmax.f32 %v4970_v28, 0.0  ;;  %v1690_v57 = vpop.f32.mrb[22].mxu0  ;;  %2656 = vmatprep.mubr.f32.mxu1 %v9192_v52  ;;  %vm3152_vm12 = vcmp.ge.f32.partialorder %v3024_v26, 0.2  ;;  %v952_v22 = vadd.f32 %v8024_v43, %v8645_v19  ;;  %v3035_v26 = vld [vmem:[#allocation2 + $0x200] sm:$0xff] }
 0x26e   :  { %v4972_v48 = vadd.f32 %v1690_v57, %v920_v61  ;;  %v1692_v11 = vpop.f32.mrb[23].mxu0  ;;  %4902 = vmatpush1.bf16.msra.mxu0 %v4901_v4  ;;  %v938_v61 = vadd.f32 %v7962_v20, %v8643_v35  ;;  %v3411_v43 = vld [vmem:[#allocation5 + $0x1c0] sm:$0xff]  ;;  %vm3163_vm4 = vcmp.ge.f32.partialorder %v3035_v26, 0.2  ;;  %v982_v26 = vadd.f32 %v8163_v40, %v8645_v19 }
 0x26f   :  { %v4974_v53 = vadd.f32 %v1692_v11, %v922_v3  ;;  %4299 = vmatprep.mubr.msk.f32.mxu0 %vm3140_vm6, %v2884_v56  ;;  %4903 = vmatprep.subr.bf16.mxu0 %v9190_v42  ;;  %v940_v3 = vadd.f32 %v7970_v33, %v8645_v19  ;;  %v3027_v11 = vld [vmem:[#allocation2 + $0x1c0] sm:$0xff]  ;;  %v986_v40 = vadd.f32 %v8182_v27, %v8643_v35 }
 0x270   :  { %4300 = vmatmul.mubr.msk.f32.gmra.mrb[84].mxu0 %vm3139_vm7, %v2883_v38  ;;  %4247 = vmatmul.mubr.msk.f32.gmra.mrb[66].mxu1 %vm690_vm0, %v5844_v63  ;;  %v2887_v17 = vmax.f32 %v4972_v48, 0.0  ;;  %v3407_v33 = vld [vmem:[#allocation5 + $0x1a0] sm:$0xff]  ;;  %vm3155_vm15 = vcmp.ge.f32.partialorder %v3027_v11, 0.2  ;;  %v5850_v11 = vld [vmem:[%s9165_s0 + $0x1b8] sm:$0xff] }
 0x271   :  { %v2888_v0 = vmax.f32 %v4974_v53, 0.0  ;;  %v1696_v2 = vpop.f32.mrb[24].mxu0  ;;  %2662 = vmatprep.mubr.f32.mxu1 %v9192_v52  ;;  %v946_v53 = vadd.f32 %v7997_v55, %v8645_v19  ;;  %v4910_v63 = vpack.c.bf16 %v3408_v1, %v3407_v33  ;;  %v3409_v55 = vld [vmem:[#allocation5 + $0x1b0] sm:$0xff]  ;;  %v3044_v33 = vld [vmem:[#allocation2 + $0x248] sm:$0xff]  ;;  %v3059_v27 = vld [vmem:[#allocation2 + $0x2c0] sm:$0xff] }
 0x272   :  { %v4976_v46 = vadd.f32 %v1696_v2, %v926_v59  ;;  %v1698_v37 = vpop.f32.mrb[25].mxu0  ;;  %4905 = vmatpush1.bf16.msra.mxu0 %v4904_v29  ;;  %v3032_v2 = vld [vmem:[#allocation2 + $0x1e8] sm:$0xff]  ;;  %vm3172_vm7 = vcmp.ge.f32.partialorder %v3044_v33, 0.2 }
 0x273   :  { %v4978_v31 = vadd.f32 %v1698_v37, %v928_v5  ;;  %4301 = vmatprep.mubr.msk.f32.mxu0 %vm3144_vm8, %v2888_v0  ;;  %4906 = vmatprep.subr.bf16.mxu0 %v9190_v42  ;;  %v5847_v0 = vld [vmem:[%s9165_s0 + $0x110] sm:$0xff]  ;;  %vm3160_vm1 = vcmp.ge.f32.partialorder %v3032_v2, 0.2  ;;  %v3412_v29 = vld [vmem:[#allocation5 + $0x1c8] sm:$0xff]  ;;  %v970_v2 = vadd.f32 %v8107_v47, %v8645_v19 }
 0x274   :  { %4302 = vmatmul.mubr.msk.f32.gmra.mrb[86].mxu0 %vm3143_vm9, %v2887_v17  ;;  %4248 = vmatmul.mubr.msk.f32.gmra.mrb[68].mxu1 %vm690_vm0, %v5845_v62  ;;  %v2891_v25 = vmax.f32 %v4976_v46, 0.0  ;;  %v3031_v17 = vld [vmem:[#allocation2 + $0x1e0] sm:$0xff]  ;;  %v3410_v46 = vld [vmem:[#allocation5 + $0x1b8] sm:$0xff]  ;;  %v3064_v33 = vld [vmem:[#allocation2 + $0x2e8] sm:$0xff] }
 0x275   :  { %v2892_v51 = vmax.f32 %v4978_v31, 0.0  ;;  %v1702_v30 = vpop.f32.mrb[26].mxu0  ;;  %2668 = vmatprep.mubr.f32.mxu1 %v9192_v52  ;;  %vm3159_vm2 = vcmp.ge.f32.partialorder %v3031_v17, 0.2 }
 0x276   :  { %v4980_v18 = vadd.f32 %v1702_v30, %v932_v6  ;;  %v1704_v34 = vpop.f32.mrb[27].mxu0  ;;  %4908 = vmatpush1.bf16.msra.mxu0 %v4907_v24  ;;  %v5848_v6 = vld [vmem:[%s9165_s0 + $0x148] sm:$0xff]  ;;  %v962_v24 = vadd.f32 %v8070_v58, %v8643_v35 }
 0x277   :  { %v4982_v28 = vadd.f32 %v1704_v34, %v934_v39  ;;  %4303 = vmatprep.mubr.msk.f32.mxu0 %vm3148_vm10, %v2892_v51  ;;  %4909 = vmatprep.subr.bf16.mxu0 %v9190_v42  ;;  %v3036_v39 = vld [vmem:[#allocation2 + $0x208] sm:$0xff]  ;;  %v4913_v51 = vpack.c.bf16 %v3410_v46, %v3409_v55  ;;  %v958_v34 = vadd.f32 %v8051_v60, %v8645_v19  ;;  %v3413_v60 = vld [vmem:[#allocation5 + $0x1d0] sm:$0xff] }
 0x278   :  { %4304 = vmatmul.mubr.msk.f32.gmra.mrb[88].mxu0 %vm3147_vm11, %v2891_v25  ;;  %4249 = vmatmul.mubr.msk.f32.gmra.mrb[70].mxu1 %vm690_vm0, %v5846_v9  ;;  %v2895_v38 = vmax.f32 %v4980_v18, 0.0  ;;  %v956_v18 = vadd.f32 %v8043_v8, %v8643_v35  ;;  %vm3164_vm3 = vcmp.ge.f32.partialorder %v3036_v39, 0.2  ;;  %v3414_v9 = vld [vmem:[#allocation5 + $0x1d8] sm:$0xff]  ;;  %v3052_v39 = vld [vmem:[#allocation2 + $0x288] sm:$0xff] }
 0x279   :  { %v2896_v56 = vmax.f32 %v4982_v28, 0.0  ;;  %v1708_v57 = vpop.f32.mrb[28].mxu0  ;;  %2674 = vmatprep.mubr.f32.mxu1 %v9192_v52  ;;  %v3040_v28 = vld [vmem:[#allocation2 + $0x228] sm:$0xff]  ;;  %v4919_v1 = vpack.c.bf16 %v3414_v9, %v3413_v60  ;;  %vm3180_vm11 = vcmp.ge.f32.partialorder %v3052_v39, 0.2 }
 0x27a   :  { %v4984_v48 = vadd.f32 %v1708_v57, %v938_v61  ;;  %v1710_v20 = vpop.f32.mrb[29].mxu0  ;;  %4911 = vmatpush1.bf16.msra.mxu0 %v4910_v63  ;;  %v4916_v61 = vpack.c.bf16 %v3412_v29, %v3411_v43  ;;  %v3039_v57 = vld [vmem:[#allocation2 + $0x220] sm:$0xff]  ;;  %vm3168_vm5 = vcmp.ge.f32.partialorder %v3040_v28, 0.2  ;;  %v3072_v39 = vld [vmem:[#allocation2 + $0x328] sm:$0xff] }
 0x27b   :  { %v4986_v12 = vadd.f32 %v1710_v20, %v940_v3  ;;  %4305 = vmatprep.mubr.msk.f32.mxu0 %vm3152_vm12, %v2896_v56  ;;  %4912 = vmatprep.subr.bf16.mxu0 %v9190_v42  ;;  %vm3167_vm6 = vcmp.ge.f32.partialorder %v3039_v57, 0.2 }
 0x27c   :  { %4306 = vmatmul.mubr.msk.f32.gmra.mrb[90].mxu0 %vm3151_vm13, %v2895_v38  ;;  %4250 = vmatmul.mubr.msk.f32.gmra.mrb[72].mxu1 %vm690_vm0, %v5847_v0  ;;  %v2899_v13 = vmax.f32 %v4984_v48, 0.0  ;;  %v964_v38 = vadd.f32 %v8079_v50, %v8645_v19  ;;  %v3415_v50 = vld [vmem:[#allocation5 + $0x1e0] sm:$0xff]  ;;  %v968_v0 = vadd.f32 %v8098_v16, %v8643_v35 }
 0x27d   :  { %v2900_v59 = vmax.f32 %v4986_v12, 0.0  ;;  %v1714_v5 = vpop.f32.mrb[30].mxu0  ;;  %2680 = vmatprep.mubr.f32.mxu1 %v9192_v52 }
 0x27e   :  { %v4988_v4 = vadd.f32 %v1714_v5, %v944_v54  ;;  %v1716_v23 = vpop.f32.mrb[31].mxu0  ;;  %4914 = vmatpush1.bf16.msra.mxu0 %v4913_v51 }
 0x27f   :  { %v4990_v37 = vadd.f32 %v1716_v23, %v946_v53  ;;  %4307 = vmatprep.mubr.msk.f32.mxu0 %vm3156_vm14, %v2900_v59  ;;  %4915 = vmatprep.subr.bf16.mxu0 %v9190_v42  ;;  %v3043_v53 = vld [vmem:[#allocation2 + $0x240] sm:$0xff]  ;;  %v3416_v59 = vld [vmem:[#allocation5 + $0x1e8] sm:$0xff] }
 0x280   :  { %4308 = vmatmul.mubr.msk.f32.gmra.mrb[92].mxu0 %vm3155_vm15, %v2899_v13  ;;  %4251 = vmatmul.mubr.msk.f32.gmra.mrb[74].mxu1 %vm690_vm0, %v5848_v6  ;;  %v2903_v30 = vmax.f32 %v4988_v4, 0.0  ;;  %v5851_v4 = vld [vmem:[%s9165_s0 + $0x1f0] sm:$0xff]  ;;  %vm3171_vm8 = vcmp.ge.f32.partialorder %v3043_v53, 0.2  ;;  %v3048_v23 = vld [vmem:[#allocation2 + $0x268] sm:$0xff]  ;;  %v4922_v17 = vpack.c.bf16 %v3416_v59, %v3415_v50 }
 0x281   :  { %v2904_v14 = vmax.f32 %v4990_v37, 0.0  ;;  %v1720_v31 = vpop.f32.mrb[32].mxu0  ;;  %2686 = vmatprep.mubr.f32.mxu1 %v9192_v52  ;;  %v3047_v37 = vld [vmem:[#allocation2 + $0x260] sm:$0xff]  ;;  %vm3176_vm9 = vcmp.ge.f32.partialorder %v3048_v23, 0.2  ;;  %v5852_v6 = vld [vmem:[%s9165_s0 + $0x228] sm:$0xff] }
 0x282   :  { %v4992_v62 = vadd.f32 %v1720_v31, %v950_v45  ;;  %v1722_v21 = vpop.f32.mrb[33].mxu0  ;;  %4917 = vmatpush1.bf16.msra.mxu0 %v4916_v61  ;;  %v974_v45 = vadd.f32 %v8126_v7, %v8643_v35  ;;  %vm3175_vm10 = vcmp.ge.f32.partialorder %v3047_v37, 0.2  ;;  %v3051_v7 = vld [vmem:[#allocation2 + $0x280] sm:$0xff]  ;;  %v9210_v50 = vld [vmem:[#allocation13_spill] sm:$0xff] }
 0x283   :  { %v4994_v25 = vadd.f32 %v1722_v21, %v952_v22  ;;  %4309 = vmatprep.mubr.msk.f32.mxu0 %vm3160_vm1, %v2904_v14  ;;  %4918 = vmatprep.subr.bf16.mxu0 %v9190_v42  ;;  %v976_v22 = vadd.f32 %v8135_v41, %v8645_v19  ;;  %v980_v21 = vadd.f32 %v8154_v44, %v8643_v35  ;;  %vm3179_vm12 = vcmp.ge.f32.partialorder %v3051_v7, 0.2  ;;  %v3055_v44 = vld [vmem:[#allocation2 + $0x2a0] sm:$0xff] }
 0x284   :  { %4310 = vmatmul.mubr.msk.f32.gmra.mrb[94].mxu0 %vm3159_vm2, %v2903_v30  ;;  %4252 = vmatmul.mubr.msk.f32.gmra.mrb[76].mxu1 %vm690_vm0, %v5849_v10  ;;  %v2907_v3 = vmax.f32 %v4992_v62, 0.0  ;;  %v988_v10 = vadd.f32 %v8191_v32, %v8645_v19  ;;  %vm3183_vm14 = vcmp.ge.f32.partialorder %v3055_v44, 0.2  ;;  %v9208_v32 = vld [vmem:[#allocation11_spill] sm:$0xff]  ;;  %vm3187_vm1 = vcmp.ge.f32.partialorder %v3059_v27, 0.2 }
 0x285   :  { %v2908_v36 = vmax.f32 %v4994_v25, 0.0  ;;  %v1726_v49 = vpop.f32.mrb[34].mxu0  ;;  %2692 = vmatprep.mubr.f32.mxu1 %v9192_v52  ;;  %v5853_v25 = vld [vmem:[%s9165_s0 + $0x260] sm:$0xff]  ;;  %v998_v59 = vadd.f32 %v9210_v50, %v8643_v35  ;;  %vm3192_vm2 = vcmp.ge.f32.partialorder %v3064_v33, 0.2  ;;  %v3080_v27 = vld [vmem:[#allocation2 + $0x368] sm:$0xff] }
 0x286   :  { %v4996_v56 = vadd.f32 %v1726_v49, %v956_v18  ;;  %v1728_v8 = vpop.f32.mrb[35].mxu0  ;;  %4920 = vmatpush1.bf16.msra.mxu0 %v4919_v1  ;;  %v9212_v37 = vld [vmem:[#allocation15_spill] sm:$0xff] }
 0x287   :  { %v4998_v15 = vadd.f32 %v1728_v8, %v958_v34  ;;  %4311 = vmatprep.mubr.msk.f32.mxu0 %vm3164_vm3, %v2908_v36  ;;  %4921 = vmatprep.subr.bf16.mxu0 %v9190_v42  ;;  %v3071_v7 = vld [vmem:[#allocation2 + $0x320] sm:$0xff] }
 0x288   :  { %4312 = vmatmul.mubr.msk.f32.gmra.mrb[96].mxu0 %vm3163_vm4, %v2907_v3  ;;  %4253 = vmatmul.mubr.msk.f32.gmra.mrb[78].mxu1 %vm690_vm0, %v5850_v11  ;;  %v2911_v12 = vmax.f32 %v4996_v56, 0.0  ;;  %v5854_v3 = vld [vmem:[%s9165_s0 + $0x298] sm:$0xff]  ;;  %v3060_v56 = vld [vmem:[#allocation2 + $0x2c8] sm:$0xff]  ;;  %v5855_v11 = vld [vmem:[%s9165_s0 + $0x2d0] sm:$0xff] }
 0x289   :  { %v2912_v48 = vmax.f32 %v4998_v15, 0.0  ;;  %v1732_v20 = vpop.f32.mrb[36].mxu0  ;;  %2698 = vmatprep.mubr.f32.mxu1 %v9192_v52  ;;  %v992_v15 = vadd.f32 %v9208_v32, %v8643_v35  ;;  %vm3188_vm15 = vcmp.ge.f32.partialorder %v3060_v56, 0.2 }
 0x28a   :  { %v5000_v54 = vadd.f32 %v1732_v20, %v962_v24  ;;  %v1734_v58 = vpop.f32.mrb[37].mxu0  ;;  %4923 = vmatpush1.bf16.msra.mxu0 %v4922_v17  ;;  %v9209_v24 = vld [vmem:[#allocation12_spill] sm:$0xff] }
 0x28b   :  { %v5002_v5 = vadd.f32 %v1734_v58, %v964_v38  ;;  %4313 = vmatprep.mubr.msk.f32.mxu0 %vm3168_vm5, %v2912_v48  ;;  %4924 = vmatprep.subr.bf16.mxu0 %v9190_v42  ;;  %v3056_v42 = vld [vmem:[#allocation2 + $0x2a8] sm:$0xff]  ;;  %v994_v38 = vadd.f32 %v9209_v24, %v8645_v19  ;;  %v3063_v58 = vld [vmem:[#allocation2 + $0x2e0] sm:$0xff] }
 0x28c   :  { %4314 = vmatmul.mubr.msk.f32.gmra.mrb[98].mxu0 %vm3167_vm6, %v2911_v12  ;;  %4254 = vmatmul.mubr.msk.f32.gmra.mrb[80].mxu1 %vm690_vm0, %v5851_v4  ;;  %v2915_v55 = vmax.f32 %v5000_v54, 0.0  ;;  %vm3184_vm13 = vcmp.ge.f32.partialorder %v3056_v42, 0.2  ;;  %vm3191_vm3 = vcmp.ge.f32.partialorder %v3063_v58, 0.2  ;;  %v3068_v4 = vld [vmem:[#allocation2 + $0x308] sm:$0xff] }
 0x28d   :  { %v2916_v63 = vmax.f32 %v5002_v5, 0.0  ;;  %v1738_v13 = vpop.f32.mrb[38].mxu0  ;;  %2704 = vmatprep.mubr.f32.mxu1 %v9192_v52  ;;  %v9211_v5 = vld [vmem:[#allocation14_spill] sm:$0xff]  ;;  %vm3196_vm4 = vcmp.ge.f32.partialorder %v3068_v4, 0.2  ;;  %v3079_v24 = vld [vmem:[#allocation2 + $0x360] sm:$0xff] }
 0x28e   :  { %v5004_v46 = vadd.f32 %v1738_v13, %v968_v0  ;;  %v1740_v16 = vpop.f32.mrb[39].mxu0  ;;  %v1000_v0 = vadd.f32 %v9211_v5, %v8645_v19  ;;  %v5856_v13 = vld [vmem:[%s9165_s0 + $0x308] sm:$0xff]  ;;  %vm3200_vm6 = vcmp.ge.f32.partialorder %v3072_v39, 0.2  ;;  %v3083_v5 = vld [vmem:[#allocation2 + $0x380] sm:$0xff] }
 0x28f   :  { %v5006_v47 = vadd.f32 %v1740_v16, %v970_v2  ;;  %4315 = vmatprep.mubr.msk.f32.mxu0 %vm3172_vm7, %v2916_v63  ;;  %vm3199_vm7 = vcmp.ge.f32.partialorder %v3071_v7, 0.2  ;;  %v3084_v58 = vld [vmem:[#allocation2 + $0x388] sm:$0xff] }
 0x290   :  { %4316 = vmatmul.mubr.msk.f32.gmra.mrb[100].mxu0 %vm3171_vm8, %v2915_v55  ;;  %4255 = vmatmul.mubr.msk.f32.gmra.mrb[82].mxu1 %vm690_vm0, %v5852_v6  ;;  %v2919_v51 = vmax.f32 %v5004_v46, 0.0  ;;  %v3067_v46 = vld [vmem:[#allocation2 + $0x300] sm:$0xff]  ;;  %v3092_v7 = vld [vmem:[#allocation2 + $0x3c8] sm:$0xff] }
 0x291   :  { %v2920_v14 = vmax.f32 %v5006_v47, 0.0  ;;  %v1744_v31 = vpop.f32.mrb[40].mxu0  ;;  %2710 = vmatprep.mubr.f32.mxu1 %v9192_v52  ;;  %v1004_v47 = vadd.f32 %v9212_v37, %v8643_v35  ;;  %v5857_v6 = vld [vmem:[%s9165_s0 + $0x340] sm:$0xff]  ;;  %vm3195_vm5 = vcmp.ge.f32.partialorder %v3067_v46, 0.2  ;;  %v3088_v46 = vld [vmem:[#allocation2 + $0x3a8] sm:$0xff] }
 0x292   :  { %v5008_v30 = vadd.f32 %v1744_v31, %v974_v45  ;;  %v1746_v62 = vpop.f32.mrb[41].mxu0  ;;  %v9213_v45 = vld [vmem:[#allocation16_spill] sm:$0xff] }
 0x293   :  { %v5010_v41 = vadd.f32 %v1746_v62, %v976_v22  ;;  %4317 = vmatprep.mubr.msk.f32.mxu0 %vm3176_vm9, %v2920_v14  ;;  %v1006_v22 = vadd.f32 %v9213_v45, %v8645_v19  ;;  %v3087_v45 = vld [vmem:[#allocation2 + $0x3a0] sm:$0xff] }
 0x294   :  { %4318 = vmatmul.mubr.msk.f32.gmra.mrb[102].mxu0 %vm3175_vm10, %v2919_v51  ;;  %4256 = vmatmul.mubr.msk.f32.gmra.mrb[84].mxu1 %vm690_vm0, %v5853_v25  ;;  %v2923_v18 = vmax.f32 %v5008_v30, 0.0  ;;  %vm3208_vm10 = vcmp.ge.f32.partialorder %v3080_v27, 0.2 }
 0x295   :  { %v2924_v43 = vmax.f32 %v5010_v41, 0.0  ;;  %v1750_v29 = vpop.f32.mrb[42].mxu0  ;;  %2716 = vmatprep.mubr.f32.mxu1 %v9192_v52 }
 0x296   :  { %v5012_v34 = vadd.f32 %v1750_v29, %v980_v21  ;;  %v1752_v36 = vpop.f32.mrb[43].mxu0  ;;  %v9214_v21 = vld [vmem:[#allocation17_spill] sm:$0xff] }
 0x297   :  { %v5014_v49 = vadd.f32 %v1752_v36, %v982_v26  ;;  %4319 = vmatprep.mubr.msk.f32.mxu0 %vm3180_vm11, %v2924_v43  ;;  %v1010_v26 = vadd.f32 %v9214_v21, %v8643_v35  ;;  %v9215_v43 = vld [vmem:[#allocation18_spill] sm:$0xff]  ;;  %vm3207_vm11 = vcmp.ge.f32.partialorder %v3079_v24, 0.2  ;;  %v5868_v24 = vld [vmem:[%s9165_s0 + $0x5a8] sm:$0xff] }
 0x298   :  { %4320 = vmatmul.mubr.msk.f32.gmra.mrb[104].mxu0 %vm3179_vm12, %v2923_v18  ;;  %4257 = vmatmul.mubr.msk.f32.gmra.mrb[86].mxu1 %vm690_vm0, %v5854_v3  ;;  %v2927_v8 = vmax.f32 %v5012_v34, 0.0  ;;  %v1012_v29 = vadd.f32 %v9215_v43, %v8645_v19  ;;  %v5858_v18 = vld [vmem:[%s9165_s0 + $0x378] sm:$0xff]  ;;  %v3076_v34 = vld [vmem:[#allocation2 + $0x348] sm:$0xff]  ;;  %vm3212_vm12 = vcmp.ge.f32.partialorder %v3084_v58, 0.2  ;;  %v3091_v43 = vld [vmem:[#allocation2 + $0x3c0] sm:$0xff] }
 0x299   :  { %v2928_v28 = vmax.f32 %v5014_v49, 0.0  ;;  %v1756_v61 = vpop.f32.mrb[44].mxu0  ;;  %2722 = vmatprep.mubr.f32.mxu1 %v9192_v52  ;;  %vm3204_vm8 = vcmp.ge.f32.partialorder %v3076_v34, 0.2  ;;  %v9217_v3 = vld [vmem:[#allocation20_spill] sm:$0xff] }
 0x29a   :  { %v5016_v57 = vadd.f32 %v1756_v61, %v986_v40  ;;  %v1758_v60 = vpop.f32.mrb[45].mxu0  ;;  %v3075_v40 = vld [vmem:[#allocation2 + $0x340] sm:$0xff]  ;;  %v1018_v56 = vadd.f32 %v9217_v3, %v8645_v19 }
 0x29b   :  { %v5018_v9 = vadd.f32 %v1758_v60, %v988_v10  ;;  %4321 = vmatprep.mubr.msk.f32.mxu0 %vm3184_vm13, %v2928_v28  ;;  %v9216_v28 = vld [vmem:[#allocation19_spill] sm:$0xff]  ;;  %v5859_v60 = vld [vmem:[%s9165_s0 + $0x3b0] sm:$0xff]  ;;  %vm3203_vm9 = vcmp.ge.f32.partialorder %v3075_v40, 0.2  ;;  %vm3211_vm13 = vcmp.ge.f32.partialorder %v3083_v5, 0.2 }
 0x29c   :  { %4322 = vmatmul.mubr.msk.f32.gmra.mrb[106].mxu0 %vm3183_vm14, %v2927_v8  ;;  %4258 = vmatmul.mubr.msk.f32.gmra.mrb[88].mxu1 %vm690_vm0, %v5855_v11  ;;  %v2931_v1 = vmax.f32 %v5016_v57, 0.0  ;;  %v1016_v61 = vadd.f32 %v9216_v28, %v8643_v35  ;;  %v9219_v11 = vld [vmem:[#allocation22_spill] sm:$0xff]  ;;  %vm3216_vm14 = vcmp.ge.f32.partialorder %v3088_v46, 0.2  ;;  %v3096_v40 = vld [vmem:[#allocation2 + $0x3e8] sm:$0xff] }
 0x29d   :  { %v2932_v48 = vmax.f32 %v5018_v9, 0.0  ;;  %v1762_v20 = vpop.f32.mrb[46].mxu0  ;;  %2728 = vmatprep.mubr.f32.mxu1 %v9192_v52  ;;  %v1024_v33 = vadd.f32 %v9219_v11, %v8645_v19  ;;  %v5872_v11 = vld [vmem:[%s9165_s0 + $0x688] sm:$0xff] }
 0x29e   :  { %v5020_v12 = vadd.f32 %v1762_v20, %v992_v15  ;;  %v1764_v54 = vpop.f32.mrb[47].mxu0 }
 0x29f   :  { %v5022_v53 = vadd.f32 %v1764_v54, %v994_v38  ;;  %4323 = vmatprep.mubr.msk.f32.mxu0 %vm3188_vm15, %v2932_v48  ;;  %v9218_v48 = vld [vmem:[#allocation21_spill] sm:$0xff]  ;;  %v5860_v54 = vld [vmem:[%s9165_s0 + $0x3e8] sm:$0xff]  ;;  %vm3215_vm15 = vcmp.ge.f32.partialorder %v3087_v45, 0.2 }
 0x2a0   :  { %4324 = vmatmul.mubr.msk.f32.gmra.mrb[108].mxu0 %vm3187_vm1, %v2931_v1  ;;  %4259 = vmatmul.mubr.msk.f32.gmra.mrb[90].mxu1 %vm690_vm0, %v5856_v13  ;;  %v2935_v23 = vmax.f32 %v5020_v12, 0.0  ;;  %v1022_v20 = vadd.f32 %v9218_v48, %v8643_v35  ;;  %v9221_v13 = vld [vmem:[#allocation24_spill] sm:$0xff]  ;;  %vm3220_vm1 = vcmp.ge.f32.partialorder %v3092_v7, 0.2  ;;  %v5870_v48 = vld [vmem:[%s9165_s0 + $0x618] sm:$0xff] }
 0x2a1   :  { %v2936_v2 = vmax.f32 %v5022_v53, 0.0  ;;  %v1768_v63 = vpop.f32.mrb[48].mxu0  ;;  %2734 = vmatprep.mubr.f32.mxu1 %v9192_v52  ;;  %v1030_v4 = vadd.f32 %v9221_v13, %v8645_v19 }
 0x2a2   :  { %v5024_v17 = vadd.f32 %v1768_v63, %v998_v59  ;;  %v1770_v55 = vpop.f32.mrb[49].mxu0 }
 0x2a3   :  { %v5026_v16 = vadd.f32 %v1770_v55, %v1000_v0  ;;  %4325 = vmatprep.mubr.msk.f32.mxu0 %vm3192_vm2, %v2936_v2  ;;  %v9220_v2 = vld [vmem:[#allocation23_spill] sm:$0xff]  ;;  %vm3219_vm2 = vcmp.ge.f32.partialorder %v3091_v43, 0.2 }
 0x2a4   :  { %4326 = vmatmul.mubr.msk.f32.gmra.mrb[110].mxu0 %vm3191_vm3, %v2935_v23  ;;  %4260 = vmatmul.mubr.msk.f32.gmra.mrb[92].mxu1 %vm690_vm0, %v5857_v6  ;;  %v2939_v51 = vmax.f32 %v5024_v17, 0.0  ;;  %v1028_v63 = vadd.f32 %v9220_v2, %v8643_v35  ;;  %v5861_v55 = vld [vmem:[%s9165_s0 + $0x420] sm:$0xff]  ;;  %v9223_v6 = vld [vmem:[#allocation26_spill] sm:$0xff]  ;;  %vm3224_vm3 = vcmp.ge.f32.partialorder %v3096_v40, 0.2  ;;  %v2989_v40 = vld [vmem:[#allocation2 + $0x90] sm:$0xff] }
 0x2a5   :  { %v2940_v14 = vmax.f32 %v5026_v16, 0.0  ;;  %v1774_v31 = vpop.f32.mrb[50].mxu0  ;;  %2740 = vmatprep.mubr.f32.mxu1 %v9192_v52  ;;  %v1036_v39 = vadd.f32 %v9223_v6, %v8645_v19 }
 0x2a6   :  { %v5028_v30 = vadd.f32 %v1774_v31, %v1004_v47  ;;  %v1776_v62 = vpop.f32.mrb[51].mxu0 }
 0x2a7   :  { %v5030_v41 = vadd.f32 %v1776_v62, %v1006_v22  ;;  %4327 = vmatprep.mubr.msk.f32.mxu0 %vm3196_vm4, %v2940_v14  ;;  %v9222_v14 = vld [vmem:[#allocation25_spill] sm:$0xff]  ;;  %v5862_v62 = vld [vmem:[%s9165_s0 + $0x458] sm:$0xff] }
 0x2a8   :  { %4328 = vmatmul.mubr.msk.f32.gmra.mrb[112].mxu0 %vm3195_vm5, %v2939_v51  ;;  %4261 = vmatmul.mubr.msk.f32.gmra.mrb[94].mxu1 %vm690_vm0, %v5858_v18  ;;  %v2943_v36 = vmax.f32 %v5028_v30, 0.0  ;;  %v1034_v31 = vadd.f32 %v9222_v14, %v8643_v35  ;;  %v9225_v18 = vld [vmem:[#allocation28_spill] sm:$0xff]  ;;  %v2982_v14 = vld [vmem:[#allocation2 + $0x58] sm:$0xff] }
 0x2a9   :  { %v2944_v25 = vmax.f32 %v5030_v41, 0.0  ;;  %v1780_v42 = vpop.f32.mrb[52].mxu0  ;;  %2746 = vmatprep.mubr.f32.mxu1 %v9192_v52  ;;  %v1042_v34 = vadd.f32 %v9225_v18, %v8645_v19 }
 0x2aa   :  { %v5032_v44 = vadd.f32 %v1780_v42, %v1010_v26  ;;  %v1782_v49 = vpop.f32.mrb[53].mxu0 }
 0x2ab   :  { %v5034_v10 = vadd.f32 %v1782_v49, %v1012_v29  ;;  %4329 = vmatprep.mubr.msk.f32.mxu0 %vm3200_vm6, %v2944_v25  ;;  %v9224_v25 = vld [vmem:[#allocation27_spill] sm:$0xff]  ;;  %v5863_v49 = vld [vmem:[%s9165_s0 + $0x490] sm:$0xff] }
 0x2ac   :  { %4330 = vmatmul.mubr.msk.f32.gmra.mrb[114].mxu0 %vm3199_vm7, %v2943_v36  ;;  %4262 = vmatmul.mubr.msk.f32.gmra.mrb[96].mxu1 %vm690_vm0, %v5859_v60  ;;  %v2947_v9 = vmax.f32 %v5032_v44, 0.0  ;;  %v1040_v42 = vadd.f32 %v9224_v25, %v8643_v35  ;;  %v3095_v35 = vld [vmem:[#allocation2 + $0x3e0] sm:$0xff]  ;;  %v3418_v60 = vld [vmem:[#allocation5 + $0x1f8] sm:$0xff] }
 0x2ad   :  { %v2948_v8 = vmax.f32 %v5034_v10, 0.0  ;;  %v1786_v57 = vpop.f32.mrb[54].mxu0  ;;  %2752 = vmatprep.mubr.f32.mxu1 %v9192_v52  ;;  %vm3223_vm4 = vcmp.ge.f32.partialorder %v3095_v35, 0.2  ;;  %v2994_v35 = vld [vmem:[#allocation2 + $0xb8] sm:$0xff] }
 0x2ae   :  { %v5036_v32 = vadd.f32 %v1786_v57, %v1016_v61  ;;  %v1788_v15 = vpop.f32.mrb[55].mxu0  ;;  %v3417_v57 = vld [vmem:[#allocation5 + $0x1f0] sm:$0xff] }
 0x2af   :  { %v5038_v38 = vadd.f32 %v1788_v15, %v1018_v56  ;;  %4331 = vmatprep.mubr.msk.f32.mxu0 %vm3204_vm8, %v2948_v8  ;;  %v5864_v56 = vld [vmem:[%s9165_s0 + $0x4c8] sm:$0xff]  ;;  %v4925_v27 = vpack.c.bf16 %v3418_v60, %v3417_v57  ;;  %v5867_v15 = vld [vmem:[%s9165_s0 + $0x570] sm:$0xff]  ;;  %vm3110_vm8 = vcmp.ge.f32.partialorder %v2982_v14, 0.2 }
 0x2b0   :  { %4332 = vmatmul.mubr.msk.f32.gmra.mrb[116].mxu0 %vm3203_vm9, %v2947_v9  ;;  %4263 = vmatmul.mubr.msk.f32.gmra.mrb[98].mxu1 %vm690_vm0, %v5860_v54  ;;  %v2951_v53 = vmax.f32 %v5036_v32, 0.0  ;;  %v5865_v9 = vld [vmem:[%s9165_s0 + $0x500] sm:$0xff]  ;;  %v5866_v32 = vld [vmem:[%s9165_s0 + $0x538] sm:$0xff] }
 0x2b1   :  { %v2952_v1 = vmax.f32 %v5038_v38, 0.0  ;;  %v1792_v12 = vpop.f32.mrb[56].mxu0  ;;  %2758 = vmatprep.mubr.f32.mxu1 %v9192_v52  ;;  %4926 = vmatpush1.bf16.msra.mxu0 %v4925_v27  ;;  %v5869_v38 = vld [vmem:[%s9165_s0 + $0x5e0] sm:$0xff] }
 0x2b2   :  { %v5040_v50 = vadd.f32 %v1792_v12, %v1022_v20  ;;  %v1794_v59 = vpop.f32.mrb[57].mxu0  ;;  %v5871_v20 = vld [vmem:[%s9165_s0 + $0x650] sm:$0xff] }
 0x2b3   :  { %v5042_v0 = vadd.f32 %v1794_v59, %v1024_v33  ;;  %4333 = vmatprep.mubr.msk.f32.mxu0 %vm3208_vm10, %v2952_v1  ;;  %v5873_v33 = vld [vmem:[%s9165_s0 + $0x6c0] sm:$0xff]  ;;  %v5874_v1 = vld [vmem:[%s9165_s0 + $0x6f8] sm:$0xff]  ;;  %v9226_v12 = vld [vmem:[#allocation29_spill] sm:$0xff] }
 0x2b4   :  { %4334 = vmatmul.mubr.msk.f32.gmra.mrb[118].mxu0 %vm3207_vm11, %v2951_v53  ;;  %4264 = vmatmul.mubr.msk.f32.gmra.mrb[100].mxu1 %vm690_vm0, %v5861_v55  ;;  %v2955_v16 = vmax.f32 %v5040_v50, 0.0  ;;  %v680_v54 = vsub.s32 2, %v9226_v12  ;;  %v684_v58 = vsub.s32 3, %v9226_v12  ;;  %v5875_v53 = vld [vmem:[%s9168_s3] sm:$0xf] }
 0x2b5   :  { %v2956_v23 = vmax.f32 %v5042_v0, 0.0  ;;  %v1798_v17 = vpop.f32.mrb[58].mxu0  ;;  %2764 = vmatprep.mubr.f32.mxu1 %v9192_v52 }
 0x2b6   :  { %v5044_v37 = vadd.f32 %v1798_v17, %v1028_v63  ;;  %v1800_v47 = vpop.f32.mrb[59].mxu0  ;;  %v9045_v50 = vrot.slane %v5875_v53, %v680_v54  ;;  %v9047_v59 = vrot.slane %v5875_v53, %v684_v58  ;;  %v2973_v63 = vld [vmem:[#allocation2 + $0x10] sm:$0xff]  ;;  %v2978_v17 = vld [vmem:[#allocation2 + $0x38] sm:$0xff] }
 0x2b7   :  { %v5046_v22 = vadd.f32 %v1800_v47, %v1030_v4  ;;  %4335 = vmatprep.mubr.msk.f32.mxu0 %vm3212_vm12, %v2956_v23  ;;  %vm3101_vm5 = vcmp.ge.f32.partialorder %v2973_v63, 0.2  ;;  %vm3106_vm6 = vcmp.ge.f32.partialorder %v2978_v17, 0.2  ;;  %v3001_v58 = vld [vmem:[#allocation2 + $0xf0] sm:$0xff] }
 0x2b8   :  { %4336 = vmatmul.mubr.msk.f32.gmra.mrb[120].mxu0 %vm3211_vm13, %v2955_v16  ;;  %4265 = vmatmul.mubr.msk.f32.gmra.mrb[102].mxu1 %vm690_vm0, %v5862_v62  ;;  %v2959_v41 = vmax.f32 %v5044_v37, 0.0  ;;  %v2977_v37 = vld [vmem:[#allocation2 + $0x30] sm:$0xff]  ;;  %vm3117_vm13 = vcmp.ge.f32.partialorder %v2989_v40, 0.2 }
 0x2b9   :  { %v2960_v51 = vmax.f32 %v5046_v22, 0.0  ;;  %v1804_v30 = vpop.f32.mrb[60].mxu0  ;;  %2770 = vmatprep.mubr.f32.mxu1 %v9192_v52  ;;  %vm3105_vm7 = vcmp.ge.f32.partialorder %v2977_v37, 0.2 }
 0x2ba   :  { %v5048_v21 = vadd.f32 %v1804_v30, %v1034_v31  ;;  %v1806_v26 = vpop.f32.mrb[61].mxu0 }
 0x2bb   :  { %v5050_v29 = vadd.f32 %v1806_v26, %v1036_v39  ;;  %4337 = vmatprep.mubr.msk.f32.mxu0 %vm3216_vm14, %v2960_v51  ;;  %v2981_v51 = vld [vmem:[#allocation2 + $0x50] sm:$0xff]  ;;  %vm3122_vm14 = vcmp.ge.f32.partialorder %v2994_v35, 0.2 }
 0x2bc   :  { %4338 = vmatmul.mubr.msk.f32.gmra.mrb[122].mxu0 %vm3215_vm15, %v2959_v41  ;;  %4266 = vmatmul.mubr.msk.f32.gmra.mrb[104].mxu1 %vm690_vm0, %v5863_v49  ;;  %v2963_v10 = vmax.f32 %v5048_v21, 0.0  ;;  %vm3109_vm9 = vcmp.ge.f32.partialorder %v2981_v51, 0.2  ;;  %v2986_v41 = vld [vmem:[#allocation2 + $0x78] sm:$0xff] }
 0x2bd   :  { %v2964_v36 = vmax.f32 %v5050_v29, 0.0  ;;  %v1810_v44 = vpop.f32.mrb[62].mxu0  ;;  %2776 = vmatprep.mubr.f32.mxu1 %v9192_v52  ;;  %v2985_v29 = vld [vmem:[#allocation2 + $0x70] sm:$0xff]  ;;  %vm3114_vm10 = vcmp.ge.f32.partialorder %v2986_v41, 0.2 }
 0x2be   :  { %v5052_v28 = vadd.f32 %v1810_v44, %v1040_v42  ;;  %v1812_v61 = vpop.f32.mrb[63].mxu0  ;;  %vm3113_vm11 = vcmp.ge.f32.partialorder %v2985_v29, 0.2 }
 0x2bf   :  { %v5054_v3 = vadd.f32 %v1812_v61, %v1042_v34  ;;  %4339 = vmatprep.mubr.msk.f32.mxu0 %vm3220_vm1, %v2964_v36  ;;  %v2990_v34 = vld [vmem:[#allocation2 + $0x98] sm:$0xff] }
 0x2c0   :  { %4340 = vmatmul.mubr.msk.f32.gmra.mrb[124].mxu0 %vm3219_vm2, %v2963_v10  ;;  %4267 = vmatmul.mubr.msk.f32.gmra.mrb[106].mxu1 %vm690_vm0, %v5864_v56  ;;  %v2967_v8 = vmax.f32 %v5052_v28, 0.0  ;;  %vm3118_vm12 = vcmp.ge.f32.partialorder %v2990_v34, 0.2 }
 0x2c1   :  { %v2968_v19 = vmax.f32 %v5054_v3, 0.0  ;;  %2782 = vmatprep.mubr.f32.mxu1 %v9192_v52 }
 0x2c3   :  { %4341 = vmatprep.mubr.msk.f32.mxu0 %vm3224_vm3, %v2968_v19 }
 0x2c4   :  { %4342 = vmatmul.mubr.msk.f32.gmra.mrb[126].mxu0 %vm3223_vm4, %v2967_v8  ;;  %4268 = vmatmul.mubr.msk.f32.gmra.mrb[108].mxu1 %vm690_vm0, %v5865_v9  ;;  %v2993_v8 = vld [vmem:[#allocation2 + $0xb0] sm:$0xff]  ;;  %v2998_v9 = vld [vmem:[#allocation2 + $0xd8] sm:$0xff]  ;;  %vm3129_vm4 = vcmp.ge.f32.partialorder %v3001_v58, 0.2 }
 0x2c5   :  { %2788 = vmatprep.mubr.f32.mxu1 %v9192_v52  ;;  %vm3121_vm15 = vcmp.ge.f32.partialorder %v2993_v8, 0.2  ;;  %vm3126_vm1 = vcmp.ge.f32.partialorder %v2998_v9, 0.2 }
 0x2c8   :  { %4269 = vmatmul.mubr.msk.f32.gmra.mrb[110].mxu1 %vm690_vm0, %v5866_v32 }
 0x2c9   :  { %2794 = vmatprep.mubr.f32.mxu1 %v9192_v52 }
 0x2cc   :  { %4270 = vmatmul.mubr.msk.f32.gmra.mrb[112].mxu1 %vm690_vm0, %v5867_v15 }
 0x2cd   :  { %2800 = vmatprep.mubr.f32.mxu1 %v9192_v52 }
 0x2d0   :  { %4271 = vmatmul.mubr.msk.f32.gmra.mrb[114].mxu1 %vm690_vm0, %v5868_v24 }
 0x2d1   :  { %2806 = vmatprep.mubr.f32.mxu1 %v9192_v52 }
 0x2d4   :  { %4272 = vmatmul.mubr.msk.f32.gmra.mrb[116].mxu1 %vm690_vm0, %v5869_v38  ;;  %v2997_v38 = vld [vmem:[#allocation2 + $0xd0] sm:$0xff] }
 0x2d5   :  { %2812 = vmatprep.mubr.f32.mxu1 %v9192_v52  ;;  %vm3125_vm2 = vcmp.ge.f32.partialorder %v2997_v38, 0.2 }
 0x2d8   :  { %4273 = vmatmul.mubr.msk.f32.gmra.mrb[118].mxu1 %vm690_vm0, %v5870_v48 }
 0x2d9   :  { %2818 = vmatprep.mubr.f32.mxu1 %v9192_v52 }
 0x2dc   :  { %4274 = vmatmul.mubr.msk.f32.gmra.mrb[120].mxu1 %vm690_vm0, %v5871_v20 }
 0x2dd   :  { %2824 = vmatprep.mubr.f32.mxu1 %v9192_v52 }
 0x2e0   :  { %4275 = vmatmul.mubr.msk.f32.gmra.mrb[122].mxu1 %vm690_vm0, %v5872_v11 }
 0x2e1   :  { %2830 = vmatprep.mubr.f32.mxu1 %v9192_v52 }
 0x2e4   :  { %4276 = vmatmul.mubr.msk.f32.gmra.mrb[124].mxu1 %vm690_vm0, %v5873_v33  ;;  %v3002_v33 = vld [vmem:[#allocation2 + $0xf8] sm:$0xff] }
 0x2e5   :  { %2836 = vmatprep.mubr.f32.mxu1 %v9192_v52  ;;  %v2974_v52 = vld [vmem:[#allocation2 + $0x18] sm:$0xff]  ;;  %vm3130_vm3 = vcmp.ge.f32.partialorder %v3002_v33, 0.2 }
 0x2e8   :  { %4277 = vmatmul.mubr.msk.f32.gmra.mrb[126].mxu1 %vm690_vm0, %v5874_v1  ;;  %vm3102_vm0 = vcmp.ge.f32.partialorder %v2974_v52, 0.2 }
 0x33f   :  { %v2652_v5 = vpop.f32.mrb[64].mxu1 }
 0x340   :  { %v5055_v0 = vadd.f32 %v2652_v5, %v9045_v50  ;;  %v2654_v2 = vpop.f32.mrb[65].mxu1 }
 0x341   :  { %v5056_v13 = vadd.f32 %v2654_v2, %v9047_v59 }
 0x342   :  { %v2845_v55 = vmax.f32 %v5055_v0, 0.0  ;;  %v3006_v0 = vld [vmem:[#allocation2 + $0x118] sm:$0xff] }
 0x343   :  { %v2846_v4 = vmax.f32 %v5056_v13, 0.0  ;;  %v2658_v23 = vpop.f32.mrb[66].mxu1 }
 0x344   :  { %v5057_v46 = vadd.f32 %v2658_v23, %v9045_v50  ;;  %v2660_v16 = vpop.f32.mrb[67].mxu1 }
 0x345   :  { %v5058_v47 = vadd.f32 %v2660_v16, %v9047_v59  ;;  %4343 = vmatprep.mubr.msk.f32.mxu0 %vm3102_vm0, %v2846_v4  ;;  %v3005_v4 = vld [vmem:[#allocation2 + $0x110] sm:$0xff]  ;;  %vm3134_vm0 = vcmp.ge.f32.partialorder %v3006_v0, 0.2 }
 0x346   :  { %4344 = vmatmul.mubr.msk.f32.vlgmr.msra.gmra.mrb[64].mxu0 %vm3101_vm5, %v2845_v55  ;;  %v2849_v31 = vmax.f32 %v5057_v46, 0.0  ;;  %vm3133_vm5 = vcmp.ge.f32.partialorder %v3005_v4, 0.2  ;;  %v3010_v46 = vld [vmem:[#allocation2 + $0x138] sm:$0xff] }
 0x347   :  { %v2850_v45 = vmax.f32 %v5058_v47, 0.0  ;;  %v2664_v22 = vpop.f32.mrb[68].mxu1 }
 0x348   :  { %v5059_v6 = vadd.f32 %v2664_v22, %v9045_v50  ;;  %v2666_v39 = vpop.f32.mrb[69].mxu1 }
 0x349   :  { %v5060_v30 = vadd.f32 %v2666_v39, %v9047_v59  ;;  %4345 = vmatprep.mubr.msk.f32.mxu0 %vm3106_vm6, %v2850_v45  ;;  %v3009_v45 = vld [vmem:[#allocation2 + $0x130] sm:$0xff]  ;;  %vm3138_vm6 = vcmp.ge.f32.partialorder %v3010_v46, 0.2 }
 0x34a   :  { %4346 = vmatmul.mubr.msk.f32.gmra.mrb[66].mxu0 %vm3105_vm7, %v2849_v31  ;;  %v2853_v21 = vmax.f32 %v5059_v6, 0.0  ;;  %vm3137_vm7 = vcmp.ge.f32.partialorder %v3009_v45, 0.2  ;;  %v3014_v6 = vld [vmem:[#allocation2 + $0x158] sm:$0xff] }
 0x34b   :  { %v2854_v62 = vmax.f32 %v5060_v30, 0.0  ;;  %v2670_v7 = vpop.f32.mrb[70].mxu1 }
 0x34c   :  { %v5061_v26 = vadd.f32 %v2670_v7, %v9045_v50  ;;  %v2672_v43 = vpop.f32.mrb[71].mxu1 }
 0x34d   :  { %v5062_v25 = vadd.f32 %v2672_v43, %v9047_v59  ;;  %4347 = vmatprep.mubr.msk.f32.mxu0 %vm3110_vm8, %v2854_v62  ;;  %v3013_v62 = vld [vmem:[#allocation2 + $0x150] sm:$0xff]  ;;  %vm3142_vm8 = vcmp.ge.f32.partialorder %v3014_v6, 0.2 }
 0x34e   :  { %4348 = vmatmul.mubr.msk.f32.gmra.mrb[68].mxu0 %vm3109_vm9, %v2853_v21  ;;  %v2857_v36 = vmax.f32 %v5061_v26, 0.0  ;;  %vm3141_vm9 = vcmp.ge.f32.partialorder %v3013_v62, 0.2  ;;  %v3018_v26 = vld [vmem:[#allocation2 + $0x178] sm:$0xff] }
 0x34f   :  { %v2858_v42 = vmax.f32 %v5062_v25, 0.0  ;;  %v2676_v18 = vpop.f32.mrb[72].mxu1 }
 0x350   :  { %v5063_v44 = vadd.f32 %v2676_v18, %v9045_v50  ;;  %v2678_v49 = vpop.f32.mrb[73].mxu1 }
 0x351   :  { %v5064_v10 = vadd.f32 %v2678_v49, %v9047_v59  ;;  %4349 = vmatprep.mubr.msk.f32.mxu0 %vm3114_vm10, %v2858_v42  ;;  %v3017_v42 = vld [vmem:[#allocation2 + $0x170] sm:$0xff]  ;;  %vm3146_vm10 = vcmp.ge.f32.partialorder %v3018_v26, 0.2 }
 0x352   :  { %4350 = vmatmul.mubr.msk.f32.gmra.mrb[70].mxu0 %vm3113_vm11, %v2857_v36  ;;  %v2861_v3 = vmax.f32 %v5063_v44, 0.0  ;;  %vm3145_vm11 = vcmp.ge.f32.partialorder %v3017_v42, 0.2  ;;  %v3022_v44 = vld [vmem:[#allocation2 + $0x198] sm:$0xff] }
 0x353   :  { %v2862_v28 = vmax.f32 %v5064_v10, 0.0  ;;  %v2682_v61 = vpop.f32.mrb[74].mxu1 }
 0x354   :  { %v5065_v19 = vadd.f32 %v2682_v61, %v9045_v50  ;;  %v2684_v56 = vpop.f32.mrb[75].mxu1 }
 0x355   :  { %v5066_v57 = vadd.f32 %v2684_v56, %v9047_v59  ;;  %4351 = vmatprep.mubr.msk.f32.mxu0 %vm3118_vm12, %v2862_v28  ;;  %v3021_v28 = vld [vmem:[#allocation2 + $0x190] sm:$0xff]  ;;  %vm3150_vm12 = vcmp.ge.f32.partialorder %v3022_v44, 0.2 }
 0x356   :  { %4352 = vmatmul.mubr.msk.f32.gmra.mrb[72].mxu0 %vm3117_vm13, %v2861_v3  ;;  %v2865_v32 = vmax.f32 %v5065_v19, 0.0  ;;  %vm3149_vm13 = vcmp.ge.f32.partialorder %v3021_v28, 0.2  ;;  %v3026_v19 = vld [vmem:[#allocation2 + $0x1b8] sm:$0xff] }
 0x357   :  { %v2866_v60 = vmax.f32 %v5066_v57, 0.0  ;;  %v2688_v27 = vpop.f32.mrb[76].mxu1 }
 0x358   :  { %v5067_v15 = vadd.f32 %v2688_v27, %v9045_v50  ;;  %v2690_v24 = vpop.f32.mrb[77].mxu1 }
 0x359   :  { %v5068_v48 = vadd.f32 %v2690_v24, %v9047_v59  ;;  %4353 = vmatprep.mubr.msk.f32.mxu0 %vm3122_vm14, %v2866_v60  ;;  %v3025_v60 = vld [vmem:[#allocation2 + $0x1b0] sm:$0xff]  ;;  %vm3154_vm14 = vcmp.ge.f32.partialorder %v3026_v19, 0.2 }
 0x35a   :  { %4354 = vmatmul.mubr.msk.f32.gmra.mrb[74].mxu0 %vm3121_vm15, %v2865_v32  ;;  %v2869_v1 = vmax.f32 %v5067_v15, 0.0  ;;  %vm3153_vm15 = vcmp.ge.f32.partialorder %v3025_v60, 0.2  ;;  %v3030_v15 = vld [vmem:[#allocation2 + $0x1d8] sm:$0xff] }
 0x35b   :  { %v2870_v20 = vmax.f32 %v5068_v48, 0.0  ;;  %v2694_v11 = vpop.f32.mrb[78].mxu1 }
 0x35c   :  { %v5069_v12 = vadd.f32 %v2694_v11, %v9045_v50  ;;  %v2696_v54 = vpop.f32.mrb[79].mxu1 }
 0x35d   :  { %v5070_v53 = vadd.f32 %v2696_v54, %v9047_v59  ;;  %4355 = vmatprep.mubr.msk.f32.mxu0 %vm3126_vm1, %v2870_v20  ;;  %v3029_v20 = vld [vmem:[#allocation2 + $0x1d0] sm:$0xff]  ;;  %vm3158_vm1 = vcmp.ge.f32.partialorder %v3030_v15, 0.2 }
 0x35e   :  { %4356 = vmatmul.mubr.msk.f32.gmra.mrb[76].mxu0 %vm3125_vm2, %v2869_v1  ;;  %v2873_v2 = vmax.f32 %v5069_v12, 0.0  ;;  %vm3157_vm2 = vcmp.ge.f32.partialorder %v3029_v20, 0.2  ;;  %v3034_v12 = vld [vmem:[#allocation2 + $0x1f8] sm:$0xff] }
 0x35f   :  { %v2874_v5 = vmax.f32 %v5070_v53, 0.0  ;;  %v2700_v52 = vpop.f32.mrb[80].mxu1 }
 0x360   :  { %v5071_v63 = vadd.f32 %v2700_v52, %v9045_v50  ;;  %v2702_v13 = vpop.f32.mrb[81].mxu1 }
 0x361   :  { %v5072_v23 = vadd.f32 %v2702_v13, %v9047_v59  ;;  %4357 = vmatprep.mubr.msk.f32.mxu0 %vm3130_vm3, %v2874_v5  ;;  %v3033_v5 = vld [vmem:[#allocation2 + $0x1f0] sm:$0xff]  ;;  %vm3162_vm3 = vcmp.ge.f32.partialorder %v3034_v12, 0.2 }
 0x362   :  { %4358 = vmatmul.mubr.msk.f32.gmra.mrb[78].mxu0 %vm3129_vm4, %v2873_v2  ;;  %v2877_v16 = vmax.f32 %v5071_v63, 0.0  ;;  %vm3161_vm4 = vcmp.ge.f32.partialorder %v3033_v5, 0.2  ;;  %v3038_v63 = vld [vmem:[#allocation2 + $0x218] sm:$0xff] }
 0x363   :  { %v2878_v17 = vmax.f32 %v5072_v23, 0.0  ;;  %v2706_v55 = vpop.f32.mrb[82].mxu1 }
 0x364   :  { %v5073_v37 = vadd.f32 %v2706_v55, %v9045_v50  ;;  %v2708_v47 = vpop.f32.mrb[83].mxu1 }
 0x365   :  { %v5074_v22 = vadd.f32 %v2708_v47, %v9047_v59  ;;  %4359 = vmatprep.mubr.msk.f32.mxu0 %vm3134_vm0, %v2878_v17  ;;  %v3037_v17 = vld [vmem:[#allocation2 + $0x210] sm:$0xff]  ;;  %vm3166_vm0 = vcmp.ge.f32.partialorder %v3038_v63, 0.2 }
 0x366   :  { %4360 = vmatmul.mubr.msk.f32.gmra.mrb[80].mxu0 %vm3133_vm5, %v2877_v16  ;;  %v2881_v39 = vmax.f32 %v5073_v37, 0.0  ;;  %vm3165_vm5 = vcmp.ge.f32.partialorder %v3037_v17, 0.2  ;;  %v3042_v37 = vld [vmem:[#allocation2 + $0x238] sm:$0xff] }
 0x367   :  { %v2882_v14 = vmax.f32 %v5074_v22, 0.0  ;;  %v2712_v31 = vpop.f32.mrb[84].mxu1 }
 0x368   :  { %v5075_v51 = vadd.f32 %v2712_v31, %v9045_v50  ;;  %v2714_v30 = vpop.f32.mrb[85].mxu1 }
 0x369   :  { %v5076_v7 = vadd.f32 %v2714_v30, %v9047_v59  ;;  %4361 = vmatprep.mubr.msk.f32.mxu0 %vm3138_vm6, %v2882_v14  ;;  %v3041_v14 = vld [vmem:[#allocation2 + $0x230] sm:$0xff]  ;;  %vm3170_vm6 = vcmp.ge.f32.partialorder %v3042_v37, 0.2 }
 0x36a   :  { %4362 = vmatmul.mubr.msk.f32.gmra.mrb[82].mxu0 %vm3137_vm7, %v2881_v39  ;;  %v2885_v43 = vmax.f32 %v5075_v51, 0.0  ;;  %vm3169_vm7 = vcmp.ge.f32.partialorder %v3041_v14, 0.2  ;;  %v3046_v51 = vld [vmem:[#allocation2 + $0x258] sm:$0xff] }
 0x36b   :  { %v2886_v41 = vmax.f32 %v5076_v7, 0.0  ;;  %v2718_v21 = vpop.f32.mrb[86].mxu1 }
 0x36c   :  { %v5077_v29 = vadd.f32 %v2718_v21, %v9045_v50  ;;  %v2720_v25 = vpop.f32.mrb[87].mxu1 }
 0x36d   :  { %v5078_v18 = vadd.f32 %v2720_v25, %v9047_v59  ;;  %4363 = vmatprep.mubr.msk.f32.mxu0 %vm3142_vm8, %v2886_v41  ;;  %v3045_v41 = vld [vmem:[#allocation2 + $0x250] sm:$0xff]  ;;  %vm3174_vm8 = vcmp.ge.f32.partialorder %v3046_v51, 0.2 }
 0x36e   :  { %4364 = vmatmul.mubr.msk.f32.gmra.mrb[84].mxu0 %vm3141_vm9, %v2885_v43  ;;  %v2889_v49 = vmax.f32 %v5077_v29, 0.0  ;;  %vm3173_vm9 = vcmp.ge.f32.partialorder %v3045_v41, 0.2  ;;  %v3050_v29 = vld [vmem:[#allocation2 + $0x278] sm:$0xff] }
 0x36f   :  { %v2890_v34 = vmax.f32 %v5078_v18, 0.0  ;;  %v2724_v36 = vpop.f32.mrb[88].mxu1 }
 0x370   :  { %v5079_v40 = vadd.f32 %v2724_v36, %v9045_v50  ;;  %v2726_v10 = vpop.f32.mrb[89].mxu1 }
 0x371   :  { %v5080_v61 = vadd.f32 %v2726_v10, %v9047_v59  ;;  %4365 = vmatprep.mubr.msk.f32.mxu0 %vm3146_vm10, %v2890_v34  ;;  %v3049_v34 = vld [vmem:[#allocation2 + $0x270] sm:$0xff]  ;;  %vm3178_vm10 = vcmp.ge.f32.partialorder %v3050_v29, 0.2 }
 0x372   :  { %4366 = vmatmul.mubr.msk.f32.gmra.mrb[86].mxu0 %vm3145_vm11, %v2889_v49  ;;  %v2893_v56 = vmax.f32 %v5079_v40, 0.0  ;;  %vm3177_vm11 = vcmp.ge.f32.partialorder %v3049_v34, 0.2  ;;  %v3054_v40 = vld [vmem:[#allocation2 + $0x298] sm:$0xff] }
 0x373   :  { %v2894_v35 = vmax.f32 %v5080_v61, 0.0  ;;  %v2730_v3 = vpop.f32.mrb[90].mxu1 }
 0x374   :  { %v5081_v8 = vadd.f32 %v2730_v3, %v9045_v50  ;;  %v2732_v57 = vpop.f32.mrb[91].mxu1 }
 0x375   :  { %v5082_v27 = vadd.f32 %v2732_v57, %v9047_v59  ;;  %4367 = vmatprep.mubr.msk.f32.mxu0 %vm3150_vm12, %v2894_v35  ;;  %v3053_v35 = vld [vmem:[#allocation2 + $0x290] sm:$0xff]  ;;  %vm3182_vm12 = vcmp.ge.f32.partialorder %v3054_v40, 0.2 }
 0x376   :  { %4368 = vmatmul.mubr.msk.f32.gmra.mrb[88].mxu0 %vm3149_vm13, %v2893_v56  ;;  %v2897_v24 = vmax.f32 %v5081_v8, 0.0  ;;  %vm3181_vm13 = vcmp.ge.f32.partialorder %v3053_v35, 0.2  ;;  %v3058_v8 = vld [vmem:[#allocation2 + $0x2b8] sm:$0xff] }
 0x377   :  { %v2898_v9 = vmax.f32 %v5082_v27, 0.0  ;;  %v2736_v32 = vpop.f32.mrb[92].mxu1 }
 0x378   :  { %v5083_v38 = vadd.f32 %v2736_v32, %v9045_v50  ;;  %v2738_v48 = vpop.f32.mrb[93].mxu1 }
 0x379   :  { %v5084_v11 = vadd.f32 %v2738_v48, %v9047_v59  ;;  %4369 = vmatprep.mubr.msk.f32.mxu0 %vm3154_vm14, %v2898_v9  ;;  %v3057_v9 = vld [vmem:[#allocation2 + $0x2b0] sm:$0xff]  ;;  %vm3186_vm14 = vcmp.ge.f32.partialorder %v3058_v8, 0.2 }
 0x37a   :  { %4370 = vmatmul.mubr.msk.f32.gmra.mrb[90].mxu0 %vm3153_vm15, %v2897_v24  ;;  %v2901_v54 = vmax.f32 %v5083_v38, 0.0  ;;  %vm3185_vm15 = vcmp.ge.f32.partialorder %v3057_v9, 0.2  ;;  %v3062_v38 = vld [vmem:[#allocation2 + $0x2d8] sm:$0xff] }
 0x37b   :  { %v2902_v33 = vmax.f32 %v5084_v11, 0.0  ;;  %v2742_v1 = vpop.f32.mrb[94].mxu1 }
 0x37c   :  { %v5085_v58 = vadd.f32 %v2742_v1, %v9045_v50  ;;  %v2744_v53 = vpop.f32.mrb[95].mxu1 }
 0x37d   :  { %v5086_v52 = vadd.f32 %v2744_v53, %v9047_v59  ;;  %4371 = vmatprep.mubr.msk.f32.mxu0 %vm3158_vm1, %v2902_v33  ;;  %v3061_v33 = vld [vmem:[#allocation2 + $0x2d0] sm:$0xff]  ;;  %vm3190_vm1 = vcmp.ge.f32.partialorder %v3062_v38, 0.2 }
 0x37e   :  { %4372 = vmatmul.mubr.msk.f32.gmra.mrb[92].mxu0 %vm3157_vm2, %v2901_v54  ;;  %v2905_v13 = vmax.f32 %v5085_v58, 0.0  ;;  %vm3189_vm2 = vcmp.ge.f32.partialorder %v3061_v33, 0.2  ;;  %v3066_v58 = vld [vmem:[#allocation2 + $0x2f8] sm:$0xff] }
 0x37f   :  { %v2906_v0 = vmax.f32 %v5086_v52, 0.0  ;;  %v2748_v2 = vpop.f32.mrb[96].mxu1 }
 0x380   :  { %v5087_v4 = vadd.f32 %v2748_v2, %v9045_v50  ;;  %v2750_v23 = vpop.f32.mrb[97].mxu1 }
 0x381   :  { %v5088_v55 = vadd.f32 %v2750_v23, %v9047_v59  ;;  %4373 = vmatprep.mubr.msk.f32.mxu0 %vm3162_vm3, %v2906_v0  ;;  %v3065_v0 = vld [vmem:[#allocation2 + $0x2f0] sm:$0xff]  ;;  %vm3194_vm3 = vcmp.ge.f32.partialorder %v3066_v58, 0.2 }
 0x382   :  { %4374 = vmatmul.mubr.msk.f32.gmra.mrb[94].mxu0 %vm3161_vm4, %v2905_v13  ;;  %v2909_v47 = vmax.f32 %v5087_v4, 0.0  ;;  %vm3193_vm4 = vcmp.ge.f32.partialorder %v3065_v0, 0.2  ;;  %v3070_v4 = vld [vmem:[#allocation2 + $0x318] sm:$0xff] }
 0x383   :  { %v2910_v46 = vmax.f32 %v5088_v55, 0.0  ;;  %v2754_v16 = vpop.f32.mrb[98].mxu1 }
 0x384   :  { %v5089_v45 = vadd.f32 %v2754_v16, %v9045_v50  ;;  %v2756_v22 = vpop.f32.mrb[99].mxu1 }
 0x385   :  { %v5090_v31 = vadd.f32 %v2756_v22, %v9047_v59  ;;  %4375 = vmatprep.mubr.msk.f32.mxu0 %vm3166_vm0, %v2910_v46  ;;  %v3069_v46 = vld [vmem:[#allocation2 + $0x310] sm:$0xff]  ;;  %vm3198_vm0 = vcmp.ge.f32.partialorder %v3070_v4, 0.2 }
 0x386   :  { %4376 = vmatmul.mubr.msk.f32.gmra.mrb[96].mxu0 %vm3165_vm5, %v2909_v47  ;;  %v2913_v30 = vmax.f32 %v5089_v45, 0.0  ;;  %vm3197_vm5 = vcmp.ge.f32.partialorder %v3069_v46, 0.2  ;;  %v3074_v45 = vld [vmem:[#allocation2 + $0x338] sm:$0xff] }
 0x387   :  { %v2914_v6 = vmax.f32 %v5090_v31, 0.0  ;;  %v2760_v39 = vpop.f32.mrb[100].mxu1 }
 0x388   :  { %v5091_v62 = vadd.f32 %v2760_v39, %v9045_v50  ;;  %v2762_v7 = vpop.f32.mrb[101].mxu1 }
 0x389   :  { %v5092_v21 = vadd.f32 %v2762_v7, %v9047_v59  ;;  %4377 = vmatprep.mubr.msk.f32.mxu0 %vm3170_vm6, %v2914_v6  ;;  %v3073_v6 = vld [vmem:[#allocation2 + $0x330] sm:$0xff]  ;;  %vm3202_vm6 = vcmp.ge.f32.partialorder %v3074_v45, 0.2 }
 0x38a   :  { %4378 = vmatmul.mubr.msk.f32.gmra.mrb[98].mxu0 %vm3169_vm7, %v2913_v30  ;;  %v2917_v25 = vmax.f32 %v5091_v62, 0.0  ;;  %vm3201_vm7 = vcmp.ge.f32.partialorder %v3073_v6, 0.2  ;;  %v3078_v62 = vld [vmem:[#allocation2 + $0x358] sm:$0xff] }
 0x38b   :  { %v2918_v26 = vmax.f32 %v5092_v21, 0.0  ;;  %v2766_v43 = vpop.f32.mrb[102].mxu1 }
 0x38c   :  { %v5093_v42 = vadd.f32 %v2766_v43, %v9045_v50  ;;  %v2768_v18 = vpop.f32.mrb[103].mxu1 }
 0x38d   :  { %v5094_v36 = vadd.f32 %v2768_v18, %v9047_v59  ;;  %4379 = vmatprep.mubr.msk.f32.mxu0 %vm3174_vm8, %v2918_v26  ;;  %v3077_v26 = vld [vmem:[#allocation2 + $0x350] sm:$0xff]  ;;  %vm3206_vm8 = vcmp.ge.f32.partialorder %v3078_v62, 0.2 }
 0x38e   :  { %4380 = vmatmul.mubr.msk.f32.gmra.mrb[100].mxu0 %vm3173_vm9, %v2917_v25  ;;  %v2921_v10 = vmax.f32 %v5093_v42, 0.0  ;;  %vm3205_vm9 = vcmp.ge.f32.partialorder %v3077_v26, 0.2  ;;  %v3082_v42 = vld [vmem:[#allocation2 + $0x378] sm:$0xff] }
 0x38f   :  { %v2922_v44 = vmax.f32 %v5094_v36, 0.0  ;;  %v2772_v49 = vpop.f32.mrb[104].mxu1 }
 0x390   :  { %v5095_v28 = vadd.f32 %v2772_v49, %v9045_v50  ;;  %v2774_v61 = vpop.f32.mrb[105].mxu1 }
 0x391   :  { %v5096_v3 = vadd.f32 %v2774_v61, %v9047_v59  ;;  %4381 = vmatprep.mubr.msk.f32.mxu0 %vm3178_vm10, %v2922_v44  ;;  %v3081_v44 = vld [vmem:[#allocation2 + $0x370] sm:$0xff]  ;;  %vm3210_vm10 = vcmp.ge.f32.partialorder %v3082_v42, 0.2 }
 0x392   :  { %4382 = vmatmul.mubr.msk.f32.gmra.mrb[102].mxu0 %vm3177_vm11, %v2921_v10  ;;  %v2925_v57 = vmax.f32 %v5095_v28, 0.0  ;;  %vm3209_vm11 = vcmp.ge.f32.partialorder %v3081_v44, 0.2  ;;  %v3086_v28 = vld [vmem:[#allocation2 + $0x398] sm:$0xff] }
 0x393   :  { %v2926_v19 = vmax.f32 %v5096_v3, 0.0  ;;  %v2778_v56 = vpop.f32.mrb[106].mxu1 }
 0x394   :  { %v5097_v60 = vadd.f32 %v2778_v56, %v9045_v50  ;;  %v2780_v27 = vpop.f32.mrb[107].mxu1 }
 0x395   :  { %v5098_v32 = vadd.f32 %v2780_v27, %v9047_v59  ;;  %4383 = vmatprep.mubr.msk.f32.mxu0 %vm3182_vm12, %v2926_v19  ;;  %v3085_v19 = vld [vmem:[#allocation2 + $0x390] sm:$0xff]  ;;  %vm3214_vm12 = vcmp.ge.f32.partialorder %v3086_v28, 0.2 }
 0x396   :  { %4384 = vmatmul.mubr.msk.f32.gmra.mrb[104].mxu0 %vm3181_vm13, %v2925_v57  ;;  %v2929_v48 = vmax.f32 %v5097_v60, 0.0  ;;  %vm3213_vm13 = vcmp.ge.f32.partialorder %v3085_v19, 0.2  ;;  %v3090_v60 = vld [vmem:[#allocation2 + $0x3b8] sm:$0xff] }
 0x397   :  { %v2930_v15 = vmax.f32 %v5098_v32, 0.0  ;;  %v2784_v24 = vpop.f32.mrb[108].mxu1 }
 0x398   :  { %v5099_v20 = vadd.f32 %v2784_v24, %v9045_v50  ;;  %v2786_v11 = vpop.f32.mrb[109].mxu1 }
 0x399   :  { %v5100_v1 = vadd.f32 %v2786_v11, %v9047_v59  ;;  %4385 = vmatprep.mubr.msk.f32.mxu0 %vm3186_vm14, %v2930_v15  ;;  %v3089_v15 = vld [vmem:[#allocation2 + $0x3b0] sm:$0xff]  ;;  %vm3218_vm14 = vcmp.ge.f32.partialorder %v3090_v60, 0.2 }
 0x39a   :  { %4386 = vmatmul.mubr.msk.f32.gmra.mrb[106].mxu0 %vm3185_vm15, %v2929_v48  ;;  %v2933_v53 = vmax.f32 %v5099_v20, 0.0  ;;  %vm3217_vm15 = vcmp.ge.f32.partialorder %v3089_v15, 0.2  ;;  %v3094_v20 = vld [vmem:[#allocation2 + $0x3d8] sm:$0xff] }
 0x39b   :  { %v2934_v12 = vmax.f32 %v5100_v1, 0.0  ;;  %v2790_v54 = vpop.f32.mrb[110].mxu1 }
 0x39c   :  { %v5101_v5 = vadd.f32 %v2790_v54, %v9045_v50  ;;  %v2792_v52 = vpop.f32.mrb[111].mxu1 }
 0x39d   :  { %v5102_v2 = vadd.f32 %v2792_v52, %v9047_v59  ;;  %4387 = vmatprep.mubr.msk.f32.mxu0 %vm3190_vm1, %v2934_v12  ;;  %v3093_v12 = vld [vmem:[#allocation2 + $0x3d0] sm:$0xff]  ;;  %vm3222_vm1 = vcmp.ge.f32.partialorder %v3094_v20, 0.2 }
 0x39e   :  { %4388 = vmatmul.mubr.msk.f32.gmra.mrb[108].mxu0 %vm3189_vm2, %v2933_v53  ;;  %v2937_v23 = vmax.f32 %v5101_v5, 0.0  ;;  %vm3221_vm2 = vcmp.ge.f32.partialorder %v3093_v12, 0.2  ;;  %v3098_v5 = vld [vmem:[#allocation2 + $0x3f8] sm:$0xff] }
 0x39f   :  { %v2938_v63 = vmax.f32 %v5102_v2, 0.0  ;;  %v2796_v13 = vpop.f32.mrb[112].mxu1 }
 0x3a0   :  { %v5103_v17 = vadd.f32 %v2796_v13, %v9045_v50  ;;  %v2798_v55 = vpop.f32.mrb[113].mxu1 }
 0x3a1   :  { %v5104_v16 = vadd.f32 %v2798_v55, %v9047_v59  ;;  %4389 = vmatprep.mubr.msk.f32.mxu0 %vm3194_vm3, %v2938_v63  ;;  %v3097_v63 = vld [vmem:[#allocation2 + $0x3f0] sm:$0xff]  ;;  %vm3226_vm3 = vcmp.ge.f32.partialorder %v3098_v5, 0.2 }
 0x3a2   :  { %4390 = vmatmul.mubr.msk.f32.gmra.mrb[110].mxu0 %vm3193_vm4, %v2937_v23  ;;  %v2941_v22 = vmax.f32 %v5103_v17, 0.0  ;;  %vm3225_vm4 = vcmp.ge.f32.partialorder %v3097_v63, 0.2  ;;  %v9116_v17 = vld [vmem:[%s9170_s5] ss:$0 sm:$0xff]  ;;  %s5956_s5 = smov [#allocation7]  }
 0x3a3   :  { %v2942_v37 = vmax.f32 %v5104_v16, 0.0  ;;  %v2802_v47 = vpop.f32.mrb[114].mxu1  ;;  %s4201_s9 = sshll.u32 %s5956_s5, 4  ;;  %s4202_s9 = int_to_ptr.vmem [resolvable:$true] %s4201_s9 }
 0x3a4   :  { %v5105_v14 = vadd.f32 %v2802_v47, %v9045_v50  ;;  %v2804_v31 = vpop.f32.mrb[115].mxu1  ;;  %s5920_s10 = scalar_lea.vmem %s4202_s9, 4096  ;;  %p5925_p3 = scmp.lt.s32.totalorder %s4202_s9, %s4202_s9 }
 0x3a5   :  { %v5106_v39 = vadd.f32 %v2804_v31, %v9047_v59  ;;  %4391 = vmatprep.mubr.msk.f32.mxu0 %vm3198_vm0, %v2942_v37  ;;  %p5921_p2 = scmp.ne.s32.totalorder %s4202_s9, %s5920_s10  ;;  %p5926_p4 = scmp.lt.s32.totalorder %s5920_s10, %s5920_s10 }
 0x3a6   :  { %4392 = vmatmul.mubr.msk.f32.gmra.mrb[112].mxu0 %vm3197_vm5, %v2941_v22  ;;  %v2945_v7 = vmax.f32 %v5105_v14, 0.0 }
 0x3a7   :  { %v2946_v51 = vmax.f32 %v5106_v39, 0.0  ;;  %v2808_v30 = vpop.f32.mrb[116].mxu1  ;;  %p5927_p5 = por %p5926_p4, %p5925_p3 }
 0x3a8   :  { %v5107_v41 = vadd.f32 %v2808_v30, %v9045_v50  ;;  %v2810_v21 = vpop.f32.mrb[117].mxu1 }
 0x3a9   :  { %v5108_v43 = vadd.f32 %v2810_v21, %v9047_v59  ;;  %4393 = vmatprep.mubr.msk.f32.mxu0 %vm3202_vm6, %v2946_v51  ;;  %p5928_p6 = pnand %p5927_p5, %p5921_p2 }
 0x3aa   :  { %4394 = vmatmul.mubr.msk.f32.gmra.mrb[114].mxu0 %vm3201_vm7, %v2945_v7  ;;  %v2949_v18 = vmax.f32 %v5107_v41, 0.0 }
 0x3ab   :  { %v2950_v29 = vmax.f32 %v5108_v43, 0.0  ;;  %v2814_v25 = vpop.f32.mrb[118].mxu1 }
 0x3ac   :  { %v5109_v34 = vadd.f32 %v2814_v25, %v9045_v50  ;;  %v2816_v36 = vpop.f32.mrb[119].mxu1 }
 0x3ad   :  { %v5110_v49 = vadd.f32 %v2816_v36, %v9047_v59  ;;  %4395 = vmatprep.mubr.msk.f32.mxu0 %vm3206_vm8, %v2950_v29 }
 0x3ae   :  { %4396 = vmatmul.mubr.msk.f32.gmra.mrb[116].mxu0 %vm3205_vm9, %v2949_v18  ;;  %v2953_v61 = vmax.f32 %v5109_v34, 0.0 }
 0x3af   :  { %v2954_v40 = vmax.f32 %v5110_v49, 0.0  ;;  %v2820_v10 = vpop.f32.mrb[120].mxu1 }
 0x3b0   :  { %v5111_v35 = vadd.f32 %v2820_v10, %v9045_v50  ;;  %v2822_v3 = vpop.f32.mrb[121].mxu1 }
 0x3b1   :  { %v5112_v56 = vadd.f32 %v2822_v3, %v9047_v59  ;;  %4397 = vmatprep.mubr.msk.f32.mxu0 %vm3210_vm10, %v2954_v40 }
 0x3b2   :  { %4398 = vmatmul.mubr.msk.f32.gmra.mrb[118].mxu0 %vm3209_vm11, %v2953_v61  ;;  %v2957_v27 = vmax.f32 %v5111_v35, 0.0 }
 0x3b3   :  { %v2958_v8 = vmax.f32 %v5112_v56, 0.0  ;;  %v2826_v57 = vpop.f32.mrb[122].mxu1 }
 0x3b4   :  { %v5113_v9 = vadd.f32 %v2826_v57, %v9045_v50  ;;  %v2828_v32 = vpop.f32.mrb[123].mxu1 }
 0x3b5   :  { %v5114_v24 = vadd.f32 %v2828_v32, %v9047_v59  ;;  %4399 = vmatprep.mubr.msk.f32.mxu0 %vm3214_vm12, %v2958_v8 }
 0x3b6   :  { %4400 = vmatmul.mubr.msk.f32.gmra.mrb[120].mxu0 %vm3213_vm13, %v2957_v27  ;;  %v2961_v11 = vmax.f32 %v5113_v9, 0.0 }
 0x3b7   :  { %v2962_v38 = vmax.f32 %v5114_v24, 0.0  ;;  %v2832_v48 = vpop.f32.mrb[124].mxu1 }
 0x3b8   :  { %v5115_v33 = vadd.f32 %v2832_v48, %v9045_v50  ;;  %v2834_v1 = vpop.f32.mrb[125].mxu1 }
 0x3b9   :  { %v5116_v54 = vadd.f32 %v2834_v1, %v9047_v59  ;;  %4401 = vmatprep.mubr.msk.f32.mxu0 %vm3218_vm14, %v2962_v38 }
 0x3ba   :  { %4402 = vmatmul.mubr.msk.f32.gmra.mrb[122].mxu0 %vm3217_vm15, %v2961_v11  ;;  %v2965_v52 = vmax.f32 %v5115_v33, 0.0 }
 0x3bb   :  { %v2966_v58 = vmax.f32 %v5116_v54, 0.0  ;;  %v2838_v53 = vpop.f32.mrb[126].mxu1 }
 0x3bc   :  { %v5117_v0 = vadd.f32 %v2838_v53, %v9045_v50  ;;  %v2840_v2 = vpop.f32.mrb[127].mxu1 }
 0x3bd   :  { %v5118_v13 = vadd.f32 %v2840_v2, %v9047_v59  ;;  %4403 = vmatprep.mubr.msk.f32.mxu0 %vm3222_vm1, %v2966_v58 }
 0x3be   :  { %4404 = vmatmul.mubr.msk.f32.gmra.mrb[124].mxu0 %vm3221_vm2, %v2965_v52  ;;  %v2969_v23 = vmax.f32 %v5117_v0, 0.0 }
 0x3bf   :  { %v2970_v4 = vmax.f32 %v5118_v13, 0.0 }
 0x3c1   :  { %4405 = vmatprep.mubr.msk.f32.mxu0 %vm3226_vm3, %v2970_v4 }
 0x3c2   :  { %4406 = vmatmul.mubr.msk.f32.gmra.mrb[126].mxu0 %vm3225_vm4, %v2969_v23 }
 0x419   :  { %v3717_v55 = vpop.f32.mrb[64].mxu0 }
 0x41a   :  { %v5119_v50 = vadd.f32 %v9116_v17, %v3717_v55  ;;  %v3719_v46 = vpop.f32.mrb[65].mxu0 }
 0x41c   :  { %v4407_v16 = vmul.f32 -1.442695, %v5119_v50 }
 0x41d   :  { %v3722_v37 = vpop.f32.mrb[66].mxu0 }
 0x41e   :  { %5576 = vpow2.f32 %v4407_v16  ;;  %v5120_v59 = vadd.f32 %v9116_v17, %v3722_v37  ;;  %v3724_v47 = vpop.f32.mrb[67].mxu0 }
 0x420   :  { %v4408_v45 = vmul.f32 -1.442695, %v5120_v59 }
 0x421   :  { %v3727_v22 = vpop.f32.mrb[68].mxu0 }
 0x422   :  { %5578 = vpow2.f32 %v4408_v45  ;;  %v5121_v14 = vadd.f32 %v9116_v17, %v3727_v22  ;;  %v3729_v31 = vpop.f32.mrb[69].mxu0 }
 0x424   :  { %v4409_v6 = vmul.f32 -1.442695, %v5121_v14 }
 0x425   :  { %v3732_v39 = vpop.f32.mrb[70].mxu0 }
 0x426   :  { %5580 = vpow2.f32 %v4409_v6  ;;  %v5122_v51 = vadd.f32 %v9116_v17, %v3732_v39  ;;  %v3734_v30 = vpop.f32.mrb[71].mxu0 }
 0x428   :  { %v5577_v62 = vpop.eup %5576  ;;  %v4410_v7 = vmul.f32 -1.442695, %v5122_v51 }
 0x429   :  { %v3972_v41 = vadd.f32 1.0, %v5577_v62  ;;  %v3737_v21 = vpop.f32.mrb[72].mxu0 }
 0x42a   :  { %5582 = vpow2.f32 %v4410_v7  ;;  %v5123_v26 = vadd.f32 %v9116_v17, %v3737_v21  ;;  %v3739_v43 = vpop.f32.mrb[73].mxu0 }
 0x42b   :  { %5584 = vrcp.f32 %v3972_v41 }
 0x42c   :  { %v5579_v29 = vpop.eup %5578  ;;  %v4411_v25 = vmul.f32 -1.442695, %v5123_v26 }
 0x42d   :  { %v3973_v42 = vadd.f32 1.0, %v5579_v29  ;;  %v3742_v18 = vpop.f32.mrb[74].mxu0 }
 0x42e   :  { %5586 = vpow2.f32 %v4411_v25  ;;  %v5124_v34 = vadd.f32 %v9116_v17, %v3742_v18  ;;  %v3744_v36 = vpop.f32.mrb[75].mxu0 }
 0x42f   :  { %5588 = vrcp.f32 %v3973_v42 }
 0x430   :  { %v5581_v44 = vpop.eup %5580  ;;  %v4412_v49 = vmul.f32 -1.442695, %v5124_v34 }
 0x431   :  { %v3974_v40 = vadd.f32 1.0, %v5581_v44  ;;  %v3747_v10 = vpop.f32.mrb[76].mxu0 }
 0x432   :  { %5590 = vpow2.f32 %v4412_v49  ;;  %v5125_v28 = vadd.f32 %v9116_v17, %v3747_v10  ;;  %v3749_v61 = vpop.f32.mrb[77].mxu0 }
 0x433   :  { %5592 = vrcp.f32 %v3974_v40 }
 0x434   :  { %v5583_v35 = vpop.eup %5582  ;;  %v4413_v3 = vmul.f32 -1.442695, %v5125_v28 }
 0x435   :  { %v5585_v19 = vpop.eup %5584  ;;  %v3975_v56 = vadd.f32 1.0, %v5583_v35  ;;  %v3752_v8 = vpop.f32.mrb[78].mxu0 }
 0x436   :  { %v4068_v57 = vmul.f32 10000.0, %v5585_v19  ;;  %5594 = vpow2.f32 %v4413_v3  ;;  %v5126_v60 = vadd.f32 %v9116_v17, %v3752_v8  ;;  %v3754_v27 = vpop.f32.mrb[79].mxu0 }
 0x437   :  { %5596 = vrcp.f32 %v3975_v56 }
 0x438   :  { %v5587_v9 = vpop.eup %5586  ;;  %v5535_v32 = vround.rtne.f32 %v4068_v57  ;;  %v4414_v15 = vmul.f32 -1.442695, %v5126_v60 }
 0x439   :  { %v5589_v24 = vpop.eup %5588  ;;  %v3976_v38 = vadd.f32 1.0, %v5587_v9  ;;  %v3757_v48 = vpop.f32.mrb[80].mxu0 }
 0x43a   :  { %v4132_v20 = vmul.f32 0.0001, %v5535_v32  ;;  %v4069_v11 = vmul.f32 10000.0, %v5589_v24  ;;  %5598 = vpow2.f32 %v4414_v15  ;;  %v5127_v33 = vadd.f32 %v9116_v17, %v3757_v48  ;;  %v3759_v1 = vpop.f32.mrb[81].mxu0 }
 0x43b   :  { %5600 = vrcp.f32 %v3976_v38 }
 0x43c   :  { %v5591_v12 = vpop.eup %5590  ;;  %4164 = vst [vmem:[#allocation7] sm:$0xff] %v4132_v20  ;;  %v5536_v54 = vround.rtne.f32 %v4069_v11  ;;  %v4415_v58 = vmul.f32 -1.442695, %v5127_v33 }
 0x43d   :  { %v5593_v53 = vpop.eup %5592  ;;  %v3977_v5 = vadd.f32 1.0, %v5591_v12  ;;  %v3762_v52 = vpop.f32.mrb[82].mxu0 }
 0x43e   :  { %v4133_v0 = vmul.f32 0.0001, %v5536_v54  ;;  %v4070_v2 = vmul.f32 10000.0, %v5593_v53  ;;  %5602 = vpow2.f32 %v4415_v58  ;;  %v5128_v63 = vadd.f32 %v9116_v17, %v3762_v52  ;;  %v3764_v13 = vpop.f32.mrb[83].mxu0 }
 0x43f   :  { %5604 = vrcp.f32 %v3977_v5 }
 0x440   :  { %v5595_v4 = vpop.eup %5594  ;;  %4165 = vst [vmem:[#allocation7 + $0x8] sm:$0xff] %v4133_v0  ;;  %v5537_v23 = vround.rtne.f32 %v4070_v2  ;;  %v4416_v55 = vmul.f32 -1.442695, %v5128_v63 }
 0x441   :  { %v5597_v50 = vpop.eup %5596  ;;  %v3978_v46 = vadd.f32 1.0, %v5595_v4  ;;  %v3767_v16 = vpop.f32.mrb[84].mxu0 }
 0x442   :  { %v4134_v37 = vmul.f32 0.0001, %v5537_v23  ;;  %v4071_v59 = vmul.f32 10000.0, %v5597_v50  ;;  %5606 = vpow2.f32 %v4416_v55  ;;  %v5129_v47 = vadd.f32 %v9116_v17, %v3767_v16  ;;  %v3769_v45 = vpop.f32.mrb[85].mxu0 }
 0x443   :  { %5608 = vrcp.f32 %v3978_v46 }
 0x444   :  { %v5599_v22 = vpop.eup %5598  ;;  %4166 = vst [vmem:[#allocation7 + $0x10] sm:$0xff] %v4134_v37  ;;  %v5538_v14 = vround.rtne.f32 %v4071_v59  ;;  %v4417_v31 = vmul.f32 -1.442695, %v5129_v47 }
 0x445   :  { %v5601_v6 = vpop.eup %5600  ;;  %v3979_v39 = vadd.f32 1.0, %v5599_v22  ;;  %v3772_v51 = vpop.f32.mrb[86].mxu0 }
 0x446   :  { %v4135_v30 = vmul.f32 0.0001, %v5538_v14  ;;  %v4072_v62 = vmul.f32 10000.0, %v5601_v6  ;;  %5610 = vpow2.f32 %v4417_v31  ;;  %v5130_v7 = vadd.f32 %v9116_v17, %v3772_v51  ;;  %v3774_v41 = vpop.f32.mrb[87].mxu0 }
 0x447   :  { %5612 = vrcp.f32 %v3979_v39 }
 0x448   :  { %v5603_v21 = vpop.eup %5602  ;;  %4167 = vst [vmem:[#allocation7 + $0x18] sm:$0xff] %v4135_v30  ;;  %v5539_v26 = vround.rtne.f32 %v4072_v62  ;;  %v4418_v43 = vmul.f32 -1.442695, %v5130_v7 }
 0x449   :  { %v5605_v29 = vpop.eup %5604  ;;  %v3980_v25 = vadd.f32 1.0, %v5603_v21  ;;  %v3777_v42 = vpop.f32.mrb[88].mxu0 }
 0x44a   :  { %v4136_v18 = vmul.f32 0.0001, %v5539_v26  ;;  %v4073_v34 = vmul.f32 10000.0, %v5605_v29  ;;  %5614 = vpow2.f32 %v4418_v43  ;;  %v5131_v36 = vadd.f32 %v9116_v17, %v3777_v42  ;;  %v3779_v44 = vpop.f32.mrb[89].mxu0 }
 0x44b   :  { %5616 = vrcp.f32 %v3980_v25 }
 0x44c   :  { %v5607_v49 = vpop.eup %5606  ;;  %4168 = vst [vmem:[#allocation7 + $0x20] sm:$0xff] %v4136_v18  ;;  %v5540_v40 = vround.rtne.f32 %v4073_v34  ;;  %v4419_v10 = vmul.f32 -1.442695, %v5131_v36 }
 0x44d   :  { %v5609_v28 = vpop.eup %5608  ;;  %v3981_v61 = vadd.f32 1.0, %v5607_v49  ;;  %v3782_v35 = vpop.f32.mrb[90].mxu0 }
 0x44e   :  { %v4137_v3 = vmul.f32 0.0001, %v5540_v40  ;;  %v4074_v19 = vmul.f32 10000.0, %v5609_v28  ;;  %5618 = vpow2.f32 %v4419_v10  ;;  %v5132_v56 = vadd.f32 %v9116_v17, %v3782_v35  ;;  %v3784_v8 = vpop.f32.mrb[91].mxu0 }
 0x44f   :  { %5620 = vrcp.f32 %v3981_v61 }
 0x450   :  { %v5611_v57 = vpop.eup %5610  ;;  %4169 = vst [vmem:[#allocation7 + $0x28] sm:$0xff] %v4137_v3  ;;  %v5541_v60 = vround.rtne.f32 %v4074_v19  ;;  %v4420_v27 = vmul.f32 -1.442695, %v5132_v56 }
 0x451   :  { %v5613_v9 = vpop.eup %5612  ;;  %v3982_v32 = vadd.f32 1.0, %v5611_v57  ;;  %v3787_v15 = vpop.f32.mrb[92].mxu0 }
 0x452   :  { %v4138_v24 = vmul.f32 0.0001, %v5541_v60  ;;  %v4075_v38 = vmul.f32 10000.0, %v5613_v9  ;;  %5622 = vpow2.f32 %v4420_v27  ;;  %v5133_v48 = vadd.f32 %v9116_v17, %v3787_v15  ;;  %v3789_v20 = vpop.f32.mrb[93].mxu0 }
 0x453   :  { %5624 = vrcp.f32 %v3982_v32 }
 0x454   :  { %v5615_v11 = vpop.eup %5614  ;;  %4170 = vst [vmem:[#allocation7 + $0x30] sm:$0xff] %v4138_v24  ;;  %v5542_v33 = vround.rtne.f32 %v4075_v38  ;;  %v4421_v1 = vmul.f32 -1.442695, %v5133_v48 }
 0x455   :  { %v5617_v12 = vpop.eup %5616  ;;  %v3983_v54 = vadd.f32 1.0, %v5615_v11  ;;  %v3792_v58 = vpop.f32.mrb[94].mxu0 }
 0x456   :  { %v4139_v53 = vmul.f32 0.0001, %v5542_v33  ;;  %v4076_v5 = vmul.f32 10000.0, %v5617_v12  ;;  %5626 = vpow2.f32 %v4421_v1  ;;  %v5134_v52 = vadd.f32 %v9116_v17, %v3792_v58  ;;  %v3794_v0 = vpop.f32.mrb[95].mxu0 }
 0x457   :  { %5628 = vrcp.f32 %v3983_v54 }
 0x458   :  { %v5619_v2 = vpop.eup %5618  ;;  %4171 = vst [vmem:[#allocation7 + $0x38] sm:$0xff] %v4139_v53  ;;  %v5543_v63 = vround.rtne.f32 %v4076_v5  ;;  %v4422_v13 = vmul.f32 -1.442695, %v5134_v52 }
 0x459   :  { %v5621_v4 = vpop.eup %5620  ;;  %v3984_v23 = vadd.f32 1.0, %v5619_v2  ;;  %v3797_v55 = vpop.f32.mrb[96].mxu0 }
 0x45a   :  { %v4140_v50 = vmul.f32 0.0001, %v5543_v63  ;;  %v4077_v46 = vmul.f32 10000.0, %v5621_v4  ;;  %5630 = vpow2.f32 %v4422_v13  ;;  %v5135_v16 = vadd.f32 %v9116_v17, %v3797_v55  ;;  %v3799_v37 = vpop.f32.mrb[97].mxu0 }
 0x45b   :  { %5632 = vrcp.f32 %v3984_v23 }
 0x45c   :  { %v5623_v59 = vpop.eup %5622  ;;  %4172 = vst [vmem:[#allocation7 + $0x40] sm:$0xff] %v4140_v50  ;;  %v5544_v47 = vround.rtne.f32 %v4077_v46  ;;  %v4423_v45 = vmul.f32 -1.442695, %v5135_v16 }
 0x45d   :  { %v5625_v22 = vpop.eup %5624  ;;  %v3985_v14 = vadd.f32 1.0, %v5623_v59  ;;  %v3802_v31 = vpop.f32.mrb[98].mxu0 }
 0x45e   :  { %v4141_v6 = vmul.f32 0.0001, %v5544_v47  ;;  %v4078_v39 = vmul.f32 10000.0, %v5625_v22  ;;  %5634 = vpow2.f32 %v4423_v45  ;;  %v5136_v51 = vadd.f32 %v9116_v17, %v3802_v31  ;;  %v3804_v30 = vpop.f32.mrb[99].mxu0 }
 0x45f   :  { %5636 = vrcp.f32 %v3985_v14 }
 0x460   :  { %v5627_v62 = vpop.eup %5626  ;;  %4173 = vst [vmem:[#allocation7 + $0x48] sm:$0xff] %v4141_v6  ;;  %v5545_v7 = vround.rtne.f32 %v4078_v39  ;;  %v4424_v41 = vmul.f32 -1.442695, %v5136_v51 }
 0x461   :  { %v5629_v21 = vpop.eup %5628  ;;  %v3986_v26 = vadd.f32 1.0, %v5627_v62  ;;  %v3807_v43 = vpop.f32.mrb[100].mxu0 }
 0x462   :  { %v4142_v29 = vmul.f32 0.0001, %v5545_v7  ;;  %v4079_v25 = vmul.f32 10000.0, %v5629_v21  ;;  %5638 = vpow2.f32 %v4424_v41  ;;  %v5137_v42 = vadd.f32 %v9116_v17, %v3807_v43  ;;  %v3809_v18 = vpop.f32.mrb[101].mxu0 }
 0x463   :  { %5640 = vrcp.f32 %v3986_v26 }
 0x464   :  { %v5631_v34 = vpop.eup %5630  ;;  %4174 = vst [vmem:[#allocation7 + $0x50] sm:$0xff] %v4142_v29  ;;  %v5546_v36 = vround.rtne.f32 %v4079_v25  ;;  %v4425_v44 = vmul.f32 -1.442695, %v5137_v42 }
 0x465   :  { %v5633_v49 = vpop.eup %5632  ;;  %v3987_v40 = vadd.f32 1.0, %v5631_v34  ;;  %v3812_v10 = vpop.f32.mrb[102].mxu0 }
 0x466   :  { %v4143_v28 = vmul.f32 0.0001, %v5546_v36  ;;  %v4080_v61 = vmul.f32 10000.0, %v5633_v49  ;;  %5642 = vpow2.f32 %v4425_v44  ;;  %v5138_v35 = vadd.f32 %v9116_v17, %v3812_v10  ;;  %v3814_v3 = vpop.f32.mrb[103].mxu0 }
 0x467   :  { %5644 = vrcp.f32 %v3987_v40 }
 0x468   :  { %v5635_v19 = vpop.eup %5634  ;;  %4175 = vst [vmem:[#allocation7 + $0x58] sm:$0xff] %v4143_v28  ;;  %v5547_v56 = vround.rtne.f32 %v4080_v61  ;;  %v4426_v8 = vmul.f32 -1.442695, %v5138_v35 }
 0x469   :  { %v5637_v57 = vpop.eup %5636  ;;  %v3988_v60 = vadd.f32 1.0, %v5635_v19  ;;  %v3817_v27 = vpop.f32.mrb[104].mxu0 }
 0x46a   :  { %v4144_v9 = vmul.f32 0.0001, %v5547_v56  ;;  %v4081_v32 = vmul.f32 10000.0, %v5637_v57  ;;  %5646 = vpow2.f32 %v4426_v8  ;;  %v5139_v15 = vadd.f32 %v9116_v17, %v3817_v27  ;;  %v3819_v24 = vpop.f32.mrb[105].mxu0 }
 0x46b   :  { %5648 = vrcp.f32 %v3988_v60 }
 0x46c   :  { %v5639_v38 = vpop.eup %5638  ;;  %4176 = vst [vmem:[#allocation7 + $0x60] sm:$0xff] %v4144_v9  ;;  %v5548_v48 = vround.rtne.f32 %v4081_v32  ;;  %v4427_v20 = vmul.f32 -1.442695, %v5139_v15 }
 0x46d   :  { %v5641_v11 = vpop.eup %5640  ;;  %v3989_v33 = vadd.f32 1.0, %v5639_v38  ;;  %v3822_v1 = vpop.f32.mrb[106].mxu0 }
 0x46e   :  { %v4145_v12 = vmul.f32 0.0001, %v5548_v48  ;;  %v4082_v54 = vmul.f32 10000.0, %v5641_v11  ;;  %5650 = vpow2.f32 %v4427_v20  ;;  %v5140_v58 = vadd.f32 %v9116_v17, %v3822_v1  ;;  %v3824_v53 = vpop.f32.mrb[107].mxu0 }
 0x46f   :  { %5652 = vrcp.f32 %v3989_v33 }
 0x470   :  { %v5643_v5 = vpop.eup %5642  ;;  %4177 = vst [vmem:[#allocation7 + $0x68] sm:$0xff] %v4145_v12  ;;  %v5549_v52 = vround.rtne.f32 %v4082_v54  ;;  %v4428_v0 = vmul.f32 -1.442695, %v5140_v58 }
 0x471   :  { %v5645_v2 = vpop.eup %5644  ;;  %v3990_v63 = vadd.f32 1.0, %v5643_v5  ;;  %v3827_v13 = vpop.f32.mrb[108].mxu0 }
 0x472   :  { %v4146_v4 = vmul.f32 0.0001, %v5549_v52  ;;  %v4083_v23 = vmul.f32 10000.0, %v5645_v2  ;;  %5654 = vpow2.f32 %v4428_v0  ;;  %v5141_v55 = vadd.f32 %v9116_v17, %v3827_v13  ;;  %v3829_v50 = vpop.f32.mrb[109].mxu0 }
 0x473   :  { %5656 = vrcp.f32 %v3990_v63 }
 0x474   :  { %v5647_v46 = vpop.eup %5646  ;;  %4178 = vst [vmem:[#allocation7 + $0x70] sm:$0xff] %v4146_v4  ;;  %v5550_v16 = vround.rtne.f32 %v4083_v23  ;;  %v4429_v37 = vmul.f32 -1.442695, %v5141_v55 }
 0x475   :  { %v5649_v59 = vpop.eup %5648  ;;  %v3991_v47 = vadd.f32 1.0, %v5647_v46  ;;  %v3832_v45 = vpop.f32.mrb[110].mxu0 }
 0x476   :  { %v4147_v22 = vmul.f32 0.0001, %v5550_v16  ;;  %v4084_v14 = vmul.f32 10000.0, %v5649_v59  ;;  %5658 = vpow2.f32 %v4429_v37  ;;  %v5142_v31 = vadd.f32 %v9116_v17, %v3832_v45  ;;  %v3834_v6 = vpop.f32.mrb[111].mxu0 }
 0x477   :  { %5660 = vrcp.f32 %v3991_v47 }
 0x478   :  { %v5651_v39 = vpop.eup %5650  ;;  %4179 = vst [vmem:[#allocation7 + $0x78] sm:$0xff] %v4147_v22  ;;  %v5551_v51 = vround.rtne.f32 %v4084_v14  ;;  %v4430_v30 = vmul.f32 -1.442695, %v5142_v31 }
 0x479   :  { %v5653_v62 = vpop.eup %5652  ;;  %v3992_v7 = vadd.f32 1.0, %v5651_v39  ;;  %v3837_v41 = vpop.f32.mrb[112].mxu0 }
 0x47a   :  { %v4148_v21 = vmul.f32 0.0001, %v5551_v51  ;;  %v4085_v26 = vmul.f32 10000.0, %v5653_v62  ;;  %5662 = vpow2.f32 %v4430_v30  ;;  %v5143_v43 = vadd.f32 %v9116_v17, %v3837_v41  ;;  %v3839_v29 = vpop.f32.mrb[113].mxu0 }
 0x47b   :  { %5664 = vrcp.f32 %v3992_v7 }
 0x47c   :  { %v5655_v25 = vpop.eup %5654  ;;  %4180 = vst [vmem:[#allocation7 + $0x80] sm:$0xff] %v4148_v21  ;;  %v5552_v42 = vround.rtne.f32 %v4085_v26  ;;  %v4431_v18 = vmul.f32 -1.442695, %v5143_v43 }
 0x47d   :  { %v5657_v34 = vpop.eup %5656  ;;  %v3993_v36 = vadd.f32 1.0, %v5655_v25  ;;  %v3842_v44 = vpop.f32.mrb[114].mxu0 }
 0x47e   :  { %v4149_v49 = vmul.f32 0.0001, %v5552_v42  ;;  %v4086_v40 = vmul.f32 10000.0, %v5657_v34  ;;  %5666 = vpow2.f32 %v4431_v18  ;;  %v5144_v10 = vadd.f32 %v9116_v17, %v3842_v44  ;;  %v3844_v28 = vpop.f32.mrb[115].mxu0 }
 0x47f   :  { %5668 = vrcp.f32 %v3993_v36 }
 0x480   :  { %v5659_v61 = vpop.eup %5658  ;;  %4181 = vst [vmem:[#allocation7 + $0x88] sm:$0xff] %v4149_v49  ;;  %v5553_v35 = vround.rtne.f32 %v4086_v40  ;;  %v4432_v3 = vmul.f32 -1.442695, %v5144_v10 }
 0x481   :  { %v5661_v19 = vpop.eup %5660  ;;  %v3994_v56 = vadd.f32 1.0, %v5659_v61  ;;  %v3847_v8 = vpop.f32.mrb[116].mxu0 }
 0x482   :  { %v4150_v57 = vmul.f32 0.0001, %v5553_v35  ;;  %v4087_v60 = vmul.f32 10000.0, %v5661_v19  ;;  %5670 = vpow2.f32 %v4432_v3  ;;  %v5145_v27 = vadd.f32 %v9116_v17, %v3847_v8  ;;  %v3849_v9 = vpop.f32.mrb[117].mxu0 }
 0x483   :  { %5672 = vrcp.f32 %v3994_v56 }
 0x484   :  { %v5663_v32 = vpop.eup %5662  ;;  %4182 = vst [vmem:[#allocation7 + $0x90] sm:$0xff] %v4150_v57  ;;  %v5554_v15 = vround.rtne.f32 %v4087_v60  ;;  %v4433_v24 = vmul.f32 -1.442695, %v5145_v27 }
 0x485   :  { %v5665_v38 = vpop.eup %5664  ;;  %v3995_v48 = vadd.f32 1.0, %v5663_v32  ;;  %v3852_v20 = vpop.f32.mrb[118].mxu0 }
 0x486   :  { %v4151_v11 = vmul.f32 0.0001, %v5554_v15  ;;  %v4088_v33 = vmul.f32 10000.0, %v5665_v38  ;;  %5674 = vpow2.f32 %v4433_v24  ;;  %v5146_v1 = vadd.f32 %v9116_v17, %v3852_v20  ;;  %v3854_v12 = vpop.f32.mrb[119].mxu0 }
 0x487   :  { %5676 = vrcp.f32 %v3995_v48 }
 0x488   :  { %v5667_v54 = vpop.eup %5666  ;;  %4183 = vst [vmem:[#allocation7 + $0x98] sm:$0xff] %v4151_v11  ;;  %v5555_v58 = vround.rtne.f32 %v4088_v33  ;;  %v4434_v53 = vmul.f32 -1.442695, %v5146_v1 }
 0x489   :  { %v5669_v5 = vpop.eup %5668  ;;  %v3996_v52 = vadd.f32 1.0, %v5667_v54  ;;  %v3857_v0 = vpop.f32.mrb[120].mxu0 }
 0x48a   :  { %v4152_v2 = vmul.f32 0.0001, %v5555_v58  ;;  %v4089_v63 = vmul.f32 10000.0, %v5669_v5  ;;  %5678 = vpow2.f32 %v4434_v53  ;;  %v5147_v13 = vadd.f32 %v9116_v17, %v3857_v0  ;;  %v3859_v4 = vpop.f32.mrb[121].mxu0 }
 0x48b   :  { %5680 = vrcp.f32 %v3996_v52 }
 0x48c   :  { %v5671_v23 = vpop.eup %5670  ;;  %4184 = vst [vmem:[#allocation7 + $0xa0] sm:$0xff] %v4152_v2  ;;  %v5556_v55 = vround.rtne.f32 %v4089_v63  ;;  %v4435_v50 = vmul.f32 -1.442695, %v5147_v13 }
 0x48d   :  { %v5673_v46 = vpop.eup %5672  ;;  %v3997_v16 = vadd.f32 1.0, %v5671_v23  ;;  %v3862_v37 = vpop.f32.mrb[122].mxu0 }
 0x48e   :  { %v4153_v59 = vmul.f32 0.0001, %v5556_v55  ;;  %v4090_v47 = vmul.f32 10000.0, %v5673_v46  ;;  %5682 = vpow2.f32 %v4435_v50  ;;  %v5148_v45 = vadd.f32 %v9116_v17, %v3862_v37  ;;  %v3864_v22 = vpop.f32.mrb[123].mxu0 }
 0x48f   :  { %5684 = vrcp.f32 %v3997_v16 }
 0x490   :  { %v5675_v14 = vpop.eup %5674  ;;  %4185 = vst [vmem:[#allocation7 + $0xa8] sm:$0xff] %v4153_v59  ;;  %v5557_v31 = vround.rtne.f32 %v4090_v47  ;;  %v4436_v6 = vmul.f32 -1.442695, %v5148_v45 }
 0x491   :  { %v5677_v39 = vpop.eup %5676  ;;  %v3998_v51 = vadd.f32 1.0, %v5675_v14  ;;  %v3867_v30 = vpop.f32.mrb[124].mxu0 }
 0x492   :  { %v4154_v62 = vmul.f32 0.0001, %v5557_v31  ;;  %v4091_v7 = vmul.f32 10000.0, %v5677_v39  ;;  %5686 = vpow2.f32 %v4436_v6  ;;  %v5149_v41 = vadd.f32 %v9116_v17, %v3867_v30  ;;  %v3869_v21 = vpop.f32.mrb[125].mxu0 }
 0x493   :  { %5688 = vrcp.f32 %v3998_v51 }
 0x494   :  { %v5679_v26 = vpop.eup %5678  ;;  %4186 = vst [vmem:[#allocation7 + $0xb0] sm:$0xff] %v4154_v62  ;;  %v5558_v43 = vround.rtne.f32 %v4091_v7  ;;  %v4437_v29 = vmul.f32 -1.442695, %v5149_v41 }
 0x495   :  { %v5681_v25 = vpop.eup %5680  ;;  %v3999_v42 = vadd.f32 1.0, %v5679_v26  ;;  %v3872_v18 = vpop.f32.mrb[126].mxu0 }
 0x496   :  { %v4155_v34 = vmul.f32 0.0001, %v5558_v43  ;;  %v4092_v36 = vmul.f32 10000.0, %v5681_v25  ;;  %5690 = vpow2.f32 %v4437_v29  ;;  %v5150_v44 = vadd.f32 %v9116_v17, %v3872_v18  ;;  %v3874_v49 = vpop.f32.mrb[127].mxu0 }
 0x497   :  { %5692 = vrcp.f32 %v3999_v42 }
 0x498   :  { %v5683_v40 = vpop.eup %5682  ;;  %4187 = vst [vmem:[#allocation7 + $0xb8] sm:$0xff] %v4155_v34  ;;  %v5559_v10 = vround.rtne.f32 %v4092_v36  ;;  %v4438_v28 = vmul.f32 -1.442695, %v5150_v44 }
 0x499   :  { %v5685_v61 = vpop.eup %5684  ;;  %v4000_v35 = vadd.f32 1.0, %v5683_v40 }
 0x49a   :  { %v4156_v3 = vmul.f32 0.0001, %v5559_v10  ;;  %v4093_v19 = vmul.f32 10000.0, %v5685_v61  ;;  %5694 = vpow2.f32 %v4438_v28 }
 0x49b   :  { %5696 = vrcp.f32 %v4000_v35 }
 0x49c   :  { %v5687_v56 = vpop.eup %5686  ;;  %4188 = vst [vmem:[#allocation7 + $0xc0] sm:$0xff] %v4156_v3  ;;  %v5560_v8 = vround.rtne.f32 %v4093_v19 }
 0x49d   :  { %v5689_v57 = vpop.eup %5688  ;;  %v4001_v60 = vadd.f32 1.0, %v5687_v56 }
 0x49e   :  { %v4157_v27 = vmul.f32 0.0001, %v5560_v8  ;;  %v4094_v9 = vmul.f32 10000.0, %v5689_v57 }
 0x49f   :  { %5698 = vrcp.f32 %v4001_v60 }
 0x4a0   :  { %v5691_v17 = vpop.eup %5690  ;;  %4189 = vst [vmem:[#allocation7 + $0xc8] sm:$0xff] %v4157_v27  ;;  %v5561_v32 = vround.rtne.f32 %v4094_v9 }
 0x4a1   :  { %v5693_v15 = vpop.eup %5692  ;;  %v4002_v24 = vadd.f32 1.0, %v5691_v17 }
 0x4a2   :  { %v4158_v38 = vmul.f32 0.0001, %v5561_v32  ;;  %v4095_v48 = vmul.f32 10000.0, %v5693_v15 }
 0x4a3   :  { %5700 = vrcp.f32 %v4002_v24 }
 0x4a4   :  { %v5695_v20 = vpop.eup %5694  ;;  %4190 = vst [vmem:[#allocation7 + $0xd0] sm:$0xff] %v4158_v38  ;;  %v5562_v11 = vround.rtne.f32 %v4095_v48 }
 0x4a5   :  { %v5697_v33 = vpop.eup %5696  ;;  %v4003_v1 = vadd.f32 1.0, %v5695_v20 }
 0x4a6   :  { %v4159_v12 = vmul.f32 0.0001, %v5562_v11  ;;  %v4096_v54 = vmul.f32 10000.0, %v5697_v33 }
 0x4a7   :  { %5702 = vrcp.f32 %v4003_v1 }
 0x4a8   :  { %4191 = vst [vmem:[#allocation7 + $0xd8] sm:$0xff] %v4159_v12  ;;  %v5563_v58 = vround.rtne.f32 %v4096_v54 }
 0x4a9   :  { %v5699_v53 = vpop.eup %5698 }
 0x4aa   :  { %v4160_v5 = vmul.f32 0.0001, %v5563_v58  ;;  %v4097_v52 = vmul.f32 10000.0, %v5699_v53 }
 0x4ac   :  { %4192 = vst [vmem:[#allocation7 + $0xe0] sm:$0xff] %v4160_v5  ;;  %v5564_v0 = vround.rtne.f32 %v4097_v52 }
 0x4ad   :  { %v5701_v2 = vpop.eup %5700 }
 0x4ae   :  { %v4161_v63 = vmul.f32 0.0001, %v5564_v0  ;;  %v4098_v13 = vmul.f32 10000.0, %v5701_v2 }
 0x4b0   :  { %4193 = vst [vmem:[#allocation7 + $0xe8] sm:$0xff] %v4161_v63  ;;  %v5565_v4 = vround.rtne.f32 %v4098_v13 }
 0x4b1   :  { %v5703_v23 = vpop.eup %5702 }
 0x4b2   :  { %v4162_v55 = vmul.f32 0.0001, %v5565_v4  ;;  %v4099_v50 = vmul.f32 10000.0, %v5703_v23 }
 0x4b4   :  { %4194 = vst [vmem:[#allocation7 + $0xf0] sm:$0xff] %v4162_v55  ;;  %v5566_v46 = vround.rtne.f32 %v4099_v50 }
 0x4b6   :  { %v4163_v16 = vmul.f32 0.0001, %v5566_v46 }
 0x4b8   :  { %4195 = vst [vmem:[#allocation7 + $0xf8] sm:$0xff] %v4163_v16 }
 0x4b9   :  { %5931 = shalt.err (!%p5928_p6)
}
 0x4ba   :  { %s5932_s13 = scalar_lea.hbm %s9171_s6, 4096 }
 0x4bb   :  { %p5933_p7 = scmp.ne.s32.totalorder %s9171_s6, %s5932_s13  ;;  %p5936_p8 = scmp.lt.u32.totalorder %s5932_s13, %s9171_s6 }
 0x4bd   :  { %p5938_p9 = pnand %p5936_p8, %p5933_p7 }
 0x4bf   :  { %5941 = shalt.err (!%p5938_p9)
}
 0x4c0   :  { %4207 = dma.vmem_to_hbm [thread:$0]  %s4202_s9, 4096, %s9171_s6, [#allocation4], %s5952_s1, %s5952_s1, %s5953_s21  }
 0x4c1   :  { %5946 = dma.done.wait [#allocation4], 4096  }
 0x4c2   :  { %5947 = vsyncadd [#allocation4], 4294963200 }
 0x4c3   :  { %4211 = vsyncpa [#allocation3], 1 }
 0x4c4   :  { %4212 = vsyncpa [#allocation6], 1 }
 0x4c5   :  { %4213 = vsyncpa [#allocation4], 1 }

</bundles_post_ra>
